<compile_context>
chip_gen: v6e
topology: v6e:2x2x1
jax: 0.10.0
libtpu: 0.0.40
codegen_flags: <defaults>
</compile_context>

<pallas_src>
import functools
import math

import jax
import jax.numpy as jnp
from jax.experimental import pallas as pl
from jax.experimental.pallas import tpu as pltpu


LN_EPS = 1e-6


# --------------------------------------------------------------------------
# Small math helpers (shared by the kernels and the pure-JAX reference)
# --------------------------------------------------------------------------

def _silu(x):
    return x * jax.nn.sigmoid(x)


def _gelu_tanh(x):
    # TODO(synk): PyTorch nn.GELU defaults to erf; tanh approximation is used
    # for robust Mosaic lowering (block weights are synthetic anyway).
    return 0.5 * x * (1.0 + jnp.tanh(0.7978845608028654 * (x + 0.044715 * x * x * x)))


def _ln_mod(x, scale, shift, d_real, eps):
    """LayerNorm (no affine) over the REAL last-dim extent, then AdaLN modulate.

    Works on zero-padded lane layouts: padded lanes of `x` are exactly zero, so
    sum(x)/d_real and sum(x*x)/d_real give the true moments of the real dims.
    """
    inv_d = 1.0 / d_real
    mean = jnp.sum(x, axis=-1, keepdims=True) * inv_d
    var = jnp.sum(x * x, axis=-1, keepdims=True) * inv_d - mean * mean
    xn = (x - mean) * jax.lax.rsqrt(var + eps)
    return xn * (1.0 + scale) + shift


# --------------------------------------------------------------------------
# Pallas kernels
# --------------------------------------------------------------------------

def _cond_kernel(tsin_ref, w1_ref, b1_ref, w2_ref, b2_ref,
                 wa_ref, ba_ref, wf_ref, bf_ref,
                 ada_all_ref, ada_fin_ref):
    """Timestep projection + ALL adaLN modulation parameters, one tiny kernel.

      t_emb   = Linear(SiLU(Linear(sin_emb)))
      ada_all = SiLU(t_emb) @ W_ada_all + b          (per-layer adaLN, std DiT)
      ada_fin = t_emb @ W_fin + b                    (spec: plain Linear, no SiLU)
    """
    t = tsin_ref[...]
    h = jnp.dot(t, w1_ref[...], preferred_element_type=jnp.float32) + b1_ref[...]
    h = _silu(h)
    temb = jnp.dot(h, w2_ref[...], preferred_element_type=jnp.float32) + b2_ref[...]
    ts = _silu(temb)
    ada_all_ref[...] = (jnp.dot(ts, wa_ref[...], preferred_element_type=jnp.float32)
                        + ba_ref[...])
    ada_fin_ref[...] = (jnp.dot(temb, wf_ref[...], preferred_element_type=jnp.float32)
                        + bf_ref[...])


def _dit_stack_kernel(patches_ref, pos_ref, ada_ref, fin_ref,
                      pw_ref, pb_ref,
                      wqkv_ref, bqkv_ref, wpr_ref, bpr_ref,
                      w1_ref, b1_ref, w2_ref, b2_ref,
                      ow_ref, ob_ref,
                      o_ref, res_ref,
                      *, num_heads, d_model, eps):
    """Whole DiT token path for one (batch, layer) grid step.

    Grid = (B, L); the residual stream lives in `res_ref` (VMEM f32) across the
    inner (arbitrary) layer axis.  Patch embedding runs at l == 0; the final
    LayerNorm + modulation + out_proj run at l == L-1 (only HBM write).
    """
    layer = pl.program_id(1)
    n_layers = pl.num_programs(1)
    d_pad = res_ref.shape[-1]
    dh = d_model // num_heads
    sm_scale = 1.0 / math.sqrt(dh)

    # ---- fused patch embedding (+ positional embedding) on the first step --
    @pl.when(layer == 0)
    def _():
        p = patches_ref[...].astype(jnp.bfloat16)                  # (T, Ppad)
        emb = jnp.dot(p, pw_ref[...], preferred_element_type=jnp.float32)
        res_ref[...] = emb + pb_ref[...] + pos_ref[...]

    x = res_ref[...]                                               # (T, Dp) f32
    ada = ada_ref[...]                                             # (6, Dp) f32
    # adaLN chunk order: shift_a, scale_a, gate_a, shift_m, scale_m, gate_m

    # ---- attention branch ---------------------------------------------------
    h = _ln_mod(x, ada[1:2], ada[0:1], d_model, eps).astype(jnp.bfloat16)
    qkv = (jnp.dot(h, wqkv_ref[...], preferred_element_type=jnp.float32)
           + bqkv_ref[...])                                        # (T, 3*Dp) f32
    q = qkv[:, :d_pad]
    k = qkv[:, d_pad:2 * d_pad]
    v = qkv[:, 2 * d_pad:]
    wpr = wpr_ref[...]                                             # (Dp, Dp) bf16

    attn = None
    for hd in range(num_heads):
        lo, hi = hd * dh, (hd + 1) * dh
        qh = q[:, lo:hi].astype(jnp.bfloat16)
        kh = k[:, lo:hi].astype(jnp.bfloat16)
        vh = v[:, lo:hi].astype(jnp.bfloat16)
        # Contract on dh (TODO(synk): may lower to an XLU transpose on kh; tiny at dh=16).
        s = jax.lax.dot_general(qh, kh, (((1,), (1,)), ((), ())),
                                preferred_element_type=jnp.float32) * sm_scale
        s = s - jnp.max(s, axis=-1, keepdims=True)
        p_ = jnp.exp(s)
        p_ = p_ * pl.reciprocal(jnp.sum(p_, axis=-1, keepdims=True), approx=True)
        oh = jnp.dot(p_.astype(jnp.bfloat16), vh, preferred_element_type=jnp.float32)
        # Accumulate straight through the matching rows of W_proj (no concat).
        contrib = jnp.dot(oh.astype(jnp.bfloat16), wpr[lo:hi, :],
                          preferred_element_type=jnp.float32)
        attn = contrib if attn is None else attn + contrib
    attn = attn + bpr_ref[...]
    x = x + ada[2:3] * attn

    # ---- MLP branch ---------------------------------------------------------
    h = _ln_mod(x, ada[4:5], ada[3:4], d_model, eps).astype(jnp.bfloat16)
    h1 = _gelu_tanh(jnp.dot(h, w1_ref[...], preferred_element_type=jnp.float32)
                    + b1_ref[...])
    h2 = (jnp.dot(h1.astype(jnp.bfloat16), w2_ref[...],
                  preferred_element_type=jnp.float32) + b2_ref[...])
    x = x + ada[5:6] * h2

    res_ref[...] = x

    # ---- final head on the last layer step ----------------------------------
    @pl.when(layer == n_layers - 1)
    def _():
        fin = fin_ref[...]                           # (2, Dp): (scale, shift) per spec
        hf = _ln_mod(x, fin[0:1], fin[1:2], d_model, eps).astype(jnp.bfloat16)
        y = jnp.dot(hf, ow_ref[...], preferred_element_type=jnp.float32) + ob_ref[...]
        o_ref[...] = y.astype(o_ref.dtype)


# --------------------------------------------------------------------------
# pallas_call wrappers
# --------------------------------------------------------------------------

def pallas_cond(t_sin, kp, num_layers, d_pad):
    B, K = t_sin.shape
    Na = num_layers * 6 * d_pad
    Nf = 2 * d_pad

    def full(shape):
        return pl.BlockSpec(shape, lambda i: tuple(0 for _ in shape))

    return pl.pallas_call(
        _cond_kernel,
        out_shape=(jax.ShapeDtypeStruct((B, Na), jnp.float32),
                   jax.ShapeDtypeStruct((B, Nf), jnp.float32)),
        grid=(1,),
        in_specs=[full((B, K)),
                  full((K, d_pad)), full((1, d_pad)),
                  full((d_pad, d_pad)), full((1, d_pad)),
                  full((d_pad, Na)), full((1, Na)),
                  full((d_pad, Nf)), full((1, Nf))],
        out_specs=(full((B, Na)), full((B, Nf))),
    )(t_sin, kp['t1_w'], kp['t1_b'], kp['t2_w'], kp['t2_b'],
      kp['ada_all_w'], kp['ada_all_b'], kp['ada_fin_w'], kp['ada_fin_b'])


def pallas_dit_stack(patches, ada_all, ada_fin, kp, config):
    B, T, Pp = patches.shape
    L = ada_all.shape[1]
    Dp = kp['pos'].shape[-1]
    Dff = kp['w1'].shape[-1]
    Ppad = kp['out_w'].shape[-1]

    kernel = functools.partial(_dit_stack_kernel,
                               num_heads=config['num_heads'],
                               d_model=config['hidden_size'],
                               eps=LN_EPS)

    def fixed(shape):            # constants reused by every grid step
        return pl.BlockSpec(shape, lambda b, l: tuple(0 for _ in shape))

    def per_layer(shape):        # stacked per-layer weights, selected by l
        return pl.BlockSpec((None,) + shape,
                            lambda b, l: (l,) + tuple(0 for _ in shape))

    in_specs = [
        pl.BlockSpec((None, T, Pp), lambda b, l: (b, 0, 0)),              # patches
        fixed((T, Dp)),                                                   # pos emb
        pl.BlockSpec((None, None, 6, Dp), lambda b, l: (b, l, 0, 0)),     # per-layer adaLN
        pl.BlockSpec((None, 2, Dp), lambda b, l: (b, 0, 0)),              # final adaLN
        fixed((Pp, Dp)), fixed((1, Dp)),                                  # patch embed
        per_layer((Dp, 3 * Dp)), per_layer((1, 3 * Dp)),                  # qkv
        per_layer((Dp, Dp)), per_layer((1, Dp)),                          # attn out proj
        per_layer((Dp, Dff)), per_layer((1, Dff)),                        # mlp1
        per_layer((Dff, Dp)), per_layer((1, Dp)),                         # mlp2
        fixed((Dp, Ppad)), fixed((1, Ppad)),                              # out proj
    ]

    return pl.pallas_call(
        kernel,
        out_shape=jax.ShapeDtypeStruct((B, T, Ppad), jnp.float32),
        grid=(B, L),
        in_specs=in_specs,
        out_specs=pl.BlockSpec((None, T, Ppad), lambda b, l: (b, 0, 0)),
        scratch_shapes=[pltpu.VMEM((T, Dp), jnp.float32)],
        compiler_params=pltpu.CompilerParams(
            dimension_semantics=("parallel", "arbitrary")),
    )(patches, kp['pos'], ada_all, ada_fin,
      kp['patch_w'], kp['patch_b'],
      kp['wqkv'], kp['bqkv'], kp['wproj'], kp['bproj'],
      kp['w1'], kp['b1'], kp['w2'], kp['b2'],
      kp['out_w'], kp['out_b'])


# --------------------------------------------------------------------------
# Plain-JAX glue, parameters, padding
# --------------------------------------------------------------------------

def get_time_embedding(time_steps, temb_dim):
    assert temb_dim % 2 == 0
    half = temb_dim // 2
    factor = 10000.0 ** (jnp.arange(half, dtype=jnp.float32) / half)
    t = time_steps.astype(jnp.float32)[:, None] / factor[None, :]
    return jnp.concatenate([jnp.sin(t), jnp.cos(t)], axis=-1)


def patchify(x, ph, pw):
    # 'b c (nh ph) (nw pw) -> b (nh nw) (ph pw c)'
    B, C, H, W = x.shape
    nh, nw = H // ph, W // pw
    p = x.reshape(B, C, nh, ph, nw, pw)
    return jnp.transpose(p, (0, 2, 4, 3, 5, 1)).reshape(B, nh * nw, ph * pw * C)


def init_params(key, config, im_channels, im_size):
    """Logical (unpadded) parameters.

    TODO(synk): PatchEmbedding / TransformerLayer internals are not in the spec;
    a standard AdaLN-modulated DiT block with a sinusoidal positional embedding
    is used.  The spec zero-inits adaptive_layernorm / out_proj — synthetic
    std=0.02 weights are used instead so the numerical check is non-trivial.
    """
    D = config['hidden_size']
    ph, pw = config['patch_height'], config['patch_size']
    temb = config['timestep_emb_dim']
    L = config['num_layers']
    patch_dim = im_channels * ph * pw

    def dense(k, fi, fo, std=0.02):
        kw, kb = jax.random.split(k)
        return (jax.random.normal(kw, (fi, fo), jnp.float32) * std,
                jax.random.normal(kb, (fo,), jnp.float32) * std)

    keys = iter(jax.random.split(key, 16 + 8 * L))
    p = {}
    p['patch_w'], p['patch_b'] = dense(next(keys), patch_dim, D)
    p['t1_w'], p['t1_b'] = dense(next(keys), temb, D)
    p['t2_w'], p['t2_b'] = dense(next(keys), D, D)
    p['ada_fin_w'], p['ada_fin_b'] = dense(next(keys), D, 2 * D)
    p['out_w'], p['out_b'] = dense(next(keys), D, patch_dim)
    p['layers'] = []
    for _ in range(L):
        lp = {}
        lp['ada_w'], lp['ada_b'] = dense(next(keys), D, 6 * D)
        lp['qkv_w'], lp['qkv_b'] = dense(next(keys), D, 3 * D)
        lp['proj_w'], lp['proj_b'] = dense(next(keys), D, D)
        lp['mlp1_w'], lp['mlp1_b'] = dense(next(keys), D, 4 * D)
        lp['mlp2_w'], lp['mlp2_b'] = dense(next(keys), 4 * D, D)
        p['layers'].append(lp)
    nh, nw = im_size // ph, im_size // pw
    p['pos_emb'] = get_time_embedding(jnp.arange(nh * nw), D)
    return p


def _pad2(w, rows, cols):
    return jnp.pad(w, ((0, rows - w.shape[0]), (0, cols - w.shape[1])))


def _pad_chunk_cols(w, n_chunks, chunk_out):
    k, n = w.shape
    ci = n // n_chunks
    w = w.reshape(k, n_chunks, ci)
    return jnp.pad(w, ((0, 0), (0, 0), (0, chunk_out - ci))).reshape(k, n_chunks * chunk_out)


def _pad_chunk_vec(b, n_chunks, chunk_out):
    ci = b.shape[0] // n_chunks
    b = b.reshape(n_chunks, ci)
    return jnp.pad(b, ((0, 0), (0, chunk_out - ci))).reshape(n_chunks * chunk_out)


def prepare_kernel_params(p, config, dp, ppad):
    """Zero-pad hidden/patch dims to lane-dense widths and stack per-layer weights."""
    D = config['hidden_size']
    dff = 4 * D
    bf = jnp.bfloat16
    kp = {}
    # conditioning path (tiny, kept f32)
    kp['t1_w'] = _pad2(p['t1_w'], p['t1_w'].shape[0], dp)
    kp['t1_b'] = _pad2(p['t1_b'][None, :], 1, dp)
    kp['t2_w'] = _pad2(p['t2_w'], dp, dp)
    kp['t2_b'] = _pad2(p['t2_b'][None, :], 1, dp)
    ada_ws = [_pad2(_pad_chunk_cols(lp['ada_w'], 6, dp), dp, 6 * dp) for lp in p['layers']]
    ada_bs = [_pad_chunk_vec(lp['ada_b'], 6, dp) for lp in p['layers']]
    kp['ada_all_w'] = jnp.concatenate(ada_ws, axis=1)
    kp['ada_all_b'] = jnp.concatenate(ada_bs, axis=0)[None, :]
    kp['ada_fin_w'] = _pad2(_pad_chunk_cols(p['ada_fin_w'], 2, dp), dp, 2 * dp)
    kp['ada_fin_b'] = _pad_chunk_vec(p['ada_fin_b'], 2, dp)[None, :]
    # token path (bf16 GEMM weights, f32 biases)
    kp['patch_w'] = _pad2(p['patch_w'], ppad, dp).astype(bf)
    kp['patch_b'] = _pad2(p['patch_b'][None, :], 1, dp)
    kp['pos'] = _pad2(p['pos_emb'], p['pos_emb'].shape[0], dp)
    layers = p['layers']
    kp['wqkv'] = jnp.stack([_pad2(_pad_chunk_cols(lp['qkv_w'], 3, dp), dp, 3 * dp)
                            for lp in layers]).astype(bf)
    kp['bqkv'] = jnp.stack([_pad_chunk_vec(lp['qkv_b'], 3, dp) for lp in layers])[:, None, :]
    kp['wproj'] = jnp.stack([_pad2(lp['proj_w'], dp, dp) for lp in layers]).astype(bf)
    kp['bproj'] = jnp.stack([_pad2(lp['proj_b'][None, :], 1, dp) for lp in layers])
    kp['w1'] = jnp.stack([_pad2(lp['mlp1_w'], dp, dff) for lp in layers]).astype(bf)
    kp['b1'] = jnp.stack([lp['mlp1_b'][None, :] for lp in layers])
    kp['w2'] = jnp.stack([_pad2(lp['mlp2_w'], dff, dp) for lp in layers]).astype(bf)
    kp['b2'] = jnp.stack([_pad2(lp['mlp2_b'][None, :], 1, dp) for lp in layers])
    kp['out_w'] = _pad2(p['out_w'], dp, ppad).astype(bf)
    kp['out_b'] = _pad2(p['out_b'][None, :], 1, ppad)
    return kp


def dit_forward(kp, x, t, config):
    B, C, H, W = x.shape
    ph, pw = config['patch_height'], config['patch_size']
    L = config['num_layers']
    patch_dim = C * ph * pw
    d_pad = kp['pos'].shape[-1]
    p_pad = kp['patch_w'].shape[0]

    # TODO(synk): patchify kept as a plain XLA relayout — trivial at these shapes;
    # at real latent resolutions it would be folded into the patch-embed DMA.
    patches = patchify(x, ph, pw)
    patches = jnp.pad(patches, ((0, 0), (0, 0), (0, p_pad - patch_dim)))

    t_sin = get_time_embedding(t.astype(jnp.int32), config['timestep_emb_dim'])
    ada_all, ada_fin = pallas_cond(t_sin, kp, L, d_pad)
    ada_all = ada_all.reshape(B, L, 6, d_pad)
    ada_fin = ada_fin.reshape(B, 2, d_pad)

    out = pallas_dit_stack(patches, ada_all, ada_fin, kp, config)
    # PyTorch forward returns (B, nh*nw, c*ph*pw) (its final rearrange is discarded).
    return out[:, :, :patch_dim]


# --------------------------------------------------------------------------
# Pure-JAX reference (mirrors the kernel's bf16 cast points, unpadded weights)
# --------------------------------------------------------------------------

def dit_forward_ref(p, x, t, config):
    D = config['hidden_size']
    H_ = config['num_heads']
    ph, pw = config['patch_height'], config['patch_size']
    dh = D // H_
    bf = jnp.bfloat16

    patches = patchify(x, ph, pw)
    out = (jnp.dot(patches.astype(bf), p['patch_w'].astype(bf),
                   preferred_element_type=jnp.float32)
           + p['patch_b'] + p['pos_emb'][None])

    t_sin = get_time_embedding(t.astype(jnp.int32), config['timestep_emb_dim'])
    h = _silu(jnp.dot(t_sin, p['t1_w']) + p['t1_b'])
    temb = jnp.dot(h, p['t2_w']) + p['t2_b']
    ts = _silu(temb)

    for lp in p['layers']:
        ada = jnp.dot(ts, lp['ada_w']) + lp['ada_b']
        sh_a, sc_a, g_a, sh_m, sc_m, g_m = jnp.split(ada, 6, axis=-1)
        hN = _ln_mod(out, sc_a[:, None, :], sh_a[:, None, :], D, LN_EPS)
        qkv = (jnp.dot(hN.astype(bf), lp['qkv_w'].astype(bf),
                       preferred_element_type=jnp.float32) + lp['qkv_b'])
        q, k, v = jnp.split(qkv, 3, axis=-1)
        B_, T_, _ = q.shape
        q = q.reshape(B_, T_, H_, dh).transpose(0, 2, 1, 3)
        k = k.reshape(B_, T_, H_, dh).transpose(0, 2, 1, 3)
        v = v.reshape(B_, T_, H_, dh).transpose(0, 2, 1, 3)
        s = jnp.einsum('bhqd,bhkd->bhqk', q.astype(bf), k.astype(bf),
                       preferred_element_type=jnp.float32) / math.sqrt(dh)
        pr = jax.nn.softmax(s, axis=-1)
        o = jnp.einsum('bhqk,bhkd->bhqd', pr.astype(bf), v.astype(bf),
                       preferred_element_type=jnp.float32)
        o = o.transpose(0, 2, 1, 3).reshape(B_, T_, D)
        o = (jnp.dot(o.astype(bf), lp['proj_w'].astype(bf),
                     preferred_element_type=jnp.float32) + lp['proj_b'])
        out = out + g_a[:, None, :] * o
        hN = _ln_mod(out, sc_m[:, None, :], sh_m[:, None, :], D, LN_EPS)
        h1 = _gelu_tanh(jnp.dot(hN.astype(bf), lp['mlp1_w'].astype(bf),
                                preferred_element_type=jnp.float32) + lp['mlp1_b'])
        h2 = (jnp.dot(h1.astype(bf), lp['mlp2_w'].astype(bf),
                      preferred_element_type=jnp.float32) + lp['mlp2_b'])
        out = out + g_m[:, None, :] * h2

    # Spec: plain Linear on t_emb, chunk order = (scale, shift).
    fin = jnp.dot(temb, p['ada_fin_w']) + p['ada_fin_b']
    sc_f, sh_f = jnp.split(fin, 2, axis=-1)
    out = _ln_mod(out, sc_f[:, None, :], sh_f[:, None, :], D, LN_EPS)
    out = (jnp.dot(out.astype(bf), p['out_w'].astype(bf),
                   preferred_element_type=jnp.float32) + p['out_b'])
    return out


# --------------------------------------------------------------------------
# Main
# --------------------------------------------------------------------------

if __name__ == "__main__":
    config = dict(
        hidden_size=64,
        patch_size=4,
        patch_height=4,
        timestep_emb_dim=64,
        num_layers=2,
        num_heads=4,
    )
    B, C, IM = 2, 4, 16
    D_PAD = 128      # lane-dense padded hidden dim
    P_PAD = 128      # lane-dense padded patch dim

    key = jax.random.PRNGKey(0)
    k_param, k_x = jax.random.split(key)
    params = init_params(k_param, config, im_channels=C, im_size=IM)
    kparams = prepare_kernel_params(params, config, D_PAD, P_PAD)

    x = jax.random.normal(k_x, (B, C, IM, IM), dtype=jnp.float32)
    t = jnp.array([1, 500], dtype=jnp.int32)

    fwd = jax.jit(functools.partial(dit_forward, config=config))
    out = jax.block_until_ready(fwd(kparams, x, t))

    expected_shape = (B, (IM // 4) * (IM // 4), C * 4 * 4)   # (2, 16, 64)
    assert out.shape == expected_shape, out.shape
    assert bool(jnp.all(jnp.isfinite(out)))

    # Tolerance-asserted pure-JAX reference check (validates padding scheme too).
    ref_fn = jax.jit(functools.partial(dit_forward_ref, config=config))
    ref = jax.block_until_ready(ref_fn(params, x, t))
    max_err = float(jnp.max(jnp.abs(out - ref)))
    assert max_err < 1e-2, f"max |pallas - ref| = {max_err}"

    print("KERNEL_OK")
</pallas_src>

<mosaic_0001>
module attributes {stable_mosaic.version = 11 : i64} {
  func.func @_cond_kernel(%arg0: i32, %arg1: memref<2x64xf32, #tpu.memory_space<vmem>>, %arg2: memref<64x128xf32, #tpu.memory_space<vmem>>, %arg3: memref<1x128xf32, #tpu.memory_space<vmem>>, %arg4: memref<128x128xf32, #tpu.memory_space<vmem>>, %arg5: memref<1x128xf32, #tpu.memory_space<vmem>>, %arg6: memref<128x1536xf32, #tpu.memory_space<vmem>>, %arg7: memref<1x1536xf32, #tpu.memory_space<vmem>>, %arg8: memref<128x256xf32, #tpu.memory_space<vmem>>, %arg9: memref<1x256xf32, #tpu.memory_space<vmem>>, %arg10: memref<2x1536xf32, #tpu.memory_space<vmem>>, %arg11: memref<2x256xf32, #tpu.memory_space<vmem>>) attributes {dimension_semantics = [#tpu.dimension_semantics<arbitrary>], iteration_bounds = array<i64: 1>, scalar_prefetch = 0 : i64, scratch_operands = 0 : i64, tpu.core_type = #tpu.core_type<tc>, window_params = [{pipeline_mode = #tpu.pipeline_mode<synchronous>, transform_indices = @transform_0, window_bounds = array<i64: 2, 64>}, {pipeline_mode = #tpu.pipeline_mode<synchronous>, transform_indices = @transform_1, window_bounds = array<i64: 64, 128>}, {pipeline_mode = #tpu.pipeline_mode<synchronous>, transform_indices = @transform_2, window_bounds = array<i64: 1, 128>}, {pipeline_mode = #tpu.pipeline_mode<synchronous>, transform_indices = @transform_3, window_bounds = array<i64: 128, 128>}, {pipeline_mode = #tpu.pipeline_mode<synchronous>, transform_indices = @transform_4, window_bounds = array<i64: 1, 128>}, {pipeline_mode = #tpu.pipeline_mode<synchronous>, transform_indices = @transform_5, window_bounds = array<i64: 128, 1536>}, {pipeline_mode = #tpu.pipeline_mode<synchronous>, transform_indices = @transform_6, window_bounds = array<i64: 1, 1536>}, {pipeline_mode = #tpu.pipeline_mode<synchronous>, transform_indices = @transform_7, window_bounds = array<i64: 128, 256>}, {pipeline_mode = #tpu.pipeline_mode<synchronous>, transform_indices = @transform_8, window_bounds = array<i64: 1, 256>}, {pipeline_mode = #tpu.pipeline_mode<synchronous>, transform_indices = @transform_9, window_bounds = array<i64: 2, 1536>}, {pipeline_mode = #tpu.pipeline_mode<synchronous>, transform_indices = @transform_10, window_bounds = array<i64: 2, 256>}]} {
    %c0 = arith.constant 0 : index
    %c0_0 = arith.constant 0 : index
    %0 = vector.load %arg1[%c0, %c0_0] : memref<2x64xf32, #tpu.memory_space<vmem>>, vector<2x64xf32>
    %c0_1 = arith.constant 0 : index
    %c0_2 = arith.constant 0 : index
    %1 = vector.load %arg2[%c0_1, %c0_2] : memref<64x128xf32, #tpu.memory_space<vmem>>, vector<64x128xf32>
    %cst = arith.constant dense<0.000000e+00> : vector<2x128xf32>
    %2 = tpu.matmul %0, %1, %cst {dimension_numbers = #tpu.dot_dimension_numbers<[1], [0], [0], [1], [0, 0, 1, 1], [], []>} : vector<2x64xf32>, vector<64x128xf32>, vector<2x128xf32> -> vector<2x128xf32>
    %c0_3 = arith.constant 0 : index
    %c0_4 = arith.constant 0 : index
    %3 = vector.load %arg3[%c0_3, %c0_4] : memref<1x128xf32, #tpu.memory_space<vmem>>, vector<1x128xf32>
    %4 = vector.broadcast %3 : vector<1x128xf32> to vector<2x128xf32>
    %5 = arith.addf %2, %4 : vector<2x128xf32>
    %6 = arith.negf %5 : vector<2x128xf32>
    %7 = math.exp %6 : vector<2x128xf32>
    %cst_5 = arith.constant 1.000000e+00 : f32
    %8 = vector.broadcast %cst_5 : f32 to vector<2x128xf32>
    %9 = arith.addf %8, %7 : vector<2x128xf32>
    %10 = arith.divf %8, %9 : vector<2x128xf32>
    %11 = arith.mulf %5, %10 : vector<2x128xf32>
    %c0_6 = arith.constant 0 : index
    %c0_7 = arith.constant 0 : index
    %12 = vector.load %arg4[%c0_6, %c0_7] : memref<128x128xf32, #tpu.memory_space<vmem>>, vector<128x128xf32>
    %cst_8 = arith.constant dense<0.000000e+00> : vector<2x128xf32>
    %13 = tpu.matmul %11, %12, %cst_8 {dimension_numbers = #tpu.dot_dimension_numbers<[1], [0], [0], [1], [0, 0, 1, 1], [], []>} : vector<2x128xf32>, vector<128x128xf32>, vector<2x128xf32> -> vector<2x128xf32>
    %c0_9 = arith.constant 0 : index
    %c0_10 = arith.constant 0 : index
    %14 = vector.load %arg5[%c0_9, %c0_10] : memref<1x128xf32, #tpu.memory_space<vmem>>, vector<1x128xf32>
    %15 = vector.broadcast %14 : vector<1x128xf32> to vector<2x128xf32>
    %16 = arith.addf %13, %15 : vector<2x128xf32>
    %17 = arith.negf %16 : vector<2x128xf32>
    %18 = math.exp %17 : vector<2x128xf32>
    %cst_11 = arith.constant 1.000000e+00 : f32
    %19 = vector.broadcast %cst_11 : f32 to vector<2x128xf32>
    %20 = arith.addf %19, %18 : vector<2x128xf32>
    %21 = arith.divf %19, %20 : vector<2x128xf32>
    %22 = arith.mulf %16, %21 : vector<2x128xf32>
    %c0_12 = arith.constant 0 : index
    %c0_13 = arith.constant 0 : index
    %23 = vector.load %arg6[%c0_12, %c0_13] : memref<128x1536xf32, #tpu.memory_space<vmem>>, vector<128x1536xf32>
    %cst_14 = arith.constant dense<0.000000e+00> : vector<2x1536xf32>
    %24 = tpu.matmul %22, %23, %cst_14 {dimension_numbers = #tpu.dot_dimension_numbers<[1], [0], [0], [1], [0, 0, 1, 1], [], []>} : vector<2x128xf32>, vector<128x1536xf32>, vector<2x1536xf32> -> vector<2x1536xf32>
    %c0_15 = arith.constant 0 : index
    %c0_16 = arith.constant 0 : index
    %25 = vector.load %arg7[%c0_15, %c0_16] : memref<1x1536xf32, #tpu.memory_space<vmem>>, vector<1x1536xf32>
    %26 = vector.broadcast %25 : vector<1x1536xf32> to vector<2x1536xf32>
    %27 = arith.addf %24, %26 : vector<2x1536xf32>
    %c0_17 = arith.constant 0 : index
    %c0_18 = arith.constant 0 : index
    %28 = vector.load %arg10[%c0_17, %c0_18] : memref<2x1536xf32, #tpu.memory_space<vmem>>, vector<2x1536xf32>
    tpu.vector_store %arg10[%c0_17, %c0_18], %27 {strides = array<i32>} : memref<2x1536xf32, #tpu.memory_space<vmem>>, vector<2x1536xf32>,
    %c0_19 = arith.constant 0 : index
    %c0_20 = arith.constant 0 : index
    %29 = vector.load %arg8[%c0_19, %c0_20] : memref<128x256xf32, #tpu.memory_space<vmem>>, vector<128x256xf32>
    %cst_21 = arith.constant dense<0.000000e+00> : vector<2x256xf32>
    %30 = tpu.matmul %16, %29, %cst_21 {dimension_numbers = #tpu.dot_dimension_numbers<[1], [0], [0], [1], [0, 0, 1, 1], [], []>} : vector<2x128xf32>, vector<128x256xf32>, vector<2x256xf32> -> vector<2x256xf32>
    %c0_22 = arith.constant 0 : index
    %c0_23 = arith.constant 0 : index
    %31 = vector.load %arg9[%c0_22, %c0_23] : memref<1x256xf32, #tpu.memory_space<vmem>>, vector<1x256xf32>
    %32 = vector.broadcast %31 : vector<1x256xf32> to vector<2x256xf32>
    %33 = arith.addf %30, %32 : vector<2x256xf32>
    %c0_24 = arith.constant 0 : index
    %c0_25 = arith.constant 0 : index
    %34 = vector.load %arg11[%c0_24, %c0_25] : memref<2x256xf32, #tpu.memory_space<vmem>>, vector<2x256xf32>
    tpu.vector_store %arg11[%c0_24, %c0_25], %33 {strides = array<i32>} : memref<2x256xf32, #tpu.memory_space<vmem>>, vector<2x256xf32>,
    return
  }
  func.func @transform_0(%arg0: i32) -> (i32, i32) {
    %c0_i32 = arith.constant 0 : i32
    %c0_i32_0 = arith.constant 0 : i32
    %c0_i32_1 = arith.constant 0 : i32
    return %c0_i32, %c0_i32_0 : i32, i32
  }
  func.func @transform_1(%arg0: i32) -> (i32, i32) {
    %c0_i32 = arith.constant 0 : i32
    %c0_i32_0 = arith.constant 0 : i32
    %c0_i32_1 = arith.constant 0 : i32
    return %c0_i32, %c0_i32_0 : i32, i32
  }
  func.func @transform_2(%arg0: i32) -> (i32, i32) {
    %c0_i32 = arith.constant 0 : i32
    %c0_i32_0 = arith.constant 0 : i32
    %c0_i32_1 = arith.constant 0 : i32
    return %c0_i32, %c0_i32_0 : i32, i32
  }
  func.func @transform_3(%arg0: i32) -> (i32, i32) {
    %c0_i32 = arith.constant 0 : i32
    %c0_i32_0 = arith.constant 0 : i32
    %c0_i32_1 = arith.constant 0 : i32
    return %c0_i32, %c0_i32_0 : i32, i32
  }
  func.func @transform_4(%arg0: i32) -> (i32, i32) {
    %c0_i32 = arith.constant 0 : i32
    %c0_i32_0 = arith.constant 0 : i32
    %c0_i32_1 = arith.constant 0 : i32
    return %c0_i32, %c0_i32_0 : i32, i32
  }
  func.func @transform_5(%arg0: i32) -> (i32, i32) {
    %c0_i32 = arith.constant 0 : i32
    %c0_i32_0 = arith.constant 0 : i32
    %c0_i32_1 = arith.constant 0 : i32
    return %c0_i32, %c0_i32_0 : i32, i32
  }
  func.func @transform_6(%arg0: i32) -> (i32, i32) {
    %c0_i32 = arith.constant 0 : i32
    %c0_i32_0 = arith.constant 0 : i32
    %c0_i32_1 = arith.constant 0 : i32
    return %c0_i32, %c0_i32_0 : i32, i32
  }
  func.func @transform_7(%arg0: i32) -> (i32, i32) {
    %c0_i32 = arith.constant 0 : i32
    %c0_i32_0 = arith.constant 0 : i32
    %c0_i32_1 = arith.constant 0 : i32
    return %c0_i32, %c0_i32_0 : i32, i32
  }
  func.func @transform_8(%arg0: i32) -> (i32, i32) {
    %c0_i32 = arith.constant 0 : i32
    %c0_i32_0 = arith.constant 0 : i32
    %c0_i32_1 = arith.constant 0 : i32
    return %c0_i32, %c0_i32_0 : i32, i32
  }
  func.func @transform_9(%arg0: i32) -> (i32, i32) {
    %c0_i32 = arith.constant 0 : i32
    %c0_i32_0 = arith.constant 0 : i32
    %c0_i32_1 = arith.constant 0 : i32
    return %c0_i32, %c0_i32_0 : i32, i32
  }
  func.func @transform_10(%arg0: i32) -> (i32, i32) {
    %c0_i32 = arith.constant 0 : i32
    %c0_i32_0 = arith.constant 0 : i32
    %c0_i32_1 = arith.constant 0 : i32
    return %c0_i32, %c0_i32_0 : i32, i32
  }
}

module attributes {stable_mosaic.version = 11 : i64} {
  func.func @_dit_stack_kernel(%arg0: i32, %arg1: i32, %arg2: memref<1x16x128xf32, #tpu.memory_space<vmem>>, %arg3: memref<16x128xf32, #tpu.memory_space<vmem>>, %arg4: memref<1x1x6x128xf32, #tpu.memory_space<vmem>>, %arg5: memref<1x2x128xf32, #tpu.memory_space<vmem>>, %arg6: memref<128x128xbf16, #tpu.memory_space<vmem>>, %arg7: memref<1x128xf32, #tpu.memory_space<vmem>>, %arg8: memref<1x128x384xbf16, #tpu.memory_space<vmem>>, %arg9: memref<1x1x384xf32, #tpu.memory_space<vmem>>, %arg10: memref<1x128x128xbf16, #tpu.memory_space<vmem>>, %arg11: memref<1x1x128xf32, #tpu.memory_space<vmem>>, %arg12: memref<1x128x256xbf16, #tpu.memory_space<vmem>>, %arg13: memref<1x1x256xf32, #tpu.memory_space<vmem>>, %arg14: memref<1x256x128xbf16, #tpu.memory_space<vmem>>, %arg15: memref<1x1x128xf32, #tpu.memory_space<vmem>>, %arg16: memref<128x128xbf16, #tpu.memory_space<vmem>>, %arg17: memref<1x128xf32, #tpu.memory_space<vmem>>, %arg18: memref<1x16x128xf32, #tpu.memory_space<vmem>>, %arg19: memref<16x128xf32, #tpu.memory_space<vmem>>) attributes {dimension_semantics = [#tpu.dimension_semantics<parallel>, #tpu.dimension_semantics<arbitrary>], iteration_bounds = array<i64: 2, 2>, scalar_prefetch = 0 : i64, scratch_operands = 1 : i64, tpu.core_type = #tpu.core_type<tc>, window_params = [{transform_indices = @transform_0, window_bounds = array<i64: 1, 16, 128>}, {pipeline_mode = #tpu.pipeline_mode<synchronous>, transform_indices = @transform_1, window_bounds = array<i64: 16, 128>}, {transform_indices = @transform_2, window_bounds = array<i64: 1, 1, 6, 128>}, {transform_indices = @transform_3, window_bounds = array<i64: 1, 2, 128>}, {pipeline_mode = #tpu.pipeline_mode<synchronous>, transform_indices = @transform_4, window_bounds = array<i64: 128, 128>}, {pipeline_mode = #tpu.pipeline_mode<synchronous>, transform_indices = @transform_5, window_bounds = array<i64: 1, 128>}, {transform_indices = @transform_6, window_bounds = array<i64: 1, 128, 384>}, {transform_indices = @transform_7, window_bounds = array<i64: 1, 1, 384>}, {transform_indices = @transform_8, window_bounds = array<i64: 1, 128, 128>}, {transform_indices = @transform_9, window_bounds = array<i64: 1, 1, 128>}, {transform_indices = @transform_10, window_bounds = array<i64: 1, 128, 256>}, {transform_indices = @transform_11, window_bounds = array<i64: 1, 1, 256>}, {transform_indices = @transform_12, window_bounds = array<i64: 1, 256, 128>}, {transform_indices = @transform_13, window_bounds = array<i64: 1, 1, 128>}, {pipeline_mode = #tpu.pipeline_mode<synchronous>, transform_indices = @transform_14, window_bounds = array<i64: 128, 128>}, {pipeline_mode = #tpu.pipeline_mode<synchronous>, transform_indices = @transform_15, window_bounds = array<i64: 1, 128>}, {transform_indices = @transform_16, window_bounds = array<i64: 1, 16, 128>}]} {
    %c0_i32 = arith.constant 0 : i32
    %0 = arith.cmpi eq, %arg1, %c0_i32 : i32
    %1 = arith.extui %0 : i1 to i32
    %c0_i32_0 = arith.constant 0 : i32
    %2 = arith.cmpi ne, %1, %c0_i32_0 : i32
    scf.if %2 {
      %c0_75 = arith.constant 0 : index
      %c0_76 = arith.constant 0 : index
      %c0_77 = arith.constant 0 : index
      %215 = vector.load %arg2[%c0_75, %c0_76, %c0_77] : memref<1x16x128xf32, #tpu.memory_space<vmem>>, vector<1x16x128xf32>
      %216 = vector.shape_cast %215 : vector<1x16x128xf32> to vector<16x128xf32>
      %217 = arith.truncf %216 : vector<16x128xf32> to vector<16x128xbf16>
      %c0_78 = arith.constant 0 : index
      %c0_79 = arith.constant 0 : index
      %218 = vector.load %arg6[%c0_78, %c0_79] : memref<128x128xbf16, #tpu.memory_space<vmem>>, vector<128x128xbf16>
      %cst_80 = arith.constant dense<0.000000e+00> : vector<16x128xf32>
      %219 = tpu.matmul %217, %218, %cst_80 {dimension_numbers = #tpu.dot_dimension_numbers<[1], [0], [0], [1], [0, 0, 1, 1], [], []>} : vector<16x128xbf16>, vector<128x128xbf16>, vector<16x128xf32> -> vector<16x128xf32>
      %c0_81 = arith.constant 0 : index
      %c0_82 = arith.constant 0 : index
      %220 = vector.load %arg7[%c0_81, %c0_82] : memref<1x128xf32, #tpu.memory_space<vmem>>, vector<1x128xf32>
      %221 = vector.broadcast %220 : vector<1x128xf32> to vector<16x128xf32>
      %222 = arith.addf %219, %221 : vector<16x128xf32>
      %c0_83 = arith.constant 0 : index
      %c0_84 = arith.constant 0 : index
      %223 = vector.load %arg3[%c0_83, %c0_84] : memref<16x128xf32, #tpu.memory_space<vmem>>, vector<16x128xf32>
      %224 = arith.addf %222, %223 : vector<16x128xf32>
      %c0_85 = arith.constant 0 : index
      %c0_86 = arith.constant 0 : index
      %225 = vector.load %arg19[%c0_85, %c0_86] : memref<16x128xf32, #tpu.memory_space<vmem>>, vector<16x128xf32>
      tpu.vector_store %arg19[%c0_85, %c0_86], %224 {strides = array<i32>} : memref<16x128xf32, #tpu.memory_space<vmem>>, vector<16x128xf32>,
    } else {
    }
    %c0 = arith.constant 0 : index
    %c0_1 = arith.constant 0 : index
    %3 = vector.load %arg19[%c0, %c0_1] : memref<16x128xf32, #tpu.memory_space<vmem>>, vector<16x128xf32>
    %c0_2 = arith.constant 0 : index
    %c0_3 = arith.constant 0 : index
    %c0_4 = arith.constant 0 : index
    %c0_5 = arith.constant 0 : index
    %4 = vector.load %arg4[%c0_2, %c0_3, %c0_4, %c0_5] : memref<1x1x6x128xf32, #tpu.memory_space<vmem>>, vector<1x1x6x128xf32>
    %5 = vector.shape_cast %4 : vector<1x1x6x128xf32> to vector<6x128xf32>
    %6 = vector.extract_strided_slice %5 {offsets = [1, 0], sizes = [1, 128], strides = [1, 1]} : vector<6x128xf32> to vector<1x128xf32>
    %7 = vector.extract_strided_slice %5 {offsets = [0, 0], sizes = [1, 128], strides = [1, 1]} : vector<6x128xf32> to vector<1x128xf32>
    %cst = arith.constant dense<0.000000e+00> : vector<16xf32>
    %8 = vector.multi_reduction <add>, %3, %cst [1] : vector<16x128xf32> to vector<16xf32>
    %9 = vector.shape_cast %8 : vector<16xf32> to vector<16x1xf32>
    %cst_6 = arith.constant 1.562500e-02 : f32
    %10 = vector.broadcast %cst_6 : f32 to vector<16x1xf32>
    %11 = arith.mulf %9, %10 : vector<16x1xf32>
    %12 = arith.mulf %3, %3 : vector<16x128xf32>
    %cst_7 = arith.constant dense<0.000000e+00> : vector<16xf32>
    %13 = vector.multi_reduction <add>, %12, %cst_7 [1] : vector<16x128xf32> to vector<16xf32>
    %14 = vector.shape_cast %13 : vector<16xf32> to vector<16x1xf32>
    %cst_8 = arith.constant 1.562500e-02 : f32
    %15 = vector.broadcast %cst_8 : f32 to vector<16x1xf32>
    %16 = arith.mulf %14, %15 : vector<16x1xf32>
    %17 = arith.mulf %11, %11 : vector<16x1xf32>
    %18 = arith.subf %16, %17 : vector<16x1xf32>
    %19 = vector.broadcast %11 : vector<16x1xf32> to vector<16x128xf32>
    %20 = arith.subf %3, %19 : vector<16x128xf32>
    %cst_9 = arith.constant 9.99999997E-7 : f32
    %21 = vector.broadcast %cst_9 : f32 to vector<16x1xf32>
    %22 = arith.addf %18, %21 : vector<16x1xf32>
    %23 = math.rsqrt %22 : vector<16x1xf32>
    %24 = vector.broadcast %23 : vector<16x1xf32> to vector<16x128xf32>
    %25 = arith.mulf %20, %24 : vector<16x128xf32>
    %cst_10 = arith.constant 1.000000e+00 : f32
    %26 = vector.broadcast %cst_10 : f32 to vector<1x128xf32>
    %27 = arith.addf %26, %6 : vector<1x128xf32>
    %28 = vector.broadcast %27 : vector<1x128xf32> to vector<16x128xf32>
    %29 = arith.mulf %25, %28 : vector<16x128xf32>
    %30 = vector.broadcast %7 : vector<1x128xf32> to vector<16x128xf32>
    %31 = arith.addf %29, %30 : vector<16x128xf32>
    %32 = arith.truncf %31 : vector<16x128xf32> to vector<16x128xbf16>
    %c0_11 = arith.constant 0 : index
    %c0_12 = arith.constant 0 : index
    %c0_13 = arith.constant 0 : index
    %33 = vector.load %arg8[%c0_11, %c0_12, %c0_13] : memref<1x128x384xbf16, #tpu.memory_space<vmem>>, vector<1x128x384xbf16>
    %34 = vector.shape_cast %33 : vector<1x128x384xbf16> to vector<128x384xbf16>
    %cst_14 = arith.constant dense<0.000000e+00> : vector<16x384xf32>
    %35 = tpu.matmul %32, %34, %cst_14 {dimension_numbers = #tpu.dot_dimension_numbers<[1], [0], [0], [1], [0, 0, 1, 1], [], []>} : vector<16x128xbf16>, vector<128x384xbf16>, vector<16x384xf32> -> vector<16x384xf32>
    %c0_15 = arith.constant 0 : index
    %c0_16 = arith.constant 0 : index
    %c0_17 = arith.constant 0 : index
    %36 = vector.load %arg9[%c0_15, %c0_16, %c0_17] : memref<1x1x384xf32, #tpu.memory_space<vmem>>, vector<1x1x384xf32>
    %37 = vector.shape_cast %36 : vector<1x1x384xf32> to vector<1x384xf32>
    %38 = vector.broadcast %37 : vector<1x384xf32> to vector<16x384xf32>
    %39 = arith.addf %35, %38 : vector<16x384xf32>
    %40 = vector.extract_strided_slice %39 {offsets = [0, 0], sizes = [16, 128], strides = [1, 1]} : vector<16x384xf32> to vector<16x128xf32>
    %41 = vector.extract_strided_slice %39 {offsets = [0, 128], sizes = [16, 128], strides = [1, 1]} : vector<16x384xf32> to vector<16x128xf32>
    %42 = vector.extract_strided_slice %39 {offsets = [0, 256], sizes = [16, 128], strides = [1, 1]} : vector<16x384xf32> to vector<16x128xf32>
    %c0_18 = arith.constant 0 : index
    %c0_19 = arith.constant 0 : index
    %c0_20 = arith.constant 0 : index
    %43 = vector.load %arg10[%c0_18, %c0_19, %c0_20] : memref<1x128x128xbf16, #tpu.memory_space<vmem>>, vector<1x128x128xbf16>
    %44 = vector.shape_cast %43 : vector<1x128x128xbf16> to vector<128x128xbf16>
    %45 = vector.extract_strided_slice %40 {offsets = [0, 0], sizes = [16, 16], strides = [1, 1]} : vector<16x128xf32> to vector<16x16xf32>
    %46 = arith.truncf %45 : vector<16x16xf32> to vector<16x16xbf16>
    %47 = vector.extract_strided_slice %41 {offsets = [0, 0], sizes = [16, 16], strides = [1, 1]} : vector<16x128xf32> to vector<16x16xf32>
    %48 = arith.truncf %47 : vector<16x16xf32> to vector<16x16xbf16>
    %49 = vector.extract_strided_slice %42 {offsets = [0, 0], sizes = [16, 16], strides = [1, 1]} : vector<16x128xf32> to vector<16x16xf32>
    %50 = arith.truncf %49 : vector<16x16xf32> to vector<16x16xbf16>
    %cst_21 = arith.constant dense<0.000000e+00> : vector<16x16xf32>
    %51 = tpu.matmul %46, %48, %cst_21 {dimension_numbers = #tpu.dot_dimension_numbers<[1], [1], [0], [0], [0, 0, 1, 0], [], []>} : vector<16x16xbf16>, vector<16x16xbf16>, vector<16x16xf32> -> vector<16x16xf32>
    %cst_22 = arith.constant 2.500000e-01 : f32
    %52 = vector.broadcast %cst_22 : f32 to vector<16x16xf32>
    %53 = arith.mulf %51, %52 : vector<16x16xf32>
    %cst_23 = arith.constant dense<0xFF800000> : vector<16xf32>
    %54 = vector.multi_reduction <maximumf>, %53, %cst_23 [1] : vector<16x16xf32> to vector<16xf32>
    %55 = vector.shape_cast %54 : vector<16xf32> to vector<16x1xf32>
    %56 = vector.broadcast %55 : vector<16x1xf32> to vector<16x16xf32>
    %57 = arith.subf %53, %56 : vector<16x16xf32>
    %58 = math.exp %57 : vector<16x16xf32>
    %cst_24 = arith.constant dense<0.000000e+00> : vector<16xf32>
    %59 = vector.multi_reduction <add>, %58, %cst_24 [1] : vector<16x16xf32> to vector<16xf32>
    %60 = vector.shape_cast %59 : vector<16xf32> to vector<16x1xf32>
    %61 = tpu.reciprocal %60 {approx = true} : vector<16x1xf32> -> vector<16x1xf32>
    %62 = vector.broadcast %61 : vector<16x1xf32> to vector<16x16xf32>
    %63 = arith.mulf %58, %62 : vector<16x16xf32>
    %64 = arith.truncf %63 : vector<16x16xf32> to vector<16x16xbf16>
    %cst_25 = arith.constant dense<0.000000e+00> : vector<16x16xf32>
    %65 = tpu.matmul %64, %50, %cst_25 {dimension_numbers = #tpu.dot_dimension_numbers<[1], [0], [0], [1], [0, 0, 1, 1], [], []>} : vector<16x16xbf16>, vector<16x16xbf16>, vector<16x16xf32> -> vector<16x16xf32>
    %66 = arith.truncf %65 : vector<16x16xf32> to vector<16x16xbf16>
    %67 = vector.extract_strided_slice %44 {offsets = [0, 0], sizes = [16, 128], strides = [1, 1]} : vector<128x128xbf16> to vector<16x128xbf16>
    %cst_26 = arith.constant dense<0.000000e+00> : vector<16x128xf32>
    %68 = tpu.matmul %66, %67, %cst_26 {dimension_numbers = #tpu.dot_dimension_numbers<[1], [0], [0], [1], [0, 0, 1, 1], [], []>} : vector<16x16xbf16>, vector<16x128xbf16>, vector<16x128xf32> -> vector<16x128xf32>
    %69 = vector.extract_strided_slice %40 {offsets = [0, 16], sizes = [16, 16], strides = [1, 1]} : vector<16x128xf32> to vector<16x16xf32>
    %70 = arith.truncf %69 : vector<16x16xf32> to vector<16x16xbf16>
    %71 = vector.extract_strided_slice %41 {offsets = [0, 16], sizes = [16, 16], strides = [1, 1]} : vector<16x128xf32> to vector<16x16xf32>
    %72 = arith.truncf %71 : vector<16x16xf32> to vector<16x16xbf16>
    %73 = vector.extract_strided_slice %42 {offsets = [0, 16], sizes = [16, 16], strides = [1, 1]} : vector<16x128xf32> to vector<16x16xf32>
    %74 = arith.truncf %73 : vector<16x16xf32> to vector<16x16xbf16>
    %cst_27 = arith.constant dense<0.000000e+00> : vector<16x16xf32>
    %75 = tpu.matmul %70, %72, %cst_27 {dimension_numbers = #tpu.dot_dimension_numbers<[1], [1], [0], [0], [0, 0, 1, 0], [], []>} : vector<16x16xbf16>, vector<16x16xbf16>, vector<16x16xf32> -> vector<16x16xf32>
    %cst_28 = arith.constant 2.500000e-01 : f32
    %76 = vector.broadcast %cst_28 : f32 to vector<16x16xf32>
    %77 = arith.mulf %75, %76 : vector<16x16xf32>
    %cst_29 = arith.constant dense<0xFF800000> : vector<16xf32>
    %78 = vector.multi_reduction <maximumf>, %77, %cst_29 [1] : vector<16x16xf32> to vector<16xf32>
    %79 = vector.shape_cast %78 : vector<16xf32> to vector<16x1xf32>
    %80 = vector.broadcast %79 : vector<16x1xf32> to vector<16x16xf32>
    %81 = arith.subf %77, %80 : vector<16x16xf32>
    %82 = math.exp %81 : vector<16x16xf32>
    %cst_30 = arith.constant dense<0.000000e+00> : vector<16xf32>
    %83 = vector.multi_reduction <add>, %82, %cst_30 [1] : vector<16x16xf32> to vector<16xf32>
    %84 = vector.shape_cast %83 : vector<16xf32> to vector<16x1xf32>
    %85 = tpu.reciprocal %84 {approx = true} : vector<16x1xf32> -> vector<16x1xf32>
    %86 = vector.broadcast %85 : vector<16x1xf32> to vector<16x16xf32>
    %87 = arith.mulf %82, %86 : vector<16x16xf32>
    %88 = arith.truncf %87 : vector<16x16xf32> to vector<16x16xbf16>
    %cst_31 = arith.constant dense<0.000000e+00> : vector<16x16xf32>
    %89 = tpu.matmul %88, %74, %cst_31 {dimension_numbers = #tpu.dot_dimension_numbers<[1], [0], [0], [1], [0, 0, 1, 1], [], []>} : vector<16x16xbf16>, vector<16x16xbf16>, vector<16x16xf32> -> vector<16x16xf32>
    %90 = arith.truncf %89 : vector<16x16xf32> to vector<16x16xbf16>
    %91 = vector.extract_strided_slice %44 {offsets = [16, 0], sizes = [16, 128], strides = [1, 1]} : vector<128x128xbf16> to vector<16x128xbf16>
    %cst_32 = arith.constant dense<0.000000e+00> : vector<16x128xf32>
    %92 = tpu.matmul %90, %91, %cst_32 {dimension_numbers = #tpu.dot_dimension_numbers<[1], [0], [0], [1], [0, 0, 1, 1], [], []>} : vector<16x16xbf16>, vector<16x128xbf16>, vector<16x128xf32> -> vector<16x128xf32>
    %93 = arith.addf %68, %92 : vector<16x128xf32>
    %94 = vector.extract_strided_slice %40 {offsets = [0, 32], sizes = [16, 16], strides = [1, 1]} : vector<16x128xf32> to vector<16x16xf32>
    %95 = arith.truncf %94 : vector<16x16xf32> to vector<16x16xbf16>
    %96 = vector.extract_strided_slice %41 {offsets = [0, 32], sizes = [16, 16], strides = [1, 1]} : vector<16x128xf32> to vector<16x16xf32>
    %97 = arith.truncf %96 : vector<16x16xf32> to vector<16x16xbf16>
    %98 = vector.extract_strided_slice %42 {offsets = [0, 32], sizes = [16, 16], strides = [1, 1]} : vector<16x128xf32> to vector<16x16xf32>
    %99 = arith.truncf %98 : vector<16x16xf32> to vector<16x16xbf16>
    %cst_33 = arith.constant dense<0.000000e+00> : vector<16x16xf32>
    %100 = tpu.matmul %95, %97, %cst_33 {dimension_numbers = #tpu.dot_dimension_numbers<[1], [1], [0], [0], [0, 0, 1, 0], [], []>} : vector<16x16xbf16>, vector<16x16xbf16>, vector<16x16xf32> -> vector<16x16xf32>
    %cst_34 = arith.constant 2.500000e-01 : f32
    %101 = vector.broadcast %cst_34 : f32 to vector<16x16xf32>
    %102 = arith.mulf %100, %101 : vector<16x16xf32>
    %cst_35 = arith.constant dense<0xFF800000> : vector<16xf32>
    %103 = vector.multi_reduction <maximumf>, %102, %cst_35 [1] : vector<16x16xf32> to vector<16xf32>
    %104 = vector.shape_cast %103 : vector<16xf32> to vector<16x1xf32>
    %105 = vector.broadcast %104 : vector<16x1xf32> to vector<16x16xf32>
    %106 = arith.subf %102, %105 : vector<16x16xf32>
    %107 = math.exp %106 : vector<16x16xf32>
    %cst_36 = arith.constant dense<0.000000e+00> : vector<16xf32>
    %108 = vector.multi_reduction <add>, %107, %cst_36 [1] : vector<16x16xf32> to vector<16xf32>
    %109 = vector.shape_cast %108 : vector<16xf32> to vector<16x1xf32>
    %110 = tpu.reciprocal %109 {approx = true} : vector<16x1xf32> -> vector<16x1xf32>
    %111 = vector.broadcast %110 : vector<16x1xf32> to vector<16x16xf32>
    %112 = arith.mulf %107, %111 : vector<16x16xf32>
    %113 = arith.truncf %112 : vector<16x16xf32> to vector<16x16xbf16>
    %cst_37 = arith.constant dense<0.000000e+00> : vector<16x16xf32>
    %114 = tpu.matmul %113, %99, %cst_37 {dimension_numbers = #tpu.dot_dimension_numbers<[1], [0], [0], [1], [0, 0, 1, 1], [], []>} : vector<16x16xbf16>, vector<16x16xbf16>, vector<16x16xf32> -> vector<16x16xf32>
    %115 = arith.truncf %114 : vector<16x16xf32> to vector<16x16xbf16>
    %116 = vector.extract_strided_slice %44 {offsets = [32, 0], sizes = [16, 128], strides = [1, 1]} : vector<128x128xbf16> to vector<16x128xbf16>
    %cst_38 = arith.constant dense<0.000000e+00> : vector<16x128xf32>
    %117 = tpu.matmul %115, %116, %cst_38 {dimension_numbers = #tpu.dot_dimension_numbers<[1], [0], [0], [1], [0, 0, 1, 1], [], []>} : vector<16x16xbf16>, vector<16x128xbf16>, vector<16x128xf32> -> vector<16x128xf32>
    %118 = arith.addf %93, %117 : vector<16x128xf32>
    %119 = vector.extract_strided_slice %40 {offsets = [0, 48], sizes = [16, 16], strides = [1, 1]} : vector<16x128xf32> to vector<16x16xf32>
    %120 = arith.truncf %119 : vector<16x16xf32> to vector<16x16xbf16>
    %121 = vector.extract_strided_slice %41 {offsets = [0, 48], sizes = [16, 16], strides = [1, 1]} : vector<16x128xf32> to vector<16x16xf32>
    %122 = arith.truncf %121 : vector<16x16xf32> to vector<16x16xbf16>
    %123 = vector.extract_strided_slice %42 {offsets = [0, 48], sizes = [16, 16], strides = [1, 1]} : vector<16x128xf32> to vector<16x16xf32>
    %124 = arith.truncf %123 : vector<16x16xf32> to vector<16x16xbf16>
    %cst_39 = arith.constant dense<0.000000e+00> : vector<16x16xf32>
    %125 = tpu.matmul %120, %122, %cst_39 {dimension_numbers = #tpu.dot_dimension_numbers<[1], [1], [0], [0], [0, 0, 1, 0], [], []>} : vector<16x16xbf16>, vector<16x16xbf16>, vector<16x16xf32> -> vector<16x16xf32>
    %cst_40 = arith.constant 2.500000e-01 : f32
    %126 = vector.broadcast %cst_40 : f32 to vector<16x16xf32>
    %127 = arith.mulf %125, %126 : vector<16x16xf32>
    %cst_41 = arith.constant dense<0xFF800000> : vector<16xf32>
    %128 = vector.multi_reduction <maximumf>, %127, %cst_41 [1] : vector<16x16xf32> to vector<16xf32>
    %129 = vector.shape_cast %128 : vector<16xf32> to vector<16x1xf32>
    %130 = vector.broadcast %129 : vector<16x1xf32> to vector<16x16xf32>
    %131 = arith.subf %127, %130 : vector<16x16xf32>
    %132 = math.exp %131 : vector<16x16xf32>
    %cst_42 = arith.constant dense<0.000000e+00> : vector<16xf32>
    %133 = vector.multi_reduction <add>, %132, %cst_42 [1] : vector<16x16xf32> to vector<16xf32>
    %134 = vector.shape_cast %133 : vector<16xf32> to vector<16x1xf32>
    %135 = tpu.reciprocal %134 {approx = true} : vector<16x1xf32> -> vector<16x1xf32>
    %136 = vector.broadcast %135 : vector<16x1xf32> to vector<16x16xf32>
    %137 = arith.mulf %132, %136 : vector<16x16xf32>
    %138 = arith.truncf %137 : vector<16x16xf32> to vector<16x16xbf16>
    %cst_43 = arith.constant dense<0.000000e+00> : vector<16x16xf32>
    %139 = tpu.matmul %138, %124, %cst_43 {dimension_numbers = #tpu.dot_dimension_numbers<[1], [0], [0], [1], [0, 0, 1, 1], [], []>} : vector<16x16xbf16>, vector<16x16xbf16>, vector<16x16xf32> -> vector<16x16xf32>
    %140 = arith.truncf %139 : vector<16x16xf32> to vector<16x16xbf16>
    %141 = vector.extract_strided_slice %44 {offsets = [48, 0], sizes = [16, 128], strides = [1, 1]} : vector<128x128xbf16> to vector<16x128xbf16>
    %cst_44 = arith.constant dense<0.000000e+00> : vector<16x128xf32>
    %142 = tpu.matmul %140, %141, %cst_44 {dimension_numbers = #tpu.dot_dimension_numbers<[1], [0], [0], [1], [0, 0, 1, 1], [], []>} : vector<16x16xbf16>, vector<16x128xbf16>, vector<16x128xf32> -> vector<16x128xf32>
    %143 = arith.addf %118, %142 : vector<16x128xf32>
    %c0_45 = arith.constant 0 : index
    %c0_46 = arith.constant 0 : index
    %c0_47 = arith.constant 0 : index
    %144 = vector.load %arg11[%c0_45, %c0_46, %c0_47] : memref<1x1x128xf32, #tpu.memory_space<vmem>>, vector<1x1x128xf32>
    %145 = vector.shape_cast %144 : vector<1x1x128xf32> to vector<1x128xf32>
    %146 = vector.broadcast %145 : vector<1x128xf32> to vector<16x128xf32>
    %147 = arith.addf %143, %146 : vector<16x128xf32>
    %148 = vector.extract_strided_slice %5 {offsets = [2, 0], sizes = [1, 128], strides = [1, 1]} : vector<6x128xf32> to vector<1x128xf32>
    %149 = vector.broadcast %148 : vector<1x128xf32> to vector<16x128xf32>
    %150 = arith.mulf %149, %147 : vector<16x128xf32>
    %151 = arith.addf %3, %150 : vector<16x128xf32>
    %152 = vector.extract_strided_slice %5 {offsets = [4, 0], sizes = [1, 128], strides = [1, 1]} : vector<6x128xf32> to vector<1x128xf32>
    %153 = vector.extract_strided_slice %5 {offsets = [3, 0], sizes = [1, 128], strides = [1, 1]} : vector<6x128xf32> to vector<1x128xf32>
    %cst_48 = arith.constant dense<0.000000e+00> : vector<16xf32>
    %154 = vector.multi_reduction <add>, %151, %cst_48 [1] : vector<16x128xf32> to vector<16xf32>
    %155 = vector.shape_cast %154 : vector<16xf32> to vector<16x1xf32>
    %cst_49 = arith.constant 1.562500e-02 : f32
    %156 = vector.broadcast %cst_49 : f32 to vector<16x1xf32>
    %157 = arith.mulf %155, %156 : vector<16x1xf32>
    %158 = arith.mulf %151, %151 : vector<16x128xf32>
    %cst_50 = arith.constant dense<0.000000e+00> : vector<16xf32>
    %159 = vector.multi_reduction <add>, %158, %cst_50 [1] : vector<16x128xf32> to vector<16xf32>
    %160 = vector.shape_cast %159 : vector<16xf32> to vector<16x1xf32>
    %cst_51 = arith.constant 1.562500e-02 : f32
    %161 = vector.broadcast %cst_51 : f32 to vector<16x1xf32>
    %162 = arith.mulf %160, %161 : vector<16x1xf32>
    %163 = arith.mulf %157, %157 : vector<16x1xf32>
    %164 = arith.subf %162, %163 : vector<16x1xf32>
    %165 = vector.broadcast %157 : vector<16x1xf32> to vector<16x128xf32>
    %166 = arith.subf %151, %165 : vector<16x128xf32>
    %cst_52 = arith.constant 9.99999997E-7 : f32
    %167 = vector.broadcast %cst_52 : f32 to vector<16x1xf32>
    %168 = arith.addf %164, %167 : vector<16x1xf32>
    %169 = math.rsqrt %168 : vector<16x1xf32>
    %170 = vector.broadcast %169 : vector<16x1xf32> to vector<16x128xf32>
    %171 = arith.mulf %166, %170 : vector<16x128xf32>
    %cst_53 = arith.constant 1.000000e+00 : f32
    %172 = vector.broadcast %cst_53 : f32 to vector<1x128xf32>
    %173 = arith.addf %172, %152 : vector<1x128xf32>
    %174 = vector.broadcast %173 : vector<1x128xf32> to vector<16x128xf32>
    %175 = arith.mulf %171, %174 : vector<16x128xf32>
    %176 = vector.broadcast %153 : vector<1x128xf32> to vector<16x128xf32>
    %177 = arith.addf %175, %176 : vector<16x128xf32>
    %178 = arith.truncf %177 : vector<16x128xf32> to vector<16x128xbf16>
    %c0_54 = arith.constant 0 : index
    %c0_55 = arith.constant 0 : index
    %c0_56 = arith.constant 0 : index
    %179 = vector.load %arg12[%c0_54, %c0_55, %c0_56] : memref<1x128x256xbf16, #tpu.memory_space<vmem>>, vector<1x128x256xbf16>
    %180 = vector.shape_cast %179 : vector<1x128x256xbf16> to vector<128x256xbf16>
    %cst_57 = arith.constant dense<0.000000e+00> : vector<16x256xf32>
    %181 = tpu.matmul %178, %180, %cst_57 {dimension_numbers = #tpu.dot_dimension_numbers<[1], [0], [0], [1], [0, 0, 1, 1], [], []>} : vector<16x128xbf16>, vector<128x256xbf16>, vector<16x256xf32> -> vector<16x256xf32>
    %c0_58 = arith.constant 0 : index
    %c0_59 = arith.constant 0 : index
    %c0_60 = arith.constant 0 : index
    %182 = vector.load %arg13[%c0_58, %c0_59, %c0_60] : memref<1x1x256xf32, #tpu.memory_space<vmem>>, vector<1x1x256xf32>
    %183 = vector.shape_cast %182 : vector<1x1x256xf32> to vector<1x256xf32>
    %184 = vector.broadcast %183 : vector<1x256xf32> to vector<16x256xf32>
    %185 = arith.addf %181, %184 : vector<16x256xf32>
    %cst_61 = arith.constant 5.000000e-01 : f32
    %186 = vector.broadcast %cst_61 : f32 to vector<16x256xf32>
    %187 = arith.mulf %186, %185 : vector<16x256xf32>
    %cst_62 = arith.constant 4.471500e-02 : f32
    %188 = vector.broadcast %cst_62 : f32 to vector<16x256xf32>
    %189 = arith.mulf %188, %185 : vector<16x256xf32>
    %190 = arith.mulf %189, %185 : vector<16x256xf32>
    %191 = arith.mulf %190, %185 : vector<16x256xf32>
    %192 = arith.addf %185, %191 : vector<16x256xf32>
    %cst_63 = arith.constant 0.797884583 : f32
    %193 = vector.broadcast %cst_63 : f32 to vector<16x256xf32>
    %194 = arith.mulf %193, %192 : vector<16x256xf32>
    %195 = math.tanh %194 : vector<16x256xf32>
    %cst_64 = arith.constant 1.000000e+00 : f32
    %196 = vector.broadcast %cst_64 : f32 to vector<16x256xf32>
    %197 = arith.addf %196, %195 : vector<16x256xf32>
    %198 = arith.mulf %187, %197 : vector<16x256xf32>
    %199 = arith.truncf %198 : vector<16x256xf32> to vector<16x256xbf16>
    %c0_65 = arith.constant 0 : index
    %c0_66 = arith.constant 0 : index
    %c0_67 = arith.constant 0 : index
    %200 = vector.load %arg14[%c0_65, %c0_66, %c0_67] : memref<1x256x128xbf16, #tpu.memory_space<vmem>>, vector<1x256x128xbf16>
    %201 = vector.shape_cast %200 : vector<1x256x128xbf16> to vector<256x128xbf16>
    %cst_68 = arith.constant dense<0.000000e+00> : vector<16x128xf32>
    %202 = tpu.matmul %199, %201, %cst_68 {dimension_numbers = #tpu.dot_dimension_numbers<[1], [0], [0], [1], [0, 0, 1, 1], [], []>} : vector<16x256xbf16>, vector<256x128xbf16>, vector<16x128xf32> -> vector<16x128xf32>
    %c0_69 = arith.constant 0 : index
    %c0_70 = arith.constant 0 : index
    %c0_71 = arith.constant 0 : index
    %203 = vector.load %arg15[%c0_69, %c0_70, %c0_71] : memref<1x1x128xf32, #tpu.memory_space<vmem>>, vector<1x1x128xf32>
    %204 = vector.shape_cast %203 : vector<1x1x128xf32> to vector<1x128xf32>
    %205 = vector.broadcast %204 : vector<1x128xf32> to vector<16x128xf32>
    %206 = arith.addf %202, %205 : vector<16x128xf32>
    %207 = vector.extract_strided_slice %5 {offsets = [5, 0], sizes = [1, 128], strides = [1, 1]} : vector<6x128xf32> to vector<1x128xf32>
    %208 = vector.broadcast %207 : vector<1x128xf32> to vector<16x128xf32>
    %209 = arith.mulf %208, %206 : vector<16x128xf32>
    %210 = arith.addf %151, %209 : vector<16x128xf32>
    %c0_72 = arith.constant 0 : index
    %c0_73 = arith.constant 0 : index
    %211 = vector.load %arg19[%c0_72, %c0_73] : memref<16x128xf32, #tpu.memory_space<vmem>>, vector<16x128xf32>
    tpu.vector_store %arg19[%c0_72, %c0_73], %210 {strides = array<i32>} : memref<16x128xf32, #tpu.memory_space<vmem>>, vector<16x128xf32>,
    %c1_i32 = arith.constant 1 : i32
    %212 = arith.cmpi eq, %arg1, %c1_i32 : i32
    %213 = arith.extui %212 : i1 to i32
    %c0_i32_74 = arith.constant 0 : i32
    %214 = arith.cmpi ne, %213, %c0_i32_74 : i32
    scf.if %214 {
      %c0_75 = arith.constant 0 : index
      %c0_76 = arith.constant 0 : index
      %c0_77 = arith.constant 0 : index
      %215 = vector.load %arg5[%c0_75, %c0_76, %c0_77] : memref<1x2x128xf32, #tpu.memory_space<vmem>>, vector<1x2x128xf32>
      %216 = vector.shape_cast %215 : vector<1x2x128xf32> to vector<2x128xf32>
      %217 = vector.extract_strided_slice %216 {offsets = [0, 0], sizes = [1, 128], strides = [1, 1]} : vector<2x128xf32> to vector<1x128xf32>
      %218 = vector.extract_strided_slice %216 {offsets = [1, 0], sizes = [1, 128], strides = [1, 1]} : vector<2x128xf32> to vector<1x128xf32>
      %cst_78 = arith.constant dense<0.000000e+00> : vector<16xf32>
      %219 = vector.multi_reduction <add>, %210, %cst_78 [1] : vector<16x128xf32> to vector<16xf32>
      %220 = vector.shape_cast %219 : vector<16xf32> to vector<16x1xf32>
      %cst_79 = arith.constant 1.562500e-02 : f32
      %221 = vector.broadcast %cst_79 : f32 to vector<16x1xf32>
      %222 = arith.mulf %220, %221 : vector<16x1xf32>
      %223 = arith.mulf %210, %210 : vector<16x128xf32>
      %cst_80 = arith.constant dense<0.000000e+00> : vector<16xf32>
      %224 = vector.multi_reduction <add>, %223, %cst_80 [1] : vector<16x128xf32> to vector<16xf32>
      %225 = vector.shape_cast %224 : vector<16xf32> to vector<16x1xf32>
      %cst_81 = arith.constant 1.562500e-02 : f32
      %226 = vector.broadcast %cst_81 : f32 to vector<16x1xf32>
      %227 = arith.mulf %225, %226 : vector<16x1xf32>
      %228 = arith.mulf %222, %222 : vector<16x1xf32>
      %229 = arith.subf %227, %228 : vector<16x1xf32>
      %230 = vector.broadcast %222 : vector<16x1xf32> to vector<16x128xf32>
      %231 = arith.subf %210, %230 : vector<16x128xf32>
      %cst_82 = arith.constant 9.99999997E-7 : f32
      %232 = vector.broadcast %cst_82 : f32 to vector<16x1xf32>
      %233 = arith.addf %229, %232 : vector<16x1xf32>
      %234 = math.rsqrt %233 : vector<16x1xf32>
      %235 = vector.broadcast %234 : vector<16x1xf32> to vector<16x128xf32>
      %236 = arith.mulf %231, %235 : vector<16x128xf32>
      %cst_83 = arith.constant 1.000000e+00 : f32
      %237 = vector.broadcast %cst_83 : f32 to vector<1x128xf32>
      %238 = arith.addf %237, %217 : vector<1x128xf32>
      %239 = vector.broadcast %238 : vector<1x128xf32> to vector<16x128xf32>
      %240 = arith.mulf %236, %239 : vector<16x128xf32>
      %241 = vector.broadcast %218 : vector<1x128xf32> to vector<16x128xf32>
      %242 = arith.addf %240, %241 : vector<16x128xf32>
      %243 = arith.truncf %242 : vector<16x128xf32> to vector<16x128xbf16>
      %c0_84 = arith.constant 0 : index
      %c0_85 = arith.constant 0 : index
      %244 = vector.load %arg16[%c0_84, %c0_85] : memref<128x128xbf16, #tpu.memory_space<vmem>>, vector<128x128xbf16>
      %cst_86 = arith.constant dense<0.000000e+00> : vector<16x128xf32>
      %245 = tpu.matmul %243, %244, %cst_86 {dimension_numbers = #tpu.dot_dimension_numbers<[1], [0], [0], [1], [0, 0, 1, 1], [], []>} : vector<16x128xbf16>, vector<128x128xbf16>, vector<16x128xf32> -> vector<16x128xf32>
      %c0_87 = arith.constant 0 : index
      %c0_88 = arith.constant 0 : index
      %246 = vector.load %arg17[%c0_87, %c0_88] : memref<1x128xf32, #tpu.memory_space<vmem>>, vector<1x128xf32>
      %247 = vector.broadcast %246 : vector<1x128xf32> to vector<16x128xf32>
      %248 = arith.addf %245, %247 : vector<16x128xf32>
      %c0_89 = arith.constant 0 : index
      %c0_90 = arith.constant 0 : index
      %c0_91 = arith.constant 0 : index
      %249 = vector.load %arg18[%c0_89, %c0_90, %c0_91] : memref<1x16x128xf32, #tpu.memory_space<vmem>>, vector<1x16x128xf32>
      %250 = vector.shape_cast %249 : vector<1x16x128xf32> to vector<16x128xf32>
      %251 = vector.shape_cast %248 : vector<16x128xf32> to vector<1x16x128xf32>
      tpu.vector_store %arg18[%c0_89, %c0_90, %c0_91], %251 {strides = array<i32>} : memref<1x16x128xf32, #tpu.memory_space<vmem>>, vector<1x16x128xf32>,
    } else {
    }
    return
  }
  func.func @transform_0(%arg0: i32, %arg1: i32) -> (i32, i32, i32) {
    %c0_i32 = arith.constant 0 : i32
    %c0_i32_0 = arith.constant 0 : i32
    %c0_i32_1 = arith.constant 0 : i32
    return %arg0, %c0_i32, %c0_i32_0 : i32, i32, i32
  }
  func.func @transform_1(%arg0: i32, %arg1: i32) -> (i32, i32) {
    %c0_i32 = arith.constant 0 : i32
    %c0_i32_0 = arith.constant 0 : i32
    %c0_i32_1 = arith.constant 0 : i32
    return %c0_i32, %c0_i32_0 : i32, i32
  }
  func.func @transform_2(%arg0: i32, %arg1: i32) -> (i32, i32, i32, i32) {
    %c0_i32 = arith.constant 0 : i32
    %c0_i32_0 = arith.constant 0 : i32
    %c0_i32_1 = arith.constant 0 : i32
    return %arg0, %arg1, %c0_i32, %c0_i32_0 : i32, i32, i32, i32
  }
  func.func @transform_3(%arg0: i32, %arg1: i32) -> (i32, i32, i32) {
    %c0_i32 = arith.constant 0 : i32
    %c0_i32_0 = arith.constant 0 : i32
    %c0_i32_1 = arith.constant 0 : i32
    return %arg0, %c0_i32, %c0_i32_0 : i32, i32, i32
  }
  func.func @transform_4(%arg0: i32, %arg1: i32) -> (i32, i32) {
    %c0_i32 = arith.constant 0 : i32
    %c0_i32_0 = arith.constant 0 : i32
    %c0_i32_1 = arith.constant 0 : i32
    return %c0_i32, %c0_i32_0 : i32, i32
  }
  func.func @transform_5(%arg0: i32, %arg1: i32) -> (i32, i32) {
    %c0_i32 = arith.constant 0 : i32
    %c0_i32_0 = arith.constant 0 : i32
    %c0_i32_1 = arith.constant 0 : i32
    return %c0_i32, %c0_i32_0 : i32, i32
  }
  func.func @transform_6(%arg0: i32, %arg1: i32) -> (i32, i32, i32) {
    %c0_i32 = arith.constant 0 : i32
    %c0_i32_0 = arith.constant 0 : i32
    %c0_i32_1 = arith.constant 0 : i32
    return %arg1, %c0_i32, %c0_i32_0 : i32, i32, i32
  }
  func.func @transform_7(%arg0: i32, %arg1: i32) -> (i32, i32, i32) {
    %c0_i32 = arith.constant 0 : i32
    %c0_i32_0 = arith.constant 0 : i32
    %c0_i32_1 = arith.constant 0 : i32
    return %arg1, %c0_i32, %c0_i32_0 : i32, i32, i32
  }
  func.func @transform_8(%arg0: i32, %arg1: i32) -> (i32, i32, i32) {
    %c0_i32 = arith.constant 0 : i32
    %c0_i32_0 = arith.constant 0 : i32
    %c0_i32_1 = arith.constant 0 : i32
    return %arg1, %c0_i32, %c0_i32_0 : i32, i32, i32
  }
  func.func @transform_9(%arg0: i32, %arg1: i32) -> (i32, i32, i32) {
    %c0_i32 = arith.constant 0 : i32
    %c0_i32_0 = arith.constant 0 : i32
    %c0_i32_1 = arith.constant 0 : i32
    return %arg1, %c0_i32, %c0_i32_0 : i32, i32, i32
  }
  func.func @transform_10(%arg0: i32, %arg1: i32) -> (i32, i32, i32) {
    %c0_i32 = arith.constant 0 : i32
    %c0_i32_0 = arith.constant 0 : i32
    %c0_i32_1 = arith.constant 0 : i32
    return %arg1, %c0_i32, %c0_i32_0 : i32, i32, i32
  }
  func.func @transform_11(%arg0: i32, %arg1: i32) -> (i32, i32, i32) {
    %c0_i32 = arith.constant 0 : i32
    %c0_i32_0 = arith.constant 0 : i32
    %c0_i32_1 = arith.constant 0 : i32
    return %arg1, %c0_i32, %c0_i32_0 : i32, i32, i32
  }
  func.func @transform_12(%arg0: i32, %arg1: i32) -> (i32, i32, i32) {
    %c0_i32 = arith.constant 0 : i32
    %c0_i32_0 = arith.constant 0 : i32
    %c0_i32_1 = arith.constant 0 : i32
    return %arg1, %c0_i32, %c0_i32_0 : i32, i32, i32
  }
  func.func @transform_13(%arg0: i32, %arg1: i32) -> (i32, i32, i32) {
    %c0_i32 = arith.constant 0 : i32
    %c0_i32_0 = arith.constant 0 : i32
    %c0_i32_1 = arith.constant 0 : i32
    return %arg1, %c0_i32, %c0_i32_0 : i32, i32, i32
  }
  func.func @transform_14(%arg0: i32, %arg1: i32) -> (i32, i32) {
    %c0_i32 = arith.constant 0 : i32
    %c0_i32_0 = arith.constant 0 : i32
    %c0_i32_1 = arith.constant 0 : i32
    return %c0_i32, %c0_i32_0 : i32, i32
  }
  func.func @transform_15(%arg0: i32, %arg1: i32) -> (i32, i32) {
    %c0_i32 = arith.constant 0 : i32
    %c0_i32_0 = arith.constant 0 : i32
    %c0_i32_1 = arith.constant 0 : i32
    return %c0_i32, %c0_i32_0 : i32, i32
  }
  func.func @transform_16(%arg0: i32, %arg1: i32) -> (i32, i32, i32) {
    %c0_i32 = arith.constant 0 : i32
    %c0_i32_0 = arith.constant 0 : i32
    %c0_i32_1 = arith.constant 0 : i32
    return %arg0, %c0_i32, %c0_i32_0 : i32, i32, i32
  }
}

</mosaic_0001>

<bundles_post_ra>
// kernel: dit_forward.2
= control target key start
LH: loop header
LB: loop body
LE: loop exit
PB: predicated region body
PF: predicated region fallthrough
CT: control target
= control target key end

     0   :  { %v1214_v0 = vmov 0.0   ;;  %vm1215_vm0 = vmmov 0   ;;  %vm50_vm1 = vcmask 523264   ;;  %s2102_s1 = inlined_call_operand.vmem [shape: f32[64,128], index: 1, kind: input, shape index: {}]   ;;  %s2103_s0 = inlined_call_operand.vmem [shape: f32[2,64], index: 0, kind: input, shape index: {}]   ;;  %s2104_s3 = inlined_call_operand.vmem [shape: f32[128,128], index: 3, kind: input, shape index: {}]   ;;  %s2105_s2 = inlined_call_operand.vmem [shape: f32[1,128], index: 2, kind: input, shape index: {}]   ;;  %s2106_s5 = inlined_call_operand.vmem [shape: f32[128,1536], index: 5, kind: input, shape index: {}]   ;;  %s2107_s4 = inlined_call_operand.vmem [shape: f32[1,128], index: 4, kind: input, shape index: {}]   ;;  %s2108_s7 = inlined_call_operand.vmem [shape: f32[128,256], index: 7, kind: input, shape index: {}]   ;;  %s2109_s6 = inlined_call_operand.vmem [shape: f32[1,1536], index: 6, kind: input, shape index: {}]   ;;  %s2110_s9 = inlined_call_operand.vmem [shape: f32[2,1536], index: 9, kind: output, shape index: {0}]   ;;  %s2111_s8 = inlined_call_operand.vmem [shape: f32[1,256], index: 8, kind: input, shape index: {}]   ;;  %s2112_s10 = inlined_call_operand.vmem [shape: f32[2,256], index: 10, kind: output, shape index: {1}]  }
   0x1   :  { %1149 = vmatprep.subr.mxu0 %v1214_v0  ;;  %v42_v1 = vld [vmem:[%s2102_s1 + $0x38] sm:$0xff]  ;;  %v41_v2 = vld [vmem:[%s2102_s1 + $0x30] sm:$0xff]  ;;  %1165 = vmatprep.mubr.msk.f32.mxu0 %vm1215_vm0, %v1214_v0  ;;  %v40_v3 = vld [vmem:[%s2102_s1 + $0x28] sm:$0xff] }
   0x2   :  { %1150 = vmatpush3.msra.mxu0 %v42_v1  ;;  %1168 = vmatprep.subr.mxu1 %v1214_v0  ;;  %v39_v4 = vld [vmem:[%s2102_s1 + $0x20] sm:$0xff]  ;;  %v38_v5 = vld [vmem:[%s2102_s1 + $0x18] sm:$0xff]  ;;  %v37_v6 = vld [vmem:[%s2102_s1 + $0x10] sm:$0xff] }
   0x3   :  { %1151 = vmatprep.subr.mxu0 %v1214_v0  ;;  %1200 = vmatprep.mubr.msk.f32.mxu1 %vm1215_vm0, %v1214_v0  ;;  %v36_v7 = vld [vmem:[%s2102_s1 + $0x8] sm:$0xff]  ;;  %v35_v8 = vld [vmem:[%s2102_s1] sm:$0xff]  ;;  %v146_v10 = vld [vmem:[%s2104_s3 + $0x78] sm:$0xff] }
   0x4   :  { %1152 = vmatpush3.msra.mxu0 %v41_v2  ;;  %v34_v9 = vld [vmem:[%s2103_s0] sm:$0x3]  ;;  %1169 = vmatpush3.msra.mxu1 %v146_v10  ;;  %v145_v11 = vld [vmem:[%s2104_s3 + $0x70] sm:$0xff]  ;;  %v144_v12 = vld [vmem:[%s2104_s3 + $0x68] sm:$0xff] }
   0x5   :  { %1153 = vmatprep.subr.mxu0 %v1214_v0  ;;  %1170 = vmatprep.subr.mxu1 %v1214_v0  ;;  %v143_v13 = vld [vmem:[%s2104_s3 + $0x60] sm:$0xff]  ;;  %v142_v14 = vld [vmem:[%s2104_s3 + $0x58] sm:$0xff]  ;;  %v141_v15 = vld [vmem:[%s2104_s3 + $0x50] sm:$0xff] }
   0x6   :  { %1154 = vmatpush3.msra.mxu0 %v40_v3  ;;  %1171 = vmatpush3.msra.mxu1 %v145_v11  ;;  %v140_v16 = vld [vmem:[%s2104_s3 + $0x48] sm:$0xff]  ;;  %v139_v17 = vld [vmem:[%s2104_s3 + $0x40] sm:$0xff]  ;;  %v138_v18 = vld [vmem:[%s2104_s3 + $0x38] sm:$0xff] }
   0x7   :  { %1155 = vmatprep.subr.mxu0 %v1214_v0  ;;  %1172 = vmatprep.subr.mxu1 %v1214_v0  ;;  %v137_v19 = vld [vmem:[%s2104_s3 + $0x30] sm:$0xff]  ;;  %v136_v20 = vld [vmem:[%s2104_s3 + $0x28] sm:$0xff]  ;;  %v135_v21 = vld [vmem:[%s2104_s3 + $0x20] sm:$0xff] }
   0x8   :  { %1156 = vmatpush3.msra.mxu0 %v39_v4  ;;  %1173 = vmatpush3.msra.mxu1 %v144_v12  ;;  %v134_v22 = vld [vmem:[%s2104_s3 + $0x18] sm:$0xff]  ;;  %v133_v23 = vld [vmem:[%s2104_s3 + $0x10] sm:$0xff]  ;;  %v132_v24 = vld [vmem:[%s2104_s3 + $0x8] sm:$0xff] }
   0x9   :  { %1157 = vmatprep.subr.mxu0 %v1214_v0  ;;  %1174 = vmatprep.subr.mxu1 %v1214_v0  ;;  %v131_v25 = vld [vmem:[%s2104_s3] sm:$0xff]  ;;  %v412_v35 = vld [vmem:[%s2106_s5 + $0x5a8] sm:$0xff]  ;;  %v414_v36 = vld [vmem:[%s2106_s5 + $0x5b8] sm:$0xff] }
   0xa   :  { %1158 = vmatpush3.msra.mxu0 %v38_v5  ;;  %1175 = vmatpush3.msra.mxu1 %v143_v13  ;;  %v1117_v26 = vld [vmem:[%s2105_s2] ss:$0 sm:$0xff]  ;;  %v413_v38 = vld [vmem:[%s2106_s5 + $0x5b0] sm:$0xff]  ;;  %v400_v39 = vld [vmem:[%s2106_s5 + $0x548] sm:$0xff] }
   0xb   :  { %1159 = vmatprep.subr.mxu0 %v1214_v0  ;;  %1176 = vmatprep.subr.mxu1 %v1214_v0  ;;  %v411_v37 = vld [vmem:[%s2106_s5 + $0x5a0] sm:$0xff]  ;;  %v402_v40 = vld [vmem:[%s2106_s5 + $0x558] sm:$0xff]  ;;  %v401_v42 = vld [vmem:[%s2106_s5 + $0x550] sm:$0xff] }
   0xc   :  { %1160 = vmatpush3.msra.mxu0 %v37_v6  ;;  %1177 = vmatpush3.msra.mxu1 %v142_v14  ;;  %v399_v41 = vld [vmem:[%s2106_s5 + $0x540] sm:$0xff]  ;;  %v388_v43 = vld [vmem:[%s2106_s5 + $0x4e8] sm:$0xff]  ;;  %v390_v44 = vld [vmem:[%s2106_s5 + $0x4f8] sm:$0xff] }
   0xd   :  { %1161 = vmatprep.subr.mxu0 %v1214_v0  ;;  %1178 = vmatprep.subr.mxu1 %v1214_v0  ;;  %v387_v45 = vld [vmem:[%s2106_s5 + $0x4e0] sm:$0xff]  ;;  %v389_v46 = vld [vmem:[%s2106_s5 + $0x4f0] sm:$0xff]  ;;  %v376_v47 = vld [vmem:[%s2106_s5 + $0x488] sm:$0xff] }
   0xe   :  { %1162 = vmatpush3.msra.mxu0 %v36_v7  ;;  %1179 = vmatpush3.msra.mxu1 %v141_v15  ;;  %v378_v48 = vld [vmem:[%s2106_s5 + $0x498] sm:$0xff]  ;;  %v375_v49 = vld [vmem:[%s2106_s5 + $0x480] sm:$0xff]  ;;  %v377_v50 = vld [vmem:[%s2106_s5 + $0x490] sm:$0xff] }
   0xf   :  { %1163 = vmatprep.subr.mxu0 %v1214_v0  ;;  %1180 = vmatprep.subr.mxu1 %v1214_v0  ;;  %v364_v51 = vld [vmem:[%s2106_s5 + $0x428] sm:$0xff]  ;;  %v366_v52 = vld [vmem:[%s2106_s5 + $0x438] sm:$0xff]  ;;  %v363_v53 = vld [vmem:[%s2106_s5 + $0x420] sm:$0xff] }
  0x10   :  { %1164 = vmatpush3.msra.mxu0 %v35_v8  ;;  %1181 = vmatpush3.msra.mxu1 %v140_v16  ;;  %v365_v54 = vld [vmem:[%s2106_s5 + $0x430] sm:$0xff]  ;;  %v352_v55 = vld [vmem:[%s2106_s5 + $0x3c8] sm:$0xff]  ;;  %v354_v56 = vld [vmem:[%s2106_s5 + $0x3d8] sm:$0xff] }
  0x11   :  { %1166 = vmatmul.mubr.msk.f32.vlgmr.msra.gmra.mxu0 %vm50_vm1, %v34_v9  ;;  %1182 = vmatprep.subr.mxu1 %v1214_v0  ;;  %v351_v57 = vld [vmem:[%s2106_s5 + $0x3c0] sm:$0xff]  ;;  %v353_v58 = vld [vmem:[%s2106_s5 + $0x3d0] sm:$0xff]  ;;  %v340_v59 = vld [vmem:[%s2106_s5 + $0x368] sm:$0xff] }
  0x12   :  { %551 = vmatprep.mubr.f32.mxu0 %v1214_v0  ;;  %1183 = vmatpush3.msra.mxu1 %v139_v17  ;;  %v342_v60 = vld [vmem:[%s2106_s5 + $0x378] sm:$0xff]  ;;  %v339_v61 = vld [vmem:[%s2106_s5 + $0x360] sm:$0xff]  ;;  %v341_v62 = vld [vmem:[%s2106_s5 + $0x370] sm:$0xff] }
  0x13   :  { %1184 = vmatprep.subr.mxu1 %v1214_v0  ;;  %487 = vmatprep.subr.mxu0 %v412_v35  ;;  %v328_v63 = vld [vmem:[%s2106_s5 + $0x308] sm:$0xff]  ;;  %v330_v1 = vld [vmem:[%s2106_s5 + $0x318] sm:$0xff]  ;;  %v327_v2 = vld [vmem:[%s2106_s5 + $0x300] sm:$0xff] }
  0x14   :  { %1185 = vmatpush3.msra.mxu1 %v138_v18  ;;  %488 = vmatpush1.msra.mxu0 %v411_v37  ;;  %v329_v3 = vld [vmem:[%s2106_s5 + $0x310] sm:$0xff]  ;;  %v316_v4 = vld [vmem:[%s2106_s5 + $0x2a8] sm:$0xff]  ;;  %v318_v5 = vld [vmem:[%s2106_s5 + $0x2b8] sm:$0xff] }
  0x15   :  { %1186 = vmatprep.subr.mxu1 %v1214_v0  ;;  %489 = vmatprep.subr.mxu0 %v400_v39  ;;  %v315_v6 = vld [vmem:[%s2106_s5 + $0x2a0] sm:$0xff]  ;;  %v317_v7 = vld [vmem:[%s2106_s5 + $0x2b0] sm:$0xff]  ;;  %v304_v8 = vld [vmem:[%s2106_s5 + $0x248] sm:$0xff] }
  0x16   :  { %1187 = vmatpush3.msra.mxu1 %v137_v19  ;;  %490 = vmatpush1.msra.mxu0 %v399_v41  ;;  %v306_v9 = vld [vmem:[%s2106_s5 + $0x258] sm:$0xff]  ;;  %v303_v10 = vld [vmem:[%s2106_s5 + $0x240] sm:$0xff]  ;;  %v305_v11 = vld [vmem:[%s2106_s5 + $0x250] sm:$0xff] }
  0x17   :  { %1188 = vmatprep.subr.mxu1 %v1214_v0  ;;  %491 = vmatprep.subr.mxu0 %v388_v43  ;;  %v292_v12 = vld [vmem:[%s2106_s5 + $0x1e8] sm:$0xff]  ;;  %v294_v13 = vld [vmem:[%s2106_s5 + $0x1f8] sm:$0xff]  ;;  %v291_v14 = vld [vmem:[%s2106_s5 + $0x1e0] sm:$0xff] }
  0x18   :  { %1189 = vmatpush3.msra.mxu1 %v136_v20  ;;  %492 = vmatpush1.msra.mxu0 %v387_v45  ;;  %v293_v15 = vld [vmem:[%s2106_s5 + $0x1f0] sm:$0xff]  ;;  %v280_v16 = vld [vmem:[%s2106_s5 + $0x188] sm:$0xff]  ;;  %v282_v17 = vld [vmem:[%s2106_s5 + $0x198] sm:$0xff] }
  0x19   :  { %1190 = vmatprep.subr.mxu1 %v1214_v0  ;;  %493 = vmatprep.subr.mxu0 %v376_v47  ;;  %v279_v18 = vld [vmem:[%s2106_s5 + $0x180] sm:$0xff]  ;;  %v281_v19 = vld [vmem:[%s2106_s5 + $0x190] sm:$0xff]  ;;  %v268_v20 = vld [vmem:[%s2106_s5 + $0x128] sm:$0xff] }
  0x1a   :  { %1191 = vmatpush3.msra.mxu1 %v135_v21  ;;  %494 = vmatpush1.msra.mxu0 %v375_v49  ;;  %v270_v21 = vld [vmem:[%s2106_s5 + $0x138] sm:$0xff]  ;;  %v233_v35 = vld [vmem:[%s2106_s5 + $0x10] sm:$0xff]  ;;  %v415_v47 = vld [vmem:[%s2106_s5 + $0x5c0] sm:$0xff] }
  0x1b   :  { %1192 = vmatprep.subr.mxu1 %v1214_v0  ;;  %495 = vmatprep.subr.mxu0 %v364_v51  ;;  %v418_v37 = vld [vmem:[%s2106_s5 + $0x5d8] sm:$0xff]  ;;  %v404_v49 = vld [vmem:[%s2106_s5 + $0x568] sm:$0xff]  ;;  %v403_v51 = vld [vmem:[%s2106_s5 + $0x560] sm:$0xff] }
  0x1c   :  { %1193 = vmatpush3.msra.mxu1 %v134_v22  ;;  %496 = vmatpush1.msra.mxu0 %v363_v53  ;;  %v267_v22 = vld [vmem:[%s2106_s5 + $0x120] sm:$0xff]  ;;  %v392_v53 = vld [vmem:[%s2106_s5 + $0x508] sm:$0xff] }
  0x1d   :  { %1194 = vmatprep.subr.mxu1 %v1214_v0  ;;  %497 = vmatprep.subr.mxu0 %v352_v55  ;;  %v391_v55 = vld [vmem:[%s2106_s5 + $0x500] sm:$0xff] }
  0x1e   :  { %1195 = vmatpush3.msra.mxu1 %v133_v23  ;;  %498 = vmatpush1.msra.mxu0 %v351_v57  ;;  %v269_v23 = vld [vmem:[%s2106_s5 + $0x130] sm:$0xff]  ;;  %v380_v57 = vld [vmem:[%s2106_s5 + $0x4a8] sm:$0xff] }
  0x1f   :  { %1196 = vmatprep.subr.mxu1 %v1214_v0  ;;  %499 = vmatprep.subr.mxu0 %v340_v59  ;;  %v379_v59 = vld [vmem:[%s2106_s5 + $0x4a0] sm:$0xff] }
  0x20   :  { %1197 = vmatpush3.msra.mxu1 %v132_v24  ;;  %500 = vmatpush1.msra.mxu0 %v339_v61  ;;  %v256_v24 = vld [vmem:[%s2106_s5 + $0xc8] sm:$0xff] }
  0x21   :  { %1198 = vmatprep.subr.mxu1 %v1214_v0  ;;  %501 = vmatprep.subr.mxu0 %v328_v63  ;;  %v368_v61 = vld [vmem:[%s2106_s5 + $0x448] sm:$0xff]  ;;  %v367_v63 = vld [vmem:[%s2106_s5 + $0x440] sm:$0xff] }
  0x22   :  { %1199 = vmatpush3.msra.mxu1 %v131_v25  ;;  %502 = vmatpush1.msra.mxu0 %v327_v2  ;;  %v258_v25 = vld [vmem:[%s2106_s5 + $0xd8] sm:$0xff]  ;;  %v356_v2 = vld [vmem:[%s2106_s5 + $0x3e8] sm:$0xff] }
  0x23   :  { %558 = vmatprep.subr.mxu1 %v414_v36  ;;  %503 = vmatprep.subr.mxu0 %v316_v4  ;;  %v416_v36 = vld [vmem:[%s2106_s5 + $0x5c8] sm:$0xff]  ;;  %v355_v4 = vld [vmem:[%s2106_s5 + $0x3e0] sm:$0xff] }
  0x24   :  { %504 = vmatpush1.msra.mxu0 %v315_v6  ;;  %v344_v6 = vld [vmem:[%s2106_s5 + $0x388] sm:$0xff] }
  0x25   :  { %505 = vmatprep.subr.mxu0 %v304_v8  ;;  %v343_v8 = vld [vmem:[%s2106_s5 + $0x380] sm:$0xff] }
  0x26   :  { %506 = vmatpush1.msra.mxu0 %v303_v10  ;;  %v332_v10 = vld [vmem:[%s2106_s5 + $0x328] sm:$0xff] }
  0x27   :  { %507 = vmatprep.subr.mxu0 %v292_v12  ;;  %v331_v12 = vld [vmem:[%s2106_s5 + $0x320] sm:$0xff] }
  0x28   :  { %508 = vmatpush1.msra.mxu0 %v291_v14  ;;  %v320_v14 = vld [vmem:[%s2106_s5 + $0x2c8] sm:$0xff] }
  0x29   :  { %509 = vmatprep.subr.mxu0 %v280_v16  ;;  %v319_v16 = vld [vmem:[%s2106_s5 + $0x2c0] sm:$0xff] }
  0x2a   :  { %510 = vmatpush1.msra.mxu0 %v279_v18  ;;  %v308_v18 = vld [vmem:[%s2106_s5 + $0x268] sm:$0xff] }
  0x2b   :  { %511 = vmatprep.subr.mxu0 %v268_v20  ;;  %v307_v20 = vld [vmem:[%s2106_s5 + $0x260] sm:$0xff] }
  0x2c   :  { %512 = vmatpush1.msra.mxu0 %v267_v22  ;;  %v296_v22 = vld [vmem:[%s2106_s5 + $0x208] sm:$0xff] }
  0x2d   :  { %513 = vmatprep.subr.mxu0 %v256_v24  ;;  %v295_v24 = vld [vmem:[%s2106_s5 + $0x200] sm:$0xff] }
  0xd1   :  { %v120_v27 = vpop.f32.mrf.mxu0 }
  0xd2   :  { %v121_v28 = vadd.f32 %v1117_v26, %v120_v27  ;;  %v255_v26 = vld [vmem:[%s2106_s5 + $0xc0] sm:$0xff]  ;;  %v257_v27 = vld [vmem:[%s2106_s5 + $0xd0] sm:$0xff] }
  0xd3   :  { %v1167_v29 = vpop.f32.mrf.mxu0  ;;  %514 = vmatpush1.msra.mxu0 %v255_v26  ;;  %v284_v26 = vld [vmem:[%s2106_s5 + $0x1a8] sm:$0xff] }
  0xd4   :  { %v1119_v30 = vmul.f32 -1.442695, %v121_v28  ;;  %v246_v29 = vld [vmem:[%s2106_s5 + $0x78] sm:$0xff] }
  0xd6   :  { %1206 = vpow2.f32 %v1119_v30  ;;  %v243_v30 = vld [vmem:[%s2106_s5 + $0x60] sm:$0xff] }
  0xe3   :  { %v1207_v31 = vpop.eup %1206 }
  0xe4   :  { %v127_v32 = vadd.f32 1.0, %v1207_v31  ;;  %v245_v31 = vld [vmem:[%s2106_s5 + $0x70] sm:$0xff] }
  0xe6   :  { %1208 = vrcp.f32 %v127_v32  ;;  %v232_v32 = vld [vmem:[%s2106_s5 + $0x8] sm:$0xff] }
  0xf3   :  { %v1209_v33 = vpop.eup %1208 }
  0xf4   :  { %v130_v34 = vmul.f32 %v1209_v33, %v121_v28  ;;  %v244_v28 = vld [vmem:[%s2106_s5 + $0x68] sm:$0xff]  ;;  %v234_v33 = vld [vmem:[%s2106_s5 + $0x18] sm:$0xff] }
  0xf5   :  { %515 = vmatprep.subr.mxu0 %v244_v28  ;;  %v283_v28 = vld [vmem:[%s2106_s5 + $0x1a0] sm:$0xff] }
  0xf6   :  { %1201 = vmatmul.mubr.f32.vlgmr.msra.gmra.mxu1 %v130_v34  ;;  %516 = vmatpush1.msra.mxu0 %v243_v30  ;;  %v231_v34 = vld [vmem:[%s2106_s5] sm:$0xff]  ;;  %v272_v30 = vld [vmem:[%s2106_s5 + $0x148] sm:$0xff] }
  0xf7   :  { %622 = vmatprep.mubr.f32.mxu1 %v1214_v0  ;;  %559 = vmatpush1.msra.mxu1 %v413_v38  ;;  %v1120_v38 = vld [vmem:[%s2107_s4] ss:$0 sm:$0xff] }
  0xf8   :  { %560 = vmatprep.subr.mxu1 %v402_v40  ;;  %517 = vmatprep.subr.mxu0 %v232_v32  ;;  %v271_v32 = vld [vmem:[%s2106_s5 + $0x140] sm:$0xff] }
  0xf9   :  { %561 = vmatpush1.msra.mxu1 %v401_v42  ;;  %518 = vmatpush1.msra.mxu0 %v231_v34  ;;  %v260_v34 = vld [vmem:[%s2106_s5 + $0xe8] sm:$0xff] }
  0xfa   :  { %562 = vmatprep.subr.mxu1 %v390_v44  ;;  %629 = vmatprep.subr.mxu0 %v416_v36  ;;  %v259_v36 = vld [vmem:[%s2106_s5 + $0xe0] sm:$0xff] }
  0xfb   :  { %563 = vmatpush1.msra.mxu1 %v389_v46 }
  0xfc   :  { %564 = vmatprep.subr.mxu1 %v378_v48  ;;  %v417_v48 = vld [vmem:[%s2106_s5 + $0x5d0] sm:$0xff] }
  0xfd   :  { %565 = vmatpush1.msra.mxu1 %v377_v50  ;;  %v406_v50 = vld [vmem:[%s2106_s5 + $0x578] sm:$0xff] }
  0xfe   :  { %566 = vmatprep.subr.mxu1 %v366_v52  ;;  %v405_v52 = vld [vmem:[%s2106_s5 + $0x570] sm:$0xff] }
  0xff   :  { %567 = vmatpush1.msra.mxu1 %v365_v54  ;;  %v394_v54 = vld [vmem:[%s2106_s5 + $0x518] sm:$0xff] }
 0x100   :  { %568 = vmatprep.subr.mxu1 %v354_v56  ;;  %v393_v56 = vld [vmem:[%s2106_s5 + $0x510] sm:$0xff] }
 0x101   :  { %569 = vmatpush1.msra.mxu1 %v353_v58  ;;  %v382_v58 = vld [vmem:[%s2106_s5 + $0x4b8] sm:$0xff] }
 0x102   :  { %570 = vmatprep.subr.mxu1 %v342_v60  ;;  %v381_v60 = vld [vmem:[%s2106_s5 + $0x4b0] sm:$0xff] }
 0x103   :  { %571 = vmatpush1.msra.mxu1 %v341_v62  ;;  %v370_v62 = vld [vmem:[%s2106_s5 + $0x458] sm:$0xff] }
 0x104   :  { %572 = vmatprep.subr.mxu1 %v330_v1  ;;  %v369_v1 = vld [vmem:[%s2106_s5 + $0x450] sm:$0xff] }
 0x105   :  { %573 = vmatpush1.msra.mxu1 %v329_v3  ;;  %v358_v3 = vld [vmem:[%s2106_s5 + $0x3f8] sm:$0xff] }
 0x106   :  { %574 = vmatprep.subr.mxu1 %v318_v5  ;;  %v357_v5 = vld [vmem:[%s2106_s5 + $0x3f0] sm:$0xff] }
 0x107   :  { %575 = vmatpush1.msra.mxu1 %v317_v7  ;;  %v346_v7 = vld [vmem:[%s2106_s5 + $0x398] sm:$0xff] }
 0x108   :  { %576 = vmatprep.subr.mxu1 %v306_v9  ;;  %v345_v9 = vld [vmem:[%s2106_s5 + $0x390] sm:$0xff] }
 0x109   :  { %577 = vmatpush1.msra.mxu1 %v305_v11  ;;  %v334_v11 = vld [vmem:[%s2106_s5 + $0x338] sm:$0xff] }
 0x10a   :  { %578 = vmatprep.subr.mxu1 %v294_v13  ;;  %v333_v13 = vld [vmem:[%s2106_s5 + $0x330] sm:$0xff] }
 0x10b   :  { %579 = vmatpush1.msra.mxu1 %v293_v15  ;;  %v322_v15 = vld [vmem:[%s2106_s5 + $0x2d8] sm:$0xff] }
 0x10c   :  { %580 = vmatprep.subr.mxu1 %v282_v17  ;;  %v321_v17 = vld [vmem:[%s2106_s5 + $0x2d0] sm:$0xff] }
 0x10d   :  { %581 = vmatpush1.msra.mxu1 %v281_v19  ;;  %v310_v19 = vld [vmem:[%s2106_s5 + $0x278] sm:$0xff] }
 0x10e   :  { %582 = vmatprep.subr.mxu1 %v270_v21  ;;  %v309_v21 = vld [vmem:[%s2106_s5 + $0x270] sm:$0xff] }
 0x10f   :  { %583 = vmatpush1.msra.mxu1 %v269_v23  ;;  %v298_v23 = vld [vmem:[%s2106_s5 + $0x218] sm:$0xff] }
 0x110   :  { %584 = vmatprep.subr.mxu1 %v258_v25  ;;  %v297_v25 = vld [vmem:[%s2106_s5 + $0x210] sm:$0xff] }
 0x111   :  { %585 = vmatpush1.msra.mxu1 %v257_v27  ;;  %v286_v27 = vld [vmem:[%s2106_s5 + $0x1b8] sm:$0xff] }
 0x112   :  { %586 = vmatprep.subr.mxu1 %v246_v29  ;;  %v285_v29 = vld [vmem:[%s2106_s5 + $0x1b0] sm:$0xff] }
 0x113   :  { %587 = vmatpush1.msra.mxu1 %v245_v31  ;;  %v274_v31 = vld [vmem:[%s2106_s5 + $0x158] sm:$0xff] }
 0x114   :  { %588 = vmatprep.subr.mxu1 %v234_v33  ;;  %v273_v33 = vld [vmem:[%s2106_s5 + $0x150] sm:$0xff] }
 0x115   :  { %589 = vmatpush1.msra.mxu1 %v233_v35  ;;  %v262_v35 = vld [vmem:[%s2106_s5 + $0xf8] sm:$0xff] }
 0x116   :  { %700 = vmatprep.subr.mxu1 %v418_v37  ;;  %v261_v37 = vld [vmem:[%s2106_s5 + $0xf0] sm:$0xff] }
 0x1b6   :  { %v220_v39 = vpop.f32.mrf.mxu1 }
 0x1b7   :  { %v1579_v40 = vadd.f32 %v1120_v38, %v220_v39  ;;  %v248_v38 = vld [vmem:[%s2106_s5 + $0x88] sm:$0xff]  ;;  %v250_v39 = vld [vmem:[%s2106_s5 + $0x98] sm:$0xff] }
 0x1b8   :  { %v1202_v41 = vpop.f32.mrf.mxu1 }
 0x1b9   :  { %v1121_v42 = vmul.f32 -1.442695, %v1579_v40  ;;  %v247_v41 = vld [vmem:[%s2106_s5 + $0x80] sm:$0xff] }
 0x1bb   :  { %1210 = vpow2.f32 %v1121_v42  ;;  %v249_v42 = vld [vmem:[%s2106_s5 + $0x90] sm:$0xff] }
 0x1c8   :  { %v1211_v43 = vpop.eup %1210 }
 0x1c9   :  { %v227_v44 = vadd.f32 1.0, %v1211_v43  ;;  %v236_v43 = vld [vmem:[%s2106_s5 + $0x28] sm:$0xff] }
 0x1cb   :  { %1212 = vrcp.f32 %v227_v44  ;;  %v238_v44 = vld [vmem:[%s2106_s5 + $0x38] sm:$0xff] }
 0x1d8   :  { %v1213_v45 = vpop.eup %1212 }
 0x1d9   :  { %v1583_v46 = vmul.f32 %v1213_v45, %v1579_v40  ;;  %v235_v45 = vld [vmem:[%s2106_s5 + $0x20] sm:$0xff] }
 0x1db   :  { %552 = vmatmul.mubr.f32.vlgmr.msra.gmra.mxu0 %v1583_v46  ;;  %623 = vmatmul.mubr.f32.vlgmr.msra.gmra.mxu1 %v1583_v46 }
 0x1dc   :  { %630 = vmatpush1.msra.mxu0 %v415_v47  ;;  %701 = vmatpush1.msra.mxu1 %v417_v48  ;;  %v237_v47 = vld [vmem:[%s2106_s5 + $0x30] sm:$0xff]  ;;  %v420_v48 = vld [vmem:[%s2106_s5 + $0x5e8] sm:$0xff] }
 0x1dd   :  { %631 = vmatprep.subr.mxu0 %v404_v49  ;;  %702 = vmatprep.subr.mxu1 %v406_v50  ;;  %v422_v49 = vld [vmem:[%s2106_s5 + $0x5f8] sm:$0xff]  ;;  %v419_v50 = vld [vmem:[%s2106_s5 + $0x5e0] sm:$0xff] }
 0x1de   :  { %632 = vmatpush1.msra.mxu0 %v403_v51  ;;  %703 = vmatpush1.msra.mxu1 %v405_v52  ;;  %v421_v51 = vld [vmem:[%s2106_s5 + $0x5f0] sm:$0xff]  ;;  %v408_v52 = vld [vmem:[%s2106_s5 + $0x588] sm:$0xff] }
 0x1df   :  { %633 = vmatprep.subr.mxu0 %v392_v53  ;;  %704 = vmatprep.subr.mxu1 %v394_v54  ;;  %v410_v53 = vld [vmem:[%s2106_s5 + $0x598] sm:$0xff]  ;;  %v407_v54 = vld [vmem:[%s2106_s5 + $0x580] sm:$0xff] }
 0x1e0   :  { %634 = vmatpush1.msra.mxu0 %v391_v55  ;;  %705 = vmatpush1.msra.mxu1 %v393_v56  ;;  %v409_v55 = vld [vmem:[%s2106_s5 + $0x590] sm:$0xff]  ;;  %v396_v56 = vld [vmem:[%s2106_s5 + $0x528] sm:$0xff] }
 0x1e1   :  { %635 = vmatprep.subr.mxu0 %v380_v57  ;;  %706 = vmatprep.subr.mxu1 %v382_v58  ;;  %v398_v57 = vld [vmem:[%s2106_s5 + $0x538] sm:$0xff]  ;;  %v395_v58 = vld [vmem:[%s2106_s5 + $0x520] sm:$0xff] }
 0x1e2   :  { %636 = vmatpush1.msra.mxu0 %v379_v59  ;;  %707 = vmatpush1.msra.mxu1 %v381_v60  ;;  %v397_v59 = vld [vmem:[%s2106_s5 + $0x530] sm:$0xff]  ;;  %v384_v60 = vld [vmem:[%s2106_s5 + $0x4c8] sm:$0xff] }
 0x1e3   :  { %637 = vmatprep.subr.mxu0 %v368_v61  ;;  %708 = vmatprep.subr.mxu1 %v370_v62  ;;  %v386_v61 = vld [vmem:[%s2106_s5 + $0x4d8] sm:$0xff]  ;;  %v383_v62 = vld [vmem:[%s2106_s5 + $0x4c0] sm:$0xff] }
 0x1e4   :  { %638 = vmatpush1.msra.mxu0 %v367_v63  ;;  %709 = vmatpush1.msra.mxu1 %v369_v1  ;;  %v385_v63 = vld [vmem:[%s2106_s5 + $0x4d0] sm:$0xff]  ;;  %v372_v1 = vld [vmem:[%s2106_s5 + $0x468] sm:$0xff] }
 0x1e5   :  { %639 = vmatprep.subr.mxu0 %v356_v2  ;;  %710 = vmatprep.subr.mxu1 %v358_v3  ;;  %v374_v2 = vld [vmem:[%s2106_s5 + $0x478] sm:$0xff]  ;;  %v371_v3 = vld [vmem:[%s2106_s5 + $0x460] sm:$0xff] }
 0x1e6   :  { %640 = vmatpush1.msra.mxu0 %v355_v4  ;;  %711 = vmatpush1.msra.mxu1 %v357_v5  ;;  %v373_v4 = vld [vmem:[%s2106_s5 + $0x470] sm:$0xff]  ;;  %v360_v5 = vld [vmem:[%s2106_s5 + $0x408] sm:$0xff] }
 0x1e7   :  { %641 = vmatprep.subr.mxu0 %v344_v6  ;;  %712 = vmatprep.subr.mxu1 %v346_v7  ;;  %v362_v6 = vld [vmem:[%s2106_s5 + $0x418] sm:$0xff]  ;;  %v359_v7 = vld [vmem:[%s2106_s5 + $0x400] sm:$0xff] }
 0x1e8   :  { %642 = vmatpush1.msra.mxu0 %v343_v8  ;;  %713 = vmatpush1.msra.mxu1 %v345_v9  ;;  %v361_v8 = vld [vmem:[%s2106_s5 + $0x410] sm:$0xff]  ;;  %v348_v9 = vld [vmem:[%s2106_s5 + $0x3a8] sm:$0xff] }
 0x1e9   :  { %643 = vmatprep.subr.mxu0 %v332_v10  ;;  %714 = vmatprep.subr.mxu1 %v334_v11  ;;  %v350_v10 = vld [vmem:[%s2106_s5 + $0x3b8] sm:$0xff]  ;;  %v347_v11 = vld [vmem:[%s2106_s5 + $0x3a0] sm:$0xff] }
 0x1ea   :  { %644 = vmatpush1.msra.mxu0 %v331_v12  ;;  %715 = vmatpush1.msra.mxu1 %v333_v13  ;;  %v349_v12 = vld [vmem:[%s2106_s5 + $0x3b0] sm:$0xff]  ;;  %v336_v13 = vld [vmem:[%s2106_s5 + $0x348] sm:$0xff] }
 0x1eb   :  { %645 = vmatprep.subr.mxu0 %v320_v14  ;;  %716 = vmatprep.subr.mxu1 %v322_v15  ;;  %v338_v14 = vld [vmem:[%s2106_s5 + $0x358] sm:$0xff]  ;;  %v335_v15 = vld [vmem:[%s2106_s5 + $0x340] sm:$0xff] }
 0x1ec   :  { %646 = vmatpush1.msra.mxu0 %v319_v16  ;;  %717 = vmatpush1.msra.mxu1 %v321_v17  ;;  %v337_v16 = vld [vmem:[%s2106_s5 + $0x350] sm:$0xff]  ;;  %v324_v17 = vld [vmem:[%s2106_s5 + $0x2e8] sm:$0xff] }
 0x1ed   :  { %647 = vmatprep.subr.mxu0 %v308_v18  ;;  %718 = vmatprep.subr.mxu1 %v310_v19  ;;  %v326_v18 = vld [vmem:[%s2106_s5 + $0x2f8] sm:$0xff]  ;;  %v323_v19 = vld [vmem:[%s2106_s5 + $0x2e0] sm:$0xff] }
 0x1ee   :  { %648 = vmatpush1.msra.mxu0 %v307_v20  ;;  %719 = vmatpush1.msra.mxu1 %v309_v21  ;;  %v325_v20 = vld [vmem:[%s2106_s5 + $0x2f0] sm:$0xff]  ;;  %v312_v21 = vld [vmem:[%s2106_s5 + $0x288] sm:$0xff] }
 0x1ef   :  { %649 = vmatprep.subr.mxu0 %v296_v22  ;;  %720 = vmatprep.subr.mxu1 %v298_v23  ;;  %v314_v22 = vld [vmem:[%s2106_s5 + $0x298] sm:$0xff]  ;;  %v311_v23 = vld [vmem:[%s2106_s5 + $0x280] sm:$0xff] }
 0x1f0   :  { %650 = vmatpush1.msra.mxu0 %v295_v24  ;;  %721 = vmatpush1.msra.mxu1 %v297_v25  ;;  %v313_v24 = vld [vmem:[%s2106_s5 + $0x290] sm:$0xff]  ;;  %v300_v25 = vld [vmem:[%s2106_s5 + $0x228] sm:$0xff] }
 0x1f1   :  { %651 = vmatprep.subr.mxu0 %v284_v26  ;;  %722 = vmatprep.subr.mxu1 %v286_v27  ;;  %v302_v26 = vld [vmem:[%s2106_s5 + $0x238] sm:$0xff]  ;;  %v299_v27 = vld [vmem:[%s2106_s5 + $0x220] sm:$0xff] }
 0x1f2   :  { %652 = vmatpush1.msra.mxu0 %v283_v28  ;;  %723 = vmatpush1.msra.mxu1 %v285_v29  ;;  %v301_v28 = vld [vmem:[%s2106_s5 + $0x230] sm:$0xff]  ;;  %v288_v29 = vld [vmem:[%s2106_s5 + $0x1c8] sm:$0xff] }
 0x1f3   :  { %653 = vmatprep.subr.mxu0 %v272_v30  ;;  %724 = vmatprep.subr.mxu1 %v274_v31  ;;  %v290_v30 = vld [vmem:[%s2106_s5 + $0x1d8] sm:$0xff]  ;;  %v287_v31 = vld [vmem:[%s2106_s5 + $0x1c0] sm:$0xff] }
 0x1f4   :  { %654 = vmatpush1.msra.mxu0 %v271_v32  ;;  %725 = vmatpush1.msra.mxu1 %v273_v33  ;;  %v289_v32 = vld [vmem:[%s2106_s5 + $0x1d0] sm:$0xff]  ;;  %v276_v33 = vld [vmem:[%s2106_s5 + $0x168] sm:$0xff] }
 0x1f5   :  { %655 = vmatprep.subr.mxu0 %v260_v34  ;;  %726 = vmatprep.subr.mxu1 %v262_v35  ;;  %v278_v34 = vld [vmem:[%s2106_s5 + $0x178] sm:$0xff]  ;;  %v275_v35 = vld [vmem:[%s2106_s5 + $0x160] sm:$0xff] }
 0x1f6   :  { %656 = vmatpush1.msra.mxu0 %v259_v36  ;;  %727 = vmatpush1.msra.mxu1 %v261_v37  ;;  %v277_v36 = vld [vmem:[%s2106_s5 + $0x170] sm:$0xff]  ;;  %v264_v37 = vld [vmem:[%s2106_s5 + $0x108] sm:$0xff] }
 0x1f7   :  { %657 = vmatprep.subr.mxu0 %v248_v38  ;;  %728 = vmatprep.subr.mxu1 %v250_v39  ;;  %v266_v38 = vld [vmem:[%s2106_s5 + $0x118] sm:$0xff]  ;;  %v263_v39 = vld [vmem:[%s2106_s5 + $0x100] sm:$0xff] }
 0x1f8   :  { %658 = vmatpush1.msra.mxu0 %v247_v41  ;;  %729 = vmatpush1.msra.mxu1 %v249_v42  ;;  %v265_v41 = vld [vmem:[%s2106_s5 + $0x110] sm:$0xff]  ;;  %v252_v42 = vld [vmem:[%s2106_s5 + $0xa8] sm:$0xff] }
 0x1f9   :  { %659 = vmatprep.subr.mxu0 %v236_v43  ;;  %730 = vmatprep.subr.mxu1 %v238_v44  ;;  %v254_v43 = vld [vmem:[%s2106_s5 + $0xb8] sm:$0xff]  ;;  %v251_v44 = vld [vmem:[%s2106_s5 + $0xa0] sm:$0xff] }
 0x1fa   :  { %660 = vmatpush1.msra.mxu0 %v235_v45  ;;  %693 = vmatprep.mubr.f32.mxu0 %v1214_v0  ;;  %v253_v45 = vld [vmem:[%s2106_s5 + $0xb0] sm:$0xff] }
 0x1fb   :  { %731 = vmatpush1.msra.mxu1 %v237_v47  ;;  %764 = vmatprep.mubr.f32.mxu1 %v1214_v0  ;;  %v240_v47 = vld [vmem:[%s2106_s5 + $0x48] sm:$0xff] }
 0x1fc   :  { %694 = vmatmul.mubr.f32.vlgmr.msra.gmra.mxu0 %v1583_v46  ;;  %765 = vmatmul.mubr.f32.vlgmr.msra.gmra.mxu1 %v1583_v46 }
 0x1fd   :  { %771 = vmatprep.subr.mxu0 %v420_v48  ;;  %842 = vmatprep.subr.mxu1 %v422_v49  ;;  %v242_v48 = vld [vmem:[%s2106_s5 + $0x58] sm:$0xff]  ;;  %v239_v49 = vld [vmem:[%s2106_s5 + $0x40] sm:$0xff] }
 0x1fe   :  { %772 = vmatpush1.msra.mxu0 %v419_v50  ;;  %843 = vmatpush1.msra.mxu1 %v421_v51  ;;  %v241_v50 = vld [vmem:[%s2106_s5 + $0x50] sm:$0xff]  ;;  %v1013_v51 = vld [vmem:[%s2108_s7 + $0xf8] sm:$0xff] }
 0x1ff   :  { %773 = vmatprep.subr.mxu0 %v408_v52  ;;  %844 = vmatprep.subr.mxu1 %v410_v53  ;;  %v1012_v52 = vld [vmem:[%s2108_s7 + $0xf0] sm:$0xff]  ;;  %v1011_v53 = vld [vmem:[%s2108_s7 + $0xe8] sm:$0xff] }
 0x200   :  { %774 = vmatpush1.msra.mxu0 %v407_v54  ;;  %845 = vmatpush1.msra.mxu1 %v409_v55  ;;  %v1010_v54 = vld [vmem:[%s2108_s7 + $0xe0] sm:$0xff]  ;;  %v1009_v55 = vld [vmem:[%s2108_s7 + $0xd8] sm:$0xff] }
 0x201   :  { %775 = vmatprep.subr.mxu0 %v396_v56  ;;  %846 = vmatprep.subr.mxu1 %v398_v57  ;;  %v1007_v56 = vld [vmem:[%s2108_s7 + $0xc8] sm:$0xff]  ;;  %v1005_v57 = vld [vmem:[%s2108_s7 + $0xb8] sm:$0xff] }
 0x202   :  { %776 = vmatpush1.msra.mxu0 %v395_v58  ;;  %847 = vmatpush1.msra.mxu1 %v397_v59  ;;  %v1004_v58 = vld [vmem:[%s2108_s7 + $0xb0] sm:$0xff]  ;;  %v1003_v59 = vld [vmem:[%s2108_s7 + $0xa8] sm:$0xff] }
 0x203   :  { %777 = vmatprep.subr.mxu0 %v384_v60  ;;  %848 = vmatprep.subr.mxu1 %v386_v61  ;;  %v1002_v60 = vld [vmem:[%s2108_s7 + $0xa0] sm:$0xff]  ;;  %v1001_v61 = vld [vmem:[%s2108_s7 + $0x98] sm:$0xff] }
 0x204   :  { %778 = vmatpush1.msra.mxu0 %v383_v62  ;;  %849 = vmatpush1.msra.mxu1 %v385_v63  ;;  %v1000_v62 = vld [vmem:[%s2108_s7 + $0x90] sm:$0xff]  ;;  %v999_v63 = vld [vmem:[%s2108_s7 + $0x88] sm:$0xff] }
 0x205   :  { %779 = vmatprep.subr.mxu0 %v372_v1  ;;  %850 = vmatprep.subr.mxu1 %v374_v2  ;;  %v998_v1 = vld [vmem:[%s2108_s7 + $0x80] sm:$0xff]  ;;  %v997_v2 = vld [vmem:[%s2108_s7 + $0x78] sm:$0xff] }
 0x206   :  { %780 = vmatpush1.msra.mxu0 %v371_v3  ;;  %851 = vmatpush1.msra.mxu1 %v373_v4  ;;  %v996_v3 = vld [vmem:[%s2108_s7 + $0x70] sm:$0xff]  ;;  %v995_v4 = vld [vmem:[%s2108_s7 + $0x68] sm:$0xff] }
 0x207   :  { %781 = vmatprep.subr.mxu0 %v360_v5  ;;  %852 = vmatprep.subr.mxu1 %v362_v6  ;;  %v994_v5 = vld [vmem:[%s2108_s7 + $0x60] sm:$0xff]  ;;  %v993_v6 = vld [vmem:[%s2108_s7 + $0x58] sm:$0xff] }
 0x208   :  { %782 = vmatpush1.msra.mxu0 %v359_v7  ;;  %853 = vmatpush1.msra.mxu1 %v361_v8  ;;  %v992_v7 = vld [vmem:[%s2108_s7 + $0x50] sm:$0xff]  ;;  %v991_v8 = vld [vmem:[%s2108_s7 + $0x48] sm:$0xff] }
 0x209   :  { %783 = vmatprep.subr.mxu0 %v348_v9  ;;  %854 = vmatprep.subr.mxu1 %v350_v10  ;;  %v990_v9 = vld [vmem:[%s2108_s7 + $0x40] sm:$0xff]  ;;  %v989_v10 = vld [vmem:[%s2108_s7 + $0x38] sm:$0xff] }
 0x20a   :  { %784 = vmatpush1.msra.mxu0 %v347_v11  ;;  %855 = vmatpush1.msra.mxu1 %v349_v12  ;;  %v988_v11 = vld [vmem:[%s2108_s7 + $0x30] sm:$0xff]  ;;  %v987_v12 = vld [vmem:[%s2108_s7 + $0x28] sm:$0xff] }
 0x20b   :  { %785 = vmatprep.subr.mxu0 %v336_v13  ;;  %856 = vmatprep.subr.mxu1 %v338_v14  ;;  %v986_v13 = vld [vmem:[%s2108_s7 + $0x20] sm:$0xff]  ;;  %v985_v14 = vld [vmem:[%s2108_s7 + $0x18] sm:$0xff] }
 0x20c   :  { %786 = vmatpush1.msra.mxu0 %v335_v15  ;;  %857 = vmatpush1.msra.mxu1 %v337_v16  ;;  %v984_v15 = vld [vmem:[%s2108_s7 + $0x10] sm:$0xff]  ;;  %v983_v16 = vld [vmem:[%s2108_s7 + $0x8] sm:$0xff] }
 0x20d   :  { %787 = vmatprep.subr.mxu0 %v324_v17  ;;  %858 = vmatprep.subr.mxu1 %v326_v18  ;;  %v982_v17 = vld [vmem:[%s2108_s7] sm:$0xff]  ;;  %v427_v18 = vlaneseq }
 0x20e   :  { %788 = vmatpush1.msra.mxu0 %v323_v19  ;;  %859 = vmatpush1.msra.mxu1 %v325_v20  ;;  %v1216_v20 = vmov 1983009808  }
 0x20f   :  { %789 = vmatprep.subr.mxu0 %v312_v21  ;;  %860 = vmatprep.subr.mxu1 %v314_v22  ;;  %v428_v19 = vshrl.u32 %v427_v18, 7  ;;  %v928_v21 = vunpack.c.l.s4 %v1216_v20 }
 0x210   :  { %790 = vmatpush1.msra.mxu0 %v311_v23  ;;  %861 = vmatpush1.msra.mxu1 %v313_v24 }
 0x211   :  { %791 = vmatprep.subr.mxu0 %v300_v25  ;;  %862 = vmatprep.subr.mxu1 %v302_v26  ;;  %v2071_v22 = vsub.s32 0, %v428_v19  ;;  %v437_v23 = vsub.s32 2, %v428_v19  ;;  %v2073_v24 = vsub.s32 1, %v428_v19  ;;  %v441_v25 = vsub.s32 3, %v428_v19  ;;  %v423_v26 = vld [vmem:[%s2109_s6] sm:$0xff] }
 0x212   :  { %792 = vmatpush1.msra.mxu0 %v299_v27  ;;  %863 = vmatpush1.msra.mxu1 %v301_v28  ;;  %v929_v27 = vunpack.c.0.s8 %v928_v21  ;;  %v1014_v21 = vld [vmem:[%s2111_s8] sm:$0x3] }
 0x213   :  { %793 = vmatprep.subr.mxu0 %v288_v29  ;;  %864 = vmatprep.subr.mxu1 %v290_v30  ;;  %v430_v28 = vrot.slane %v423_v26, %v2071_v22  ;;  %v438_v29 = vrot.slane %v423_v26, %v437_v23  ;;  %v442_v30 = vrot.slane %v423_v26, %v441_v25 }
 0x214   :  { %794 = vmatpush1.msra.mxu0 %v287_v31  ;;  %865 = vmatpush1.msra.mxu1 %v289_v32 }
 0x215   :  { %795 = vmatprep.subr.mxu0 %v276_v33  ;;  %866 = vmatprep.subr.mxu1 %v278_v34  ;;  %v932_v34 = vsub.s32 %v929_v27, %v428_v19 }
 0x216   :  { %796 = vmatpush1.msra.mxu0 %v275_v35  ;;  %867 = vmatpush1.msra.mxu1 %v277_v36 }
 0x217   :  { %797 = vmatprep.subr.mxu0 %v264_v37  ;;  %868 = vmatprep.subr.mxu1 %v266_v38 }
 0x218   :  { %798 = vmatpush1.msra.mxu0 %v263_v39  ;;  %869 = vmatpush1.msra.mxu1 %v265_v41 }
 0x219   :  { %799 = vmatprep.subr.mxu0 %v252_v42  ;;  %870 = vmatprep.subr.mxu1 %v254_v43 }
 0x21a   :  { %800 = vmatpush1.msra.mxu0 %v251_v44  ;;  %871 = vmatpush1.msra.mxu1 %v253_v45 }
 0x21b   :  { %801 = vmatprep.subr.mxu0 %v240_v47  ;;  %872 = vmatprep.subr.mxu1 %v242_v48  ;;  %v445_v47 = vsub.s32 4, %v428_v19  ;;  %v453_v48 = vsub.s32 6, %v428_v19 }
 0x21c   :  { %802 = vmatpush1.msra.mxu0 %v239_v49  ;;  %835 = vmatprep.mubr.f32.mxu0 %v1214_v0  ;;  %v449_v49 = vsub.s32 5, %v428_v19 }
 0x21d   :  { %873 = vmatpush1.msra.mxu1 %v241_v50  ;;  %906 = vmatprep.mubr.f32.mxu1 %v1214_v0  ;;  %v457_v50 = vsub.s32 7, %v428_v19 }
 0x21e   :  { %836 = vmatmul.mubr.f32.vlgmr.msra.gmra.mxu0 %v1583_v46  ;;  %907 = vmatmul.mubr.f32.vlgmr.msra.gmra.mxu1 %v1583_v46  ;;  %v1008_v46 = vld [vmem:[%s2108_s7 + $0xd0] sm:$0xff] }
 0x21f   :  { %1026 = vmatprep.subr.mxu0 %v1013_v51  ;;  %1090 = vmatprep.mubr.f32.mxu0 %v1214_v0  ;;  %v1006_v0 = vld [vmem:[%s2108_s7 + $0xc0] sm:$0xff]  ;;  %v446_v51 = vrot.slane %v423_v26, %v445_v47 }
 0x220   :  { %1027 = vmatpush1.msra.mxu0 %v1012_v52  ;;  %v454_v52 = vrot.slane %v423_v26, %v453_v48 }
 0x221   :  { %1028 = vmatprep.subr.mxu0 %v1011_v53  ;;  %v450_v53 = vrot.slane %v423_v26, %v449_v49 }
 0x222   :  { %1029 = vmatpush1.msra.mxu0 %v1010_v54  ;;  %v458_v54 = vrot.slane %v423_v26, %v457_v50 }
 0x223   :  { %1030 = vmatprep.subr.mxu0 %v1009_v55 }
 0x224   :  { %1031 = vmatpush1.msra.mxu0 %v1008_v46 }
 0x225   :  { %1032 = vmatprep.subr.mxu0 %v1007_v56 }
 0x226   :  { %1033 = vmatpush1.msra.mxu0 %v1006_v0 }
 0x227   :  { %1034 = vmatprep.subr.mxu0 %v1005_v57 }
 0x228   :  { %1035 = vmatpush1.msra.mxu0 %v1004_v58 }
 0x229   :  { %1036 = vmatprep.subr.mxu0 %v1003_v59 }
 0x22a   :  { %1037 = vmatpush1.msra.mxu0 %v1002_v60 }
 0x22b   :  { %1038 = vmatprep.subr.mxu0 %v1001_v61 }
 0x22c   :  { %1039 = vmatpush1.msra.mxu0 %v1000_v62 }
 0x22d   :  { %1040 = vmatprep.subr.mxu0 %v999_v63 }
 0x22e   :  { %1041 = vmatpush1.msra.mxu0 %v998_v1 }
 0x22f   :  { %1042 = vmatprep.subr.mxu0 %v997_v2 }
 0x230   :  { %1043 = vmatpush1.msra.mxu0 %v996_v3  ;;  %v424_v3 = vld [vmem:[%s2109_s6 + $0x8] sm:$0xf] }
 0x231   :  { %1044 = vmatprep.subr.mxu0 %v995_v4  ;;  %v462_v4 = vrot.slane %v424_v3, %v2071_v22 }
 0x232   :  { %1045 = vmatpush1.msra.mxu0 %v994_v5  ;;  %v470_v5 = vrot.slane %v424_v3, %v437_v23  ;;  %v1019_v23 = vrot.slane %v1014_v21, %v2071_v22 }
 0x233   :  { %1046 = vmatprep.subr.mxu0 %v993_v6  ;;  %v466_v6 = vrot.slane %v424_v3, %v2073_v24 }
 0x234   :  { %1047 = vmatpush1.msra.mxu0 %v992_v7  ;;  %v474_v7 = vrot.slane %v424_v3, %v441_v25  ;;  %v1023_v25 = vrot.slane %v1014_v21, %v2073_v24 }
 0x235   :  { %1048 = vmatprep.subr.mxu0 %v991_v8 }
 0x236   :  { %1049 = vmatpush1.msra.mxu0 %v990_v9 }
 0x237   :  { %1050 = vmatprep.subr.mxu0 %v989_v10 }
 0x238   :  { %1051 = vmatpush1.msra.mxu0 %v988_v11 }
 0x239   :  { %1052 = vmatprep.subr.mxu0 %v987_v12 }
 0x23a   :  { %1053 = vmatpush1.msra.mxu0 %v986_v13 }
 0x23b   :  { %1054 = vmatprep.subr.mxu0 %v985_v14 }
 0x23c   :  { %1055 = vmatpush1.msra.mxu0 %v984_v15 }
 0x23d   :  { %1056 = vmatprep.subr.mxu0 %v983_v16 }
 0x23e   :  { %1057 = vmatpush1.msra.mxu0 %v982_v17 }
 0x23f   :  { %1091 = vmatmul.mubr.f32.vlgmr.msra.gmra.mxu0 %v1579_v40  ;;  %v434_v40 = vrot.slane %v423_v26, %v2073_v24 }
 0x29b   :  { %v553_v31 = vpop.f32.mrf.mxu0  ;;  %v624_v32 = vpop.f32.mrf.mxu1 }
 0x29c   :  { %v554_v36 = vadd.f32 %v553_v31, %v430_v28  ;;  %v625_v37 = vadd.f32 %v624_v32, %v438_v29 }
 0x29d   :  { %v555_v33 = vpop.f32.mrf.mxu0  ;;  %v626_v35 = vpop.f32.mrf.mxu1 }
 0x29e   :  { %v556_v38 = vadd.f32 %v555_v33, %v434_v40  ;;  %v627_v39 = vadd.f32 %v626_v35, %v442_v30 }
 0x2a0   :  { %v925_v41 = vcombine.low %v554_v36, %v556_v38  ;;  %v926_v42 = vcombine.low %v625_v37, %v627_v39 }
 0x2a2   :  { %v933_v43 = vrot.slane %v925_v41, %v932_v34  ;;  %v940_v44 = vrot.slane %v926_v42, %v932_v34 }
 0x2a4   :  { %v941_v45 = vcombine.low %v933_v43, %v940_v44 }
 0x2a6   :  { %979 = vst [vmem:[%s2110_s9] sm:$0xff] %v941_v45 }
 0x2bc   :  { %v695_v55 = vpop.f32.mrf.mxu0  ;;  %v766_v46 = vpop.f32.mrf.mxu1 }
 0x2bd   :  { %v696_v57 = vadd.f32 %v695_v55, %v446_v51  ;;  %v767_v58 = vadd.f32 %v766_v46, %v454_v52 }
 0x2be   :  { %v697_v56 = vpop.f32.mrf.mxu0  ;;  %v768_v0 = vpop.f32.mrf.mxu1 }
 0x2bf   :  { %v698_v59 = vadd.f32 %v697_v56, %v450_v53  ;;  %v769_v60 = vadd.f32 %v768_v0, %v458_v54 }
 0x2c1   :  { %v942_v61 = vcombine.low %v696_v57, %v698_v59  ;;  %v943_v62 = vcombine.low %v767_v58, %v769_v60 }
 0x2c3   :  { %v950_v63 = vrot.slane %v942_v61, %v932_v34  ;;  %v957_v1 = vrot.slane %v943_v62, %v932_v34 }
 0x2c5   :  { %v958_v2 = vcombine.low %v950_v63, %v957_v1 }
 0x2c7   :  { %980 = vst [vmem:[%s2110_s9 + $0x8] sm:$0xff] %v958_v2 }
 0x2de   :  { %v837_v8 = vpop.f32.mrf.mxu0  ;;  %v908_v9 = vpop.f32.mrf.mxu1 }
 0x2df   :  { %v838_v12 = vadd.f32 %v837_v8, %v462_v4  ;;  %v909_v13 = vadd.f32 %v908_v9, %v470_v5 }
 0x2e0   :  { %v839_v10 = vpop.f32.mrf.mxu0  ;;  %v910_v11 = vpop.f32.mrf.mxu1 }
 0x2e1   :  { %v840_v14 = vadd.f32 %v839_v10, %v466_v6  ;;  %v911_v15 = vadd.f32 %v910_v11, %v474_v7 }
 0x2e3   :  { %v959_v16 = vcombine.low %v838_v12, %v840_v14  ;;  %v960_v17 = vcombine.low %v909_v13, %v911_v15 }
 0x2e5   :  { %v967_v18 = vrot.slane %v959_v16, %v932_v34  ;;  %v974_v19 = vrot.slane %v960_v17, %v932_v34 }
 0x2e7   :  { %v975_v20 = vcombine.low %v967_v18, %v974_v19 }
 0x2e9   :  { %981 = vst [vmem:[%s2110_s9 + $0x10] sm:$0xff] %v975_v20 }
 0x2ff   :  { %v1092_v26 = vpop.f32.mrf.mxu0 }
 0x300   :  { %v1093_v28 = vadd.f32 %v1092_v26, %v1019_v23 }
 0x301   :  { %v1094_v27 = vpop.f32.mrf.mxu0 }
 0x302   :  { %v1095_v29 = vadd.f32 %v1094_v27, %v1023_v25 }
 0x304   :  { %v1099_v40 = vcombine.low %v1093_v28, %v1095_v29 }
 0x306   :  { %1122 = vst.sshfl [vmem:[%s2112_s10] sm:$0x33 pattern:$0x76325410] %v1099_v40 }

// kernel: dit_forward.3
= control target key start
LH: loop header
LB: loop body
LE: loop exit
PB: predicated region body
PF: predicated region fallthrough
CT: control target
= control target key end

     0   :  { %s3929_s0 = inlined_call_operand.vmem [shape: f32[2,16,128], index: 0, kind: input, shape index: {}]   ;;  %s3930_s1 = inlined_call_operand.vmem [shape: f32[16,128], index: 1, kind: input, shape index: {}]   ;;  %s3931_s2 = inlined_call_operand.vmem [shape: f32[2,2,6,128], index: 2, kind: input, shape index: {}]   ;;  %s3932_s3 = inlined_call_operand.vmem [shape: f32[2,2,128], index: 3, kind: input, shape index: {}]   ;;  %s3933_s4 = inlined_call_operand.vmem [shape: bf16[128,128], index: 4, kind: input, shape index: {}]   ;;  %s3934_s5 = inlined_call_operand.vmem [shape: f32[1,128], index: 5, kind: input, shape index: {}]   ;;  %s3935_s6 = inlined_call_operand.vmem [shape: bf16[2,128,384], index: 6, kind: input, shape index: {}]   ;;  %s3936_s7 = inlined_call_operand.vmem [shape: f32[2,1,384], index: 7, kind: input, shape index: {}]   ;;  %s3937_s8 = inlined_call_operand.vmem [shape: bf16[2,128,128], index: 8, kind: input, shape index: {}]   ;;  %s3938_s9 = inlined_call_operand.vmem [shape: f32[2,1,128], index: 9, kind: input, shape index: {}]   ;;  %s3939_s10 = inlined_call_operand.vmem [shape: bf16[2,128,256], index: 10, kind: input, shape index: {}]   ;;  %s3940_s11 = inlined_call_operand.vmem [shape: f32[2,1,256], index: 11, kind: input, shape index: {}]   ;;  %s3941_s12 = inlined_call_operand.vmem [shape: bf16[2,256,128], index: 12, kind: input, shape index: {}]   ;;  %s3942_s13 = inlined_call_operand.vmem [shape: f32[2,1,128], index: 13, kind: input, shape index: {}]   ;;  %s3943_s14 = inlined_call_operand.vmem [shape: bf16[128,128], index: 14, kind: input, shape index: {}]   ;;  %s3944_s15 = inlined_call_operand.vmem [shape: f32[1,128], index: 15, kind: input, shape index: {}]   ;;  %s3945_s16 = inlined_call_operand.hbm [shape: f32[2,16,128], index: 16, kind: output, shape index: {}]  }
   0x1   :  { %3963 = sst [smem:[#allocation19_spill]] %s3929_s0 }
   0x2   :  { %3964 = sst [smem:[#allocation20_spill]] %s3930_s1 }
   0x3   :  { %3965 = sst [smem:[#allocation21_spill]] %s3931_s2 }
   0x4   :  { %3966 = sst [smem:[#allocation22_spill]] %s3932_s3 }
   0x5   :  { %3967 = sst [smem:[#allocation23_spill]] %s3933_s4 }
   0x6   :  { %3968 = sst [smem:[#allocation24_spill]] %s3934_s5 }
   0x7   :  { %3969 = sst [smem:[#allocation25_spill]] %s3935_s6 }
   0x8   :  { %3970 = sst [smem:[#allocation26_spill]] %s3943_s14 }
   0x9   :  { %3971 = sst [smem:[#allocation27_spill]] %s3944_s15 }
   0xa   :  { %3972 = sst [smem:[#allocation28_spill]] %s3945_s16 }
   0xb   :  { %21 = vsyncpa [#allocation4], 0 }
   0xc   :  { %23 = vsyncpa [#allocation4 + $0x1], 0  ;;  %s3406_s21 = smov 0   ;;  %s3408_s22 = smov 0  }
   0xd   :  { %s3410_s23 = smov 0   ;;  %s3412_s24 = smov 0  }
   0xe   :  { %s3414_s25 = smov 0   ;;  %s3416_s26 = smov 0  }
   0xf   :  { %s3418_s27 = smov 0   ;;  %s3420_s28 = smov 0  }
  0x10 LB: > { %3973 = sst [smem:[#allocation6_spill]] %s3278_s21  ;;  %s2657_s29 = sadd.s32 4294967295, %s3306_s28   ;;  %s3306_s28 = sphi %s3420_s28, %s29_s28   ;;  %s3302_s27 = sphi %s3418_s27, %s4015_s27   ;;  %s3298_s26 = sphi %s3416_s26, %s4014_s26   ;;  %s3294_s25 = sphi %s3414_s25, %s4013_s25   ;;  %s3290_s24 = sphi %s3412_s24, %s4012_s24   ;;  %s3286_s23 = sphi %s3410_s23, %s4011_s23   ;;  %s3282_s22 = sphi %s3408_s22, %s4010_s22   ;;  %s3278_s21 = sphi %s3406_s21, %s4009_s21  }
  0x11   : > { %3974 = sst [smem:[#allocation7_spill]] %s3282_s22  ;;  %s2658_s30 = sadd.s32 4294967294, %s3306_s28  }
  0x12   : > { %3975 = sst [smem:[#allocation8_spill]] %s3286_s23  ;;  %s38_s0 = sadd.s32 1, %s3298_s26 }
  0x13   : > { %3976 = sst [smem:[#allocation9_spill]] %s3294_s25  ;;  %p39_p0 = scmp.ge.s32.totalorder %s38_s0, 2 }
  0x14   : > { %3977 = sst [smem:[#allocation10_spill]] %s3298_s26  ;;  %s41_s17 = sadd.s32 1, %s3302_s27 }
  0x15   : > { %3978 = sst [smem:[#allocation11_spill]] %s3302_s27  ;;  %p451_p1 = scmp.ne.s32.totalorder %s3286_s23, %s3282_s22 }
  0x16   : > { %3979 = sst [smem:[#allocation12_spill]] %s3306_s28  ;;  %p452_p2 = scmp.eq.s32.totalorder %s2657_s29, 3 }
  0x17   : > { %s4017_s0 = smov (%p39_p0, %s38_s0), 0  ;;  %s4019_s17 = smov (!%p39_p0, %s41_s17), %s3302_s27 }
  0x18   : > { %3980 = sst [smem:[#allocation13_spill]] %s4017_s0  ;;  %p3455_p3 = por %p452_p2, %p451_p1 }
  0x19   : > { %p457_p4 = scmp.ne.s32.totalorder %s3282_s22, %s3278_s21  ;;  %p43_p5 = scmp.ge.s32.totalorder %s4019_s17, 2 }
  0x1a   : > { %s3981_s18 = scalar_select %p3455_p3, 1, 0 }
  0x1b   : > { %p458_p6 = scmp.eq.s32.totalorder %s2658_s30, 3  ;;  %p2661_p7 = scmp.ge.s32.totalorder %s3306_s28, 1 }
  0x1c   : > { %3982 = sst [smem:[#allocation14_spill]] %s3981_s18  ;;  %p575_p8 = scmp.lt.s32.totalorder %s3306_s28, 5 }
  0x1d   : > { %s4021_s17 = smov (%p43_p5, %s4019_s17), 0  ;;  %p3465_p9 = por %p458_p6, %p457_p4 }
  0x1e   : > { %3983 = sst [smem:[#allocation15_spill]] %s4021_s17  ;;  %p576_p10 = pnand %p2661_p7, %p575_p8 }
  0x1f   : > { %s3984_s19 = scalar_select %p3465_p9, 1, 0 }
  0x20   : > { %s438_s20 = ssub.s32 %s3302_s27, %s4021_s17  ;;  %s441_s29 = sadd.s32 1, %s3286_s23 }
  0x21   : > { %3985 = sst [smem:[#allocation16_spill]] %s3984_s19  ;;  %p439_p11 = scmp.eq.s32.totalorder %s438_s20, 0 }
  0x22   : > { %579 = sbr.rel (%p576_p10) target bundleno = 3968 (0xf80), region = 84 }
  0x23   : > { %s3473_s0 = scalar_select %p439_p11, %s3286_s23, %s441_s29  }
  0x25   : > { %3986 = sst [smem:[#allocation17_spill]] %s3473_s0 }
  0x27   : > { %s3954_s30 = sand.u32 1, %s3282_s22   ;;  %p671_p12 = scmp.lt.s32.totalorder %s3294_s25, 1 }
  0x28   : > { %s2662_s26 = sshll.u32 %s3954_s30, 4  ;;  %p678_p13 = scmp.lt.s32.totalorder %s3290_s24, 1 }
  0x29   : > { %s672_s21 = scalar_select %p671_p12, %s3294_s25, 1 }
  0x2a   : > { %s3482_s19 = scalar_select %p678_p13, %s3290_s24, 1 }
  0x2b   : > { %s2775_s20 = sshll.u32 %s672_s21, 4  ;;  %s2665_s29 = sshll.u32 %s672_s21, 1 }
  0x2c   : > { %s3987_s0 = sld [smem:[#allocation19_spill]]  ;;  %s681_s28 = sadd.s32 %s2665_s29, %s3482_s19 }
  0x2d   : > { %s2666_s30 = sshll.u32 %s681_s28, 3  ;;  %s3988_s3 = sld [smem:[#allocation22_spill]] }
  0x2e   : > { %s3990_s2 = sld [smem:[#allocation21_spill]]  ;;  %s2985_s1 = smul.u32 192, %s3482_s19 }
  0x2f   : > { %s2986_s21 = smul.u32 3, %s3482_s19  ;;  %s2776_s5 = sshll.u32 %s3482_s19, 6 }
  0x30   : > { %s3991_s6 = sld [smem:[#allocation25_spill]]  ;;  %s721_s25 = scalar_lea.vmem %s3942_s13, %s3482_s19 }
  0x31   : > { %p2676_p0 = scmp.ne.s32.totalorder %s3290_s24, 0 }
  0x32   : > { %s3487_s23 = scalar_lea.vmem %s3987_s0, %s2775_s20  ;;  %s3511_s20 = scalar_lea.vmem %s3937_s8, %s2776_s5 }
  0x33   : > { %s3493_s22 = scalar_lea.vmem %s3988_s3, %s2665_s29  ;;  %s3516_s29 = scalar_lea.vmem %s3936_s7, %s2986_s21 }
  0x34   : > { %3989 = sst [smem:[#allocation18_spill]] %s3493_s22  ;;  %s3498_s14 = scalar_lea.vmem %s3990_s2, %s2666_s30 }
  0x35   : > { %s2777_s2 = sshll.u32 %s3482_s19, 7  ;;  %s2673_s3 = sshll.u32 %s3482_s19, 1 }
  0x36   : > { %s3506_s0 = scalar_lea.vmem %s3991_s6, %s2985_s1  ;;  %s3527_s1 = scalar_lea.vmem %s3939_s10, %s2777_s2 }
  0x37   : > { %s3532_s5 = scalar_lea.vmem %s3940_s11, %s2673_s3  ;;  %s3537_s21 = scalar_lea.vmem %s3941_s12, %s2777_s2 }
  0x38   : > { %s3543_s30 = scalar_lea.vmem [#allocation3], %s2662_s26  ;;  %726 = sbr.rel (%p2676_p0) target bundleno = 297 (0x129), region = 88 }
  0x39   : > { %s3992_s6 = sld [smem:[#allocation23_spill]] (!%p2676_p0) }
  0x3a   : > { %s3993_s28 = sld [smem:[#allocation24_spill]] (!%p2676_p0) }
  0x3b   : > { %s3994_s15 = sld [smem:[#allocation20_spill]] (!%p2676_p0) }
  0x3d   : > { %v3308_v1 = vmov 0.0   ;;  %vm3309_vm0 = vmmov 0   ;;  %v727_v9 = vld [vmem:[%s3487_s23] sm:$0xff]  ;;  %v728_v10 = vld [vmem:[%s3487_s23 + $0x8] sm:$0xff] }
  0x3e   : > { %2853 = vmatprep.subr.bf16.mxu0 %v3308_v1  ;;  %2869 = vmatprep.mubr.msk.bf16.mxu0 %vm3309_vm0, %v3308_v1  ;;  %v729_v11 = vpack.c.bf16 %v728_v10, %v727_v9 }
  0x3f   : > { %v3070_v0 = vld [vmem:[%s3992_s6 + $0x38] sm:$0xff]   ;;  %v3071_v2 = vld [vmem:[%s3992_s6 + $0x30] sm:$0xff]   ;;  %v3072_v3 = vld [vmem:[%s3992_s6 + $0x28] sm:$0xff]  }
  0x40   : > { %2854 = vmatpush3.bf16.msra.mxu0 %v3070_v0  ;;  %v3073_v4 = vld [vmem:[%s3992_s6 + $0x20] sm:$0xff]   ;;  %v3074_v5 = vld [vmem:[%s3992_s6 + $0x18] sm:$0xff]   ;;  %v3075_v6 = vld [vmem:[%s3992_s6 + $0x10] sm:$0xff]  }
  0x41   : > { %2855 = vmatprep.subr.bf16.mxu0 %v3308_v1  ;;  %v3076_v7 = vld [vmem:[%s3992_s6 + $0x8] sm:$0xff]   ;;  %v3077_v8 = vld [vmem:[%s3992_s6] sm:$0xff]  }
  0x42   : > { %v2677_v12 = vld [vmem:[%s3993_s28] ss:$0 sm:$0xff]  ;;  %v843_v19 = vld [vmem:[%s3994_s15 + $0x8] sm:$0xff] }
  0x43   : > { %v842_v14 = vld [vmem:[%s3994_s15] sm:$0xff] }
  0x44   : > { %2856 = vmatpush3.bf16.msra.mxu0 %v3071_v2 }
  0x45   : > { %2857 = vmatprep.subr.bf16.mxu0 %v3308_v1 }
  0x48   : > { %2858 = vmatpush3.bf16.msra.mxu0 %v3072_v3 }
  0x49   : > { %2859 = vmatprep.subr.bf16.mxu0 %v3308_v1 }
  0x4c   : > { %2860 = vmatpush3.bf16.msra.mxu0 %v3073_v4 }
  0x4d   : > { %2861 = vmatprep.subr.bf16.mxu0 %v3308_v1 }
  0x50   : > { %2862 = vmatpush3.bf16.msra.mxu0 %v3074_v5 }
  0x51   : > { %2863 = vmatprep.subr.bf16.mxu0 %v3308_v1 }
  0x54   : > { %2864 = vmatpush3.bf16.msra.mxu0 %v3075_v6 }
  0x55   : > { %2865 = vmatprep.subr.bf16.mxu0 %v3308_v1 }
  0x58   : > { %2866 = vmatpush3.bf16.msra.mxu0 %v3076_v7 }
  0x59   : > { %2867 = vmatprep.subr.bf16.mxu0 %v3308_v1 }
  0x5c   : > { %2868 = vmatpush3.bf16.msra.mxu0 %v3077_v8 }
  0x5f   : > { %2870 = vmatmul.mubr.bf16.vlgmr.msra.gmra.mxu0 %v729_v11 }
 0x11f   : > { %v835_v13 = vpop.f32.mrf.mxu0 }
 0x120   : > { %v836_v15 = vadd.f32 %v2677_v12, %v835_v13 }
 0x121   : > { %v2871_v16 = vpop.f32.mrf.mxu0 }
 0x122   : > { %v844_v17 = vadd.f32 %v842_v14, %v836_v15 }
 0x123   : > { %v838_v18 = vpop.f32.mrf.mxu0 }
 0x124   : > { %846 = vst [vmem:[#allocation2] sm:$0xff] %v844_v17  ;;  %v839_v20 = vadd.f32 %v2677_v12, %v838_v18 }
 0x125   : > { %v2872_v21 = vpop.f32.mrf.mxu0 }
 0x126   : > { %v845_v22 = vadd.f32 %v843_v19, %v839_v20 }
 0x128   : > { %847 = vst [vmem:[#allocation2 + $0x8] sm:$0xff] %v845_v22 }
 0x129 PF: > { %v3078_v27 = vld [vmem:[%s3506_s0 + $0xac] ss:$12 sps:$4 sm:$0xff]   ;;  %v3080_v28 = vld [vmem:[%s3506_s0 + $0xa8] ss:$12 sps:$4 sm:$0xff]   ;;  %v3081_v29 = vld [vmem:[%s3506_s0 + $0xb0] ss:$12 sps:$4 sm:$0xff]   ;;  %v878_v3 = vlaneseq  ;;  %s3995_s27 = scalar_lea.vmem %s3938_s9, %s3482_s19 }
 0x12a   : > { %1068 = vmatprep.subr.bf16.mxu0 %v3078_v27  ;;  %v3310_v30 = vmov 0.0   ;;  %v3082_v31 = vld [vmem:[%s3506_s0 + $0x94] ss:$12 sps:$4 sm:$0xff]   ;;  %v3084_v32 = vld [vmem:[%s3506_s0 + $0x90] ss:$12 sps:$4 sm:$0xff]   ;;  %v3311_v46 = vmov 0  }
 0x12b   : > { %v3581_v23 = vld [vmem:[#allocation2] sm:$0xff]  ;;  %2873 = vmatprep.subr.bf16.mxu1 %v3310_v30  ;;  %1069 = vmatpush1.bf16.msra.mxu0 %v3080_v28  ;;  %v3086_v34 = vld [vmem:[%s3506_s0 + $0x7c] ss:$12 sps:$4 sm:$0xff]   ;;  %v3094_v40 = vld [vmem:[%s3506_s0 + $0x4c] ss:$12 sps:$4 sm:$0xff]   ;;  %vm3312_vm1 = vmmov 0  }
 0x12c   : > { %851 = vadd.xlane.f32.xlu0 %v3581_v23  ;;  %v857_v25 = vmul.f32 %v3581_v23, %v3581_v23  ;;  %2874 = vmatpush3.bf16.msra.mxu1 %v3081_v29  ;;  %v3085_v33 = vld [vmem:[%s3506_s0 + $0x98] ss:$12 sps:$4 sm:$0xff]   ;;  %v3089_v36 = vld [vmem:[%s3506_s0 + $0x80] ss:$12 sps:$4 sm:$0xff]   ;;  %v3093_v39 = vld [vmem:[%s3506_s0 + $0x68] ss:$12 sps:$4 sm:$0xff]  }
 0x12d   : > { %2875 = vmatprep.subr.bf16.mxu1 %v3310_v30  ;;  %1070 = vmatprep.subr.bf16.mxu0 %v3082_v31  ;;  %v3088_v35 = vld [vmem:[%s3506_s0 + $0x78] ss:$12 sps:$4 sm:$0xff]   ;;  %v3092_v38 = vld [vmem:[%s3506_s0 + $0x60] ss:$12 sps:$4 sm:$0xff]   ;;  %v3096_v41 = vld [vmem:[%s3506_s0 + $0x48] ss:$12 sps:$4 sm:$0xff]  }
 0x12e   : > { %859 = vadd.xlane.f32.xlu1 %v857_v25  ;;  %v3090_v37 = vld [vmem:[%s3506_s0 + $0x64] ss:$12 sps:$4 sm:$0xff]   ;;  %v3098_v43 = vld [vmem:[%s3506_s0 + $0x34] ss:$12 sps:$4 sm:$0xff]   ;;  %1100 = vmatprep.mubr.bf16.mxu0 %v3311_v46  ;;  %v3102_v47 = vld [vmem:[%s3506_s0 + $0x1c] ss:$12 sps:$4 sm:$0xff]  }
 0x12f   : > { %v3583_v24 = vld [vmem:[#allocation2 + $0x8] sm:$0xff]  ;;  %1071 = vmatpush1.bf16.msra.mxu0 %v3084_v32  ;;  %v3097_v42 = vld [vmem:[%s3506_s0 + $0x50] ss:$12 sps:$4 sm:$0xff]   ;;  %v3101_v45 = vld [vmem:[%s3506_s0 + $0x38] ss:$12 sps:$4 sm:$0xff]   ;;  %2889 = vmatprep.mubr.msk.bf16.mxu1 %vm3312_vm1, %v3310_v30  ;;  %v3628_v4 = vshrl.u32 %v878_v3, 7 }
 0x130   : > { %v858_v26 = vmul.f32 %v3583_v24, %v3583_v24  ;;  %853 = vadd.xlane.f32.xlu0 %v3583_v24  ;;  %2876 = vmatpush3.bf16.msra.mxu1 %v3085_v33  ;;  %v3100_v44 = vld [vmem:[%s3506_s0 + $0x30] ss:$12 sps:$4 sm:$0xff]   ;;  %v3104_v48 = vld [vmem:[%s3506_s0 + $0x18] ss:$12 sps:$4 sm:$0xff]   ;;  %v3105_v49 = vld [vmem:[%s3506_s0 + $0x20] ss:$12 sps:$4 sm:$0xff]  }
 0x131   : > { %2877 = vmatprep.subr.bf16.mxu1 %v3310_v30  ;;  %1072 = vmatprep.subr.bf16.mxu0 %v3086_v34  ;;  %v3106_v50 = vld [vmem:[%s3506_s0 + $0x4] ss:$12 sps:$4 sm:$0xff]   ;;  %v3108_v51 = vld [vmem:[%s3506_s0] ss:$12 sps:$4 sm:$0xff]   ;;  %v3109_v52 = vld [vmem:[%s3506_s0 + $0x8] ss:$12 sps:$4 sm:$0xff]  }
 0x132   : > { %861 = vadd.xlane.f32.xlu1 %v858_v26  ;;  %v3631_v5 = vld [vmem:[%s3498_s14] sm:$0x3f]  ;;  %v3637_v7 = vsub.s32 1, %v3628_v4  ;;  %v3643_v12 = vsub.s32 0, %v3628_v4  ;;  %v935_v22 = vsub.s32 2, %v3628_v4  ;;  %vm1163_vm2 = vcmask 130048  }
 0x133   : > { %1073 = vmatpush1.bf16.msra.mxu0 %v3088_v35  ;;  %v3634_v6 = vadd.f32 1.0, %v3631_v5  ;;  %v923_v25 = vld [vmem:[%s3516_s29] sm:$0x7]  ;;  %s3313_s14 = smov 112   ;;  %s3314_s23 = smov 96  }
 0x134   : > { %2878 = vmatpush3.bf16.msra.mxu1 %v3089_v36  ;;  %1074 = vmatprep.subr.bf16.mxu0 %v3090_v37  ;;  %v887_v17 = vrot.slane %v3631_v5, %v3643_v12  ;;  %v928_v28 = vrot.slane %v923_v25, %v3643_v12  ;;  %v936_v29 = vrot.slane %v923_v25, %v935_v22  ;;  %s3315_s0 = smov 80   ;;  %p2760_p1 = scmp.ne.s32.totalorder %s3290_s24, 1 }
 0x135   : > { %2879 = vmatprep.subr.bf16.mxu1 %v3310_v30  ;;  %v881_v11 = vrot.slane %v3634_v6, %v3637_v7  ;;  %v932_v33 = vrot.slane %v923_v25, %v3637_v7  ;;  %s3999_s19 = sld [smem:[#allocation27_spill]] (!%p2760_p1) }
 0x137   : > { %1075 = vmatpush1.bf16.msra.mxu0 %v3092_v38 }
 0x138   : > { %2880 = vmatpush3.bf16.msra.mxu1 %v3093_v39  ;;  %1076 = vmatprep.subr.bf16.mxu0 %v3094_v40 }
 0x139   : > { %2881 = vmatprep.subr.bf16.mxu1 %v3310_v30 }
 0x13b   : > { %1077 = vmatpush1.bf16.msra.mxu0 %v3096_v41 }
 0x13c   : > { %2882 = vmatpush3.bf16.msra.mxu1 %v3097_v42  ;;  %1078 = vmatprep.subr.bf16.mxu0 %v3098_v43 }
 0x13d   : > { %2883 = vmatprep.subr.bf16.mxu1 %v3310_v30 }
 0x13f   : > { %1079 = vmatpush1.bf16.msra.mxu0 %v3100_v44 }
 0x140   : > { %2884 = vmatpush3.bf16.msra.mxu1 %v3101_v45  ;;  %1080 = vmatprep.subr.bf16.mxu0 %v3102_v47 }
 0x141   : > { %2885 = vmatprep.subr.bf16.mxu1 %v3310_v30 }
 0x143   : > { %1081 = vmatpush1.bf16.msra.mxu0 %v3104_v48 }
 0x144   : > { %2886 = vmatpush3.bf16.msra.mxu1 %v3105_v49  ;;  %1082 = vmatprep.subr.bf16.mxu0 %v3106_v50 }
 0x145   : > { %2887 = vmatprep.subr.bf16.mxu1 %v3310_v30 }
 0x147   : > { %1083 = vmatpush1.bf16.msra.mxu0 %v3108_v51 }
 0x148   : > { %2888 = vmatpush3.bf16.msra.mxu1 %v3109_v52  ;;  %2893 = vmatprep.subr.bf16.mxu0 %v3310_v30 }
 0x149   : > { %2899 = vmatprep.subr.bf16.mxu1 %v3310_v30 }
 0x1b5   : > { %v852_v53 = vpop.xlane.xlu0 %851 }
 0x1b6   : > { %v855_v54 = vmul.f32 0.015625, %v852_v53 }
 0x1b7   : > { %v860_v55 = vpop.xlane.xlu1 %859 }
 0x1b8   : > { %v865_v56 = vmul.f32 %v855_v54, %v855_v54  ;;  %v863_v57 = vmul.f32 0.015625, %v860_v55  ;;  %v869_v8 = vsub.f32 %v3581_v23, %v855_v54 }
 0x1b9   : > { %v854_v58 = vpop.xlane.xlu0 %853 }
 0x1ba   : > { %v867_v59 = vsub.f32 %v863_v57, %v865_v56  ;;  %v856_v60 = vmul.f32 0.015625, %v854_v58 }
 0x1bb   : > { %v862_v61 = vpop.xlane.xlu1 %861 }
 0x1bc   : > { %v871_v62 = vadd.f32 1e-06, %v867_v59  ;;  %v866_v63 = vmul.f32 %v856_v60, %v856_v60  ;;  %v864_v0 = vmul.f32 0.015625, %v862_v61  ;;  %v870_v13 = vsub.f32 %v3583_v24, %v856_v60 }
 0x1be   : > { %3154 = vrsqrt.f32 %v871_v62  ;;  %v868_v1 = vsub.f32 %v864_v0, %v866_v63 }
 0x1c0   : > { %v872_v2 = vadd.f32 1e-06, %v868_v1 }
 0x1c2   : > { %3156 = vrsqrt.f32 %v872_v2 }
 0x1cb   : > { %v3155_v9 = vpop.eup %3154 }
 0x1cc   : > { %v875_v10 = vmul.f32 %v3155_v9, %v869_v8 }
 0x1ce   : > { %v882_v16 = vmul.f32 %v881_v11, %v875_v10 }
 0x1cf   : > { %v3157_v14 = vpop.eup %3156 }
 0x1d0   : > { %v876_v15 = vmul.f32 %v3157_v14, %v870_v13  ;;  %v888_v19 = vadd.f32 %v887_v17, %v882_v16 }
 0x1d2   : > { %v883_v18 = vmul.f32 %v881_v11, %v876_v15 }
 0x1d4   : > { %v889_v20 = vadd.f32 %v887_v17, %v883_v18 }
 0x1d6   : > { %v890_v21 = vpack.c.bf16 %v889_v20, %v888_v19 }
 0x1d8   : > { %1101 = vmatmul.mubr.bf16.vlgmr.msra.gmra.mxu0 %v890_v21  ;;  %2890 = vmatmul.mubr.bf16.vlgmr.msra.gmra.mxu1 %v890_v21 }
 0x1d9   : > { %2895 = vmatprep.mubr.msk.bf16.mxu0 %vm3312_vm1, %v3310_v30  ;;  %2901 = vmatprep.mubr.msk.bf16.mxu1 %vm3312_vm1, %v3310_v30 }
 0x298   : > { %v1102_v26 = vpop.f32.mrf.mxu0  ;;  %v1145_v27 = vpop.f32.mrf.mxu1 }
 0x299   : > { %v1103_v36 = vadd.f32 %v1102_v26, %v928_v28  ;;  %v1146_v37 = vadd.f32 %v1145_v27, %v936_v29 }
 0x29a   : > { %v1104_v31 = vpop.f32.mrf.mxu0  ;;  %v2891_v32 = vpop.f32.mrf.mxu1 }
 0x29b   : > { %v1105_v42 = vadd.f32 %v1104_v31, %v932_v33 }
 0x29c   : > { %v1106_v34 = vpop.f32.mrf.mxu0  ;;  %v1148_v35 = vpop.f32.mrf.mxu1 }
 0x29d   : > { %v1107_v38 = vadd.f32 %v1106_v34, %v928_v28  ;;  %v1149_v39 = vadd.f32 %v1148_v35, %v936_v29 }
 0x29e   : > { %v1108_v40 = vpop.f32.mrf.mxu0  ;;  %v2892_v41 = vpop.f32.mrf.mxu1 }
 0x29f   : > { %v3658_v43 = vpack.c.bf16 %v1107_v38, %v1103_v36  ;;  %v3660_v44 = vpack.c.bf16 %v1149_v39, %v1146_v37  ;;  %v1109_v45 = vadd.f32 %v1108_v40, %v932_v33 }
 0x2a1   : > { %v3662_v47 = vpack.c.bf16 %v1109_v45, %v1105_v42  ;;  %2900 = vmatpush3.bf16.msra.mxu1 %v3660_v44  ;;  %1282 = vrot.lane.b32.xlu1 %v3658_v43, %s3313_s14 }
 0x2a2   : > { %2911 = vmatprep.subr.bf16.mxu1 %v3310_v30 }
 0x2a3   : > { %1285 = vrot.lane.b32.xlu0 %v3662_v47, %s3313_s14  ;;  %v1168_v48 = vsel %vm1163_vm2, %v3662_v47, 0 }
 0x2a4   : > { %2894 = vmatpush3.bf16.xpose.msra.mxu0 %v1168_v48 }
 0x2a5   : > { %2905 = vmatprep.subr.bf16.mxu0 %v3310_v30 }
 0x2ab   : > { %2896 = vmatmul.mubr.msk.bf16.vlgmr.msra.gmra.mxu0 %vm1163_vm2, %v3658_v43 }
 0x2ac   : > { %2907 = vmatprep.mubr.msk.bf16.mxu0 %vm3312_vm1, %v3310_v30 }
 0x313   : > { %v1283_v51 = vpop.permute.xlu1 %1282 }
 0x315   : > { %v1286_v49 = vpop.permute.xlu0 %1285 }
 0x316   : > { %v1291_v50 = vsel %vm1163_vm2, %v1286_v49, 0 }
 0x317   : > { %2906 = vmatpush3.bf16.xpose.msra.mxu0 %v1291_v50 }
 0x318   : > { %2917 = vmatprep.subr.bf16.mxu0 %v3310_v30 }
 0x31e   : > { %2908 = vmatmul.mubr.msk.bf16.vlgmr.msra.gmra.mxu0 %vm1163_vm2, %v1283_v51  ;;  %v3110_v51 = vld [vmem:[%s3511_s20] sm:$0xff]  }
 0x31f   : > { %2919 = vmatprep.mubr.msk.bf16.mxu0 %vm3312_vm1, %v3310_v30 }
 0x36b   : > { %v1204_v52 = vpop.f32.mrf.mxu0 }
 0x36c   : > { %v1211_v53 = vmul.f32 0.25, %v1204_v52 }
 0x36d   : > { %v2897_v54 = vpop.f32.mrf.mxu0 }
 0x36e   : > { %v1213_v55 = vsel %vm1163_vm2, %v1211_v53, -inf }
 0x36f   : > { %1214 = vmax.xlane.f32.xlu1 %v1213_v55  ;;  %v1207_v56 = vpop.f32.mrf.mxu0 }
 0x370   : > { %v1212_v57 = vmul.f32 0.25, %v1207_v56 }
 0x371   : > { %v2898_v58 = vpop.f32.mrf.mxu0 }
 0x372   : > { %v1216_v59 = vsel %vm1163_vm2, %v1212_v57, -inf }
 0x373   : > { %1217 = vmax.xlane.f32.xlu0 %v1216_v59 }
 0x3de   : > { %v1327_v60 = vpop.f32.mrf.mxu0 }
 0x3df   : > { %v1334_v61 = vmul.f32 0.25, %v1327_v60 }
 0x3e0   : > { %v2909_v62 = vpop.f32.mrf.mxu0 }
 0x3e1   : > { %v1336_v63 = vsel %vm1163_vm2, %v1334_v61, -inf }
 0x3e2   : > { %1337 = vmax.xlane.f32.xlu0 %v1336_v63  ;;  %v1330_v0 = vpop.f32.mrf.mxu0 }
 0x3e3   : > { %v1335_v1 = vmul.f32 0.25, %v1330_v0 }
 0x3e4   : > { %v2910_v2 = vpop.f32.mrf.mxu0 }
 0x3e5   : > { %v1339_v3 = vsel %vm1163_vm2, %v1335_v1, -inf }
 0x3e6   : > { %1340 = vmax.xlane.f32.xlu1 %v1339_v3 }
 0x3f8   : > { %v1215_v8 = vpop.xlane.xlu1 %1214 }
 0x3f9   : > { %v1219_v9 = vsub.f32 %v1211_v53, %v1215_v8  ;;  %v3111_v53 = vld [vmem:[%s3511_s20 + $0x8] sm:$0xff]  }
 0x3fa   : > { %2918 = vmatpush3.bf16.msra.mxu0 %v3111_v53 }
 0x3fb   : > { %v1221_v10 = vmul.f32 1.442695, %v1219_v9  ;;  %2929 = vmatprep.subr.bf16.mxu0 %v3310_v30 }
 0x3fc   : > { %v1218_v11 = vpop.xlane.xlu0 %1217 }
 0x3fd   : > { %3158 = vpow2.f32 %v1221_v10  ;;  %v1220_v13 = vsub.f32 %v1212_v57, %v1218_v11 }
 0x3ff   : > { %v1223_v14 = vmul.f32 1.442695, %v1220_v13 }
 0x401   : > { %3160 = vpow2.f32 %v1223_v14 }
 0x40a   : > { %v3159_v15 = vpop.eup %3158 }
 0x40b   : > { %v1225_v16 = vsel %vm1163_vm2, %v3159_v15, 0.0 }
 0x40c   : > { %1226 = vadd.xlane.f32.xlu0 %v1225_v16 }
 0x40e   : > { %v3161_v17 = vpop.eup %3160 }
 0x40f   : > { %v1228_v18 = vsel %vm1163_vm2, %v3161_v17, 0.0 }
 0x410   : > { %1229 = vadd.xlane.f32.xlu1 %v1228_v18 }
 0x46b   : > { %v1338_v19 = vpop.xlane.xlu0 %1337 }
 0x46c   : > { %v1342_v20 = vsub.f32 %v1334_v61, %v1338_v19 }
 0x46e   : > { %v1344_v21 = vmul.f32 1.442695, %v1342_v20 }
 0x46f   : > { %v1341_v25 = vpop.xlane.xlu1 %1340 }
 0x470   : > { %3162 = vpow2.f32 %v1344_v21  ;;  %v1343_v26 = vsub.f32 %v1335_v1, %v1341_v25 }
 0x472   : > { %v1346_v27 = vmul.f32 1.442695, %v1343_v26 }
 0x474   : > { %3164 = vpow2.f32 %v1346_v27 }
 0x47d   : > { %v3163_v28 = vpop.eup %3162 }
 0x47e   : > { %v1348_v29 = vsel %vm1163_vm2, %v3163_v28, 0.0 }
 0x47f   : > { %1349 = vadd.xlane.f32.xlu0 %v1348_v29 }
 0x481   : > { %v3165_v31 = vpop.eup %3164 }
 0x482   : > { %v1351_v32 = vsel %vm1163_vm2, %v3165_v31, 0.0 }
 0x483   : > { %1352 = vadd.xlane.f32.xlu1 %v1351_v32 }
 0x494   : > { %1510 = vrot.lane.b32.xlu1 %v3662_v47, %s3314_s23 }
 0x495   : > { %1360 = vrot.lane.b32.xlu0 %v3660_v44, %s3313_s14  ;;  %v1227_v33 = vpop.xlane.xlu0 %1226 }
 0x496   : > { %3166 = vrcp.f32 %v1227_v33 }
 0x498   : > { %1508 = vrot.lane.b32.xlu1 %v3658_v43, %s3314_s23 }
 0x499   : > { %v1230_v34 = vpop.xlane.xlu1 %1229 }
 0x49a   : > { %3168 = vrcp.f32 %v1230_v34 }
 0x4a3   : > { %v3167_v35 = vpop.eup %3166 }
 0x4a4   : > { %v1233_v37 = vmul.f32 %v3167_v35, %v3159_v15 }
 0x4a7   : > { %v3169_v36 = vpop.eup %3168 }
 0x4a8   : > { %v1234_v38 = vmul.f32 %v3169_v36, %v3161_v17 }
 0x4aa   : > { %v1235_v39 = vpack.c.bf16 %v1234_v38, %v1233_v37 }
 0x4ac   : > { %2902 = vmatmul.mubr.msk.bf16.vlgmr.msra.gmra.mxu1 %vm1163_vm2, %v1235_v39 }
 0x4ad   : > { %2913 = vmatprep.mubr.msk.bf16.mxu1 %vm3312_vm1, %v3310_v30 }
 0x508   : > { %v1350_v40 = vpop.xlane.xlu0 %1349 }
 0x509   : > { %3170 = vrcp.f32 %v1350_v40 }
 0x50c   : > { %v1361_v41 = vpop.permute.xlu0 %1360  ;;  %v1353_v42 = vpop.xlane.xlu1 %1352 }
 0x50d   : > { %3172 = vrcp.f32 %v1353_v42  ;;  %2912 = vmatpush3.bf16.msra.mxu1 %v1361_v41 }
 0x50e   : > { %2923 = vmatprep.subr.bf16.mxu1 %v3310_v30 }
 0x510   : > { %v1511_v61 = vpop.permute.xlu1 %1510 }
 0x511   : > { %v1516_v1 = vsel %vm1163_vm2, %v1511_v61, 0 }
 0x514   : > { %v1509_v2 = vpop.permute.xlu1 %1508 }
 0x516   : > { %v3171_v45 = vpop.eup %3170 }
 0x517   : > { %v1356_v49 = vmul.f32 %v3171_v45, %v3163_v28 }
 0x51a   : > { %v3173_v48 = vpop.eup %3172 }
 0x51b   : > { %v1357_v50 = vmul.f32 %v3173_v48, %v3165_v31 }
 0x51d   : > { %v1358_v52 = vpack.c.bf16 %v1357_v50, %v1356_v49 }
 0x51f   : > { %2914 = vmatmul.mubr.msk.bf16.vlgmr.msra.gmra.mxu1 %vm1163_vm2, %v1358_v52 }
 0x520   : > { %2924 = vmatpush3.bf16.msra.mxu1 %v3110_v51  ;;  %2925 = vmatprep.mubr.msk.bf16.mxu1 %vm3312_vm1, %v3310_v30  ;;  %v3112_v51 = vld [vmem:[%s3511_s20 + $0x10] sm:$0xff]  }
 0x521   : > { %2935 = vmatprep.subr.bf16.mxu1 %v3310_v30 }
 0x56c   : > { %v1273_v54 = vpop.f32.mrf.mxu1 }
 0x56e   : > { %v2903_v55 = vpop.f32.mrf.mxu1 }
 0x570   : > { %v1276_v56 = vpop.f32.mrf.mxu1 }
 0x571   : > { %v1280_v57 = vpack.c.bf16 %v1276_v56, %v1273_v54 }
 0x572   : > { %v2904_v58 = vpop.f32.mrf.mxu1 }
 0x573   : > { %2926 = vmatmul.mubr.msk.bf16.vlgmr.msra.gmra.mxu1 %vm1163_vm2, %v1280_v57 }
 0x574   : > { %2937 = vmatprep.mubr.msk.bf16.mxu1 %vm3312_vm1, %v3310_v30 }
 0x5df   : > { %v1400_v59 = vpop.f32.mrf.mxu1 }
 0x5e1   : > { %v2915_v60 = vpop.f32.mrf.mxu1 }
 0x5e3   : > { %v1403_v62 = vpop.f32.mrf.mxu1 }
 0x5e4   : > { %v1407_v63 = vpack.c.bf16 %v1403_v62, %v1400_v59 }
 0x5e5   : > { %v2916_v0 = vpop.f32.mrf.mxu1 }
 0x5e6   : > { %2920 = vmatmul.mubr.msk.bf16.vlgmr.msra.gmra.mxu0 %vm1163_vm2, %v1407_v63 }
 0x5e7   : > { %2930 = vmatpush3.bf16.xpose.msra.mxu0 %v1516_v1  ;;  %2931 = vmatprep.mubr.msk.bf16.mxu0 %vm3312_vm1, %v3310_v30 }
 0x5e8   : > { %2941 = vmatprep.subr.bf16.mxu0 %v3310_v30 }
 0x5ee   : > { %2932 = vmatmul.mubr.msk.bf16.vlgmr.msra.gmra.mxu0 %vm1163_vm2, %v1509_v2 }
 0x5ef   : > { %2943 = vmatprep.mubr.msk.bf16.mxu0 %vm3312_vm1, %v3310_v30  ;;  %2942 = vmatpush3.bf16.msra.mxu0 %v3112_v51 }
 0x5f0   : > { %2953 = vmatprep.subr.bf16.mxu0 %v3310_v30 }
 0x633   : > { %v3718_v3 = vpop.f32.mrf.mxu1 }
 0x635   : > { %v2927_v8 = vpop.f32.mrf.mxu1 }
 0x637   : > { %v3720_v9 = vpop.f32.mrf.mxu1 }
 0x639   : > { %v2928_v10 = vpop.f32.mrf.mxu1 }
 0x6a6   : > { %v3722_v11 = vpop.f32.mrf.mxu0 }
 0x6a8   : > { %v2921_v13 = vpop.f32.mrf.mxu0 }
 0x6aa   : > { %v3724_v14 = vpop.f32.mrf.mxu0 }
 0x6ac   : > { %v2922_v15 = vpop.f32.mrf.mxu0 }
 0x6ae   : > { %v1552_v16 = vpop.f32.mrf.mxu0 }
 0x6af   : > { %v1559_v17 = vmul.f32 0.25, %v1552_v16 }
 0x6b0   : > { %v2933_v18 = vpop.f32.mrf.mxu0 }
 0x6b1   : > { %v1561_v19 = vsel %vm1163_vm2, %v1559_v17, -inf }
 0x6b2   : > { %1562 = vmax.xlane.f32.xlu1 %v1561_v19  ;;  %v1555_v20 = vpop.f32.mrf.mxu0  ;;  %v1502_v19 = vadd.f32 %v3718_v3, %v3722_v11 }
 0x6b3   : > { %v1560_v21 = vmul.f32 0.25, %v1555_v20 }
 0x6b4   : > { %v2934_v25 = vpop.f32.mrf.mxu0 }
 0x6b5   : > { %v1564_v26 = vsel %vm1163_vm2, %v1560_v21, -inf }
 0x6b6   : > { %1565 = vmax.xlane.f32.xlu0 %v1564_v26  ;;  %v1505_v26 = vadd.f32 %v3720_v9, %v3724_v14  ;;  %v3113_v9 = vld [vmem:[%s3511_s20 + $0x18] sm:$0xff]  }
 0x6c3   : > { %1584 = vrot.lane.b32.xlu1 %v3660_v44, %s3314_s23 }
 0x6c7   : > { %1684 = vrot.lane.b32.xlu1 %v3658_v43, %s3315_s0 }
 0x73b   : > { %v1563_v27 = vpop.xlane.xlu1 %1562 }
 0x73c   : > { %v1567_v28 = vsub.f32 %v1559_v17, %v1563_v27 }
 0x73e   : > { %v1569_v29 = vmul.f32 1.442695, %v1567_v28 }
 0x73f   : > { %v1585_v31 = vpop.permute.xlu1 %1584  ;;  %v1566_v32 = vpop.xlane.xlu0 %1565 }
 0x740   : > { %3174 = vpow2.f32 %v1569_v29  ;;  %v1568_v33 = vsub.f32 %v1560_v21, %v1566_v32  ;;  %2936 = vmatpush3.bf16.msra.mxu1 %v1585_v31 }
 0x741   : > { %2947 = vmatprep.subr.bf16.mxu1 %v3310_v30 }
 0x742   : > { %v1571_v34 = vmul.f32 1.442695, %v1568_v33 }
 0x744   : > { %3176 = vpow2.f32 %v1571_v34 }
 0x74d   : > { %v3175_v35 = vpop.eup %3174 }
 0x74e   : > { %v1573_v36 = vsel %vm1163_vm2, %v3175_v35, 0.0 }
 0x74f   : > { %1574 = vadd.xlane.f32.xlu0 %v1573_v36 }
 0x751   : > { %v3177_v37 = vpop.eup %3176 }
 0x752   : > { %v1576_v38 = vsel %vm1163_vm2, %v3177_v37, 0.0 }
 0x753   : > { %1577 = vadd.xlane.f32.xlu0 %v1576_v38 }
 0x769   : > { %1686 = vrot.lane.b32.xlu0 %v3662_v47, %s3315_s0  ;;  %v1685_v47 = vpop.permute.xlu1 %1684 }
 0x7d8   : > { %v1575_v43 = vpop.xlane.xlu0 %1574 }
 0x7d9   : > { %3178 = vrcp.f32 %v1575_v43 }
 0x7dc   : > { %v1578_v39 = vpop.xlane.xlu0 %1577 }
 0x7dd   : > { %3180 = vrcp.f32 %v1578_v39 }
 0x7e0   : > { %v1687_v48 = vpop.permute.xlu0 %1686 }
 0x7e1   : > { %v1692_v50 = vsel %vm1163_vm2, %v1687_v48, 0 }
 0x7e6   : > { %v3179_v40 = vpop.eup %3178 }
 0x7e7   : > { %v1581_v42 = vmul.f32 %v3179_v40, %v3175_v35  ;;  %v2726_v40 = vld [vmem:[%s3995_s27] ss:$0 sm:$0xff]  ;;  %s3998_s27 = sld [smem:[#allocation18_spill]] (!%p2760_p1) }
 0x7ea   : > { %v3181_v41 = vpop.eup %3180 }
 0x7eb   : > { %v1582_v45 = vmul.f32 %v3181_v41, %v3177_v37 }
 0x7ed   : > { %v1583_v49 = vpack.c.bf16 %v1582_v45, %v1581_v42 }
 0x7ef   : > { %2938 = vmatmul.mubr.msk.bf16.vlgmr.msra.gmra.mxu1 %vm1163_vm2, %v1583_v49 }
 0x7f0   : > { %2948 = vmatpush3.bf16.xpose.msra.mxu1 %v1692_v50  ;;  %2949 = vmatprep.mubr.msk.bf16.mxu1 %vm3312_vm1, %v3310_v30 }
 0x7f1   : > { %2959 = vmatprep.subr.bf16.mxu1 %v3310_v30 }
 0x7f7   : > { %2950 = vmatmul.mubr.msk.bf16.vlgmr.msra.gmra.mxu1 %vm1163_vm2, %v1685_v47 }
 0x7f8   : > { %2961 = vmatprep.mubr.msk.bf16.mxu1 %vm3312_vm1, %v3310_v30  ;;  %2960 = vmatpush3.bf16.msra.mxu1 %v3113_v9 }
 0x8af   : > { %v1624_v52 = vpop.f32.mrf.mxu1 }
 0x8b1   : > { %v2939_v53 = vpop.f32.mrf.mxu1 }
 0x8b3   : > { %v1627_v54 = vpop.f32.mrf.mxu1 }
 0x8b4   : > { %v1631_v55 = vpack.c.bf16 %v1627_v54, %v1624_v52 }
 0x8b5   : > { %v2940_v56 = vpop.f32.mrf.mxu1 }
 0x8b6   : > { %2944 = vmatmul.mubr.msk.bf16.vlgmr.msra.gmra.mxu0 %vm1163_vm2, %v1631_v55  ;;  %v3116_v55 = vld [vmem:[%s3527_s1 + $0x74] ss:$8 sps:$4 sm:$0xff]   ;;  %v3114_v56 = vld [vmem:[%s3527_s1 + $0x70] ss:$8 sps:$4 sm:$0xff]  }
 0x8b7   : > { %v1728_v57 = vpop.f32.mrf.mxu1  ;;  %2955 = vmatprep.mubr.msk.bf16.mxu0 %vm3312_vm1, %v3310_v30 }
 0x8b8   : > { %v1735_v58 = vmul.f32 0.25, %v1728_v57  ;;  %v3119_v57 = vld [vmem:[%s3527_s1 + $0x64] ss:$8 sps:$4 sm:$0xff]  }
 0x8b9   : > { %v2951_v59 = vpop.f32.mrf.mxu1 }
 0x8ba   : > { %v1737_v60 = vsel %vm1163_vm2, %v1735_v58, -inf  ;;  %v3120_v59 = vld [vmem:[%s3527_s1 + $0x50] ss:$8 sps:$4 sm:$0xff]  }
 0x8bb   : > { %1738 = vmax.xlane.f32.xlu1 %v1737_v60  ;;  %v1731_v61 = vpop.f32.mrf.mxu1  ;;  %v3123_v60 = vld [vmem:[%s3527_s1 + $0x40] ss:$8 sps:$4 sm:$0xff]  }
 0x8bc   : > { %v1736_v62 = vmul.f32 0.25, %v1731_v61  ;;  %v3125_v61 = vld [vmem:[%s3527_s1 + $0x44] ss:$8 sps:$4 sm:$0xff]  }
 0x8bd   : > { %v2952_v63 = vpop.f32.mrf.mxu1 }
 0x8be   : > { %v1740_v0 = vsel %vm1163_vm2, %v1736_v62, -inf  ;;  %v3126_v63 = vld [vmem:[%s3527_s1 + $0x30] ss:$8 sps:$4 sm:$0xff]  }
 0x8bf   : > { %1741 = vmax.xlane.f32.xlu0 %v1740_v0  ;;  %v3131_v0 = vld [vmem:[%s3527_s1 + $0x24] ss:$8 sps:$4 sm:$0xff]  }
 0x944   : > { %v1739_v1 = vpop.xlane.xlu1 %1738 }
 0x945   : > { %v1743_v2 = vsub.f32 %v1735_v58, %v1739_v1  ;;  %v3117_v58 = vld [vmem:[%s3527_s1 + $0x60] ss:$8 sps:$4 sm:$0xff]  }
 0x946   : > { %v3129_v1 = vld [vmem:[%s3527_s1 + $0x20] ss:$8 sps:$4 sm:$0xff]  }
 0x947   : > { %v1745_v8 = vmul.f32 1.442695, %v1743_v2  ;;  %v3134_v2 = vld [vmem:[%s3527_s1 + $0x14] ss:$8 sps:$4 sm:$0xff]  }
 0x948   : > { %v1742_v10 = vpop.xlane.xlu0 %1741 }
 0x949   : > { %3182 = vpow2.f32 %v1745_v8  ;;  %v1744_v13 = vsub.f32 %v1736_v62, %v1742_v10  ;;  %v3128_v62 = vld [vmem:[%s3527_s1 + $0x34] ss:$8 sps:$4 sm:$0xff]   ;;  %v3132_v8 = vld [vmem:[%s3527_s1 + $0x10] ss:$8 sps:$4 sm:$0xff]   ;;  %v3137_v10 = vld [vmem:[%s3527_s1 + $0x4] ss:$8 sps:$4 sm:$0xff]  }
 0x94b   : > { %v1747_v15 = vmul.f32 1.442695, %v1744_v13  ;;  %v3135_v13 = vld [vmem:[%s3527_s1] ss:$8 sps:$4 sm:$0xff]  }
 0x94d   : > { %3184 = vpow2.f32 %v1747_v15 }
 0x956   : > { %v3183_v30 = vpop.eup %3182 }
 0x957   : > { %v1749_v16 = vsel %vm1163_vm2, %v3183_v30, 0.0 }
 0x958   : > { %1750 = vadd.xlane.f32.xlu0 %v1749_v16 }
 0x95a   : > { %v3185_v17 = vpop.eup %3184 }
 0x95b   : > { %v1752_v18 = vsel %vm1163_vm2, %v3185_v17, 0.0 }
 0x95c   : > { %1753 = vadd.xlane.f32.xlu1 %v1752_v18 }
 0x96e   : > { %1760 = vrot.lane.b32.xlu0 %v3660_v44, %s3315_s0 }
 0x976   : > { %v1675_v20 = vpop.f32.mrf.mxu0 }
 0x977   : > { %v1682_v21 = vadd.f32 %v1675_v20, %v1502_v19 }
 0x978   : > { %v2945_v25 = vpop.f32.mrf.mxu0 }
 0x97a   : > { %v1678_v27 = vpop.f32.mrf.mxu0 }
 0x97b   : > { %v1683_v28 = vadd.f32 %v1678_v27, %v1505_v26 }
 0x97c   : > { %v2946_v29 = vpop.f32.mrf.mxu0 }
 0x9e1   : > { %v1751_v31 = vpop.xlane.xlu0 %1750 }
 0x9e2   : > { %3186 = vrcp.f32 %v1751_v31 }
 0x9e5   : > { %v1754_v32 = vpop.xlane.xlu1 %1753  ;;  %v1761_v33 = vpop.permute.xlu0 %1760 }
 0x9e6   : > { %3188 = vrcp.f32 %v1754_v32  ;;  %2954 = vmatpush3.bf16.msra.mxu0 %v1761_v33  ;;  %v1905_v32 = vsub.s32 4, %v3628_v4 }
 0x9e7   : > { %2024 = vmatprep.subr.bf16.mxu0 %v3116_v55  ;;  %v3151_v55 = vld [vmem:[%s3537_s21 + $0x8] sm:$0xff]  }
 0x9ef   : > { %v3187_v44 = vpop.eup %3186 }
 0x9f0   : > { %v1757_v3 = vmul.f32 %v3187_v44, %v3183_v30 }
 0x9f3   : > { %v3189_v34 = vpop.eup %3188 }
 0x9f4   : > { %v1758_v11 = vmul.f32 %v3189_v34, %v3185_v17 }
 0x9f6   : > { %v1759_v35 = vpack.c.bf16 %v1758_v11, %v1757_v3  ;;  %v1906_v3 = vrot.slane %v3634_v6, %v1905_v32  ;;  %v1911_v11 = vsub.s32 3, %v3628_v4  ;;  %v3138_v6 = vld [vmem:[%s3537_s21 + $0x78] sm:$0xff]  }
 0x9f7   : > { %2822 = vmatprep.subr.bf16.mxu1 %v3138_v6 }
 0x9f8   : > { %2956 = vmatmul.mubr.msk.bf16.vlgmr.msra.gmra.mxu0 %vm1163_vm2, %v1759_v35 }
 0x9f9   : > { %2056 = vmatprep.mubr.bf16.mxu0 %v3311_v46  ;;  %v1872_v46 = vrot.slane %v3631_v5, %v935_v22  ;;  %2025 = vmatpush1.bf16.msra.mxu0 %v3114_v56  ;;  %v3152_v56 = vld [vmem:[%s3537_s21 + $0x40] sm:$0xff]  }
 0x9fa   : > { %2026 = vmatprep.subr.bf16.mxu0 %v3119_v57  ;;  %v3153_v57 = vld [vmem:[%s3537_s21] sm:$0xff]  }
 0x9fd   : > { %2027 = vmatpush1.bf16.msra.mxu0 %v3117_v58  ;;  %v1932_v58 = vld [vmem:[%s3532_s5] sm:$0x3] }
 0xab8   : > { %v1800_v14 = vpop.f32.mrf.mxu0 }
 0xaba   : > { %v2957_v36 = vpop.f32.mrf.mxu0 }
 0xabc   : > { %v1803_v37 = vpop.f32.mrf.mxu0 }
 0xabd   : > { %v1807_v38 = vpack.c.bf16 %v1803_v37, %v1800_v14  ;;  %v1912_v37 = vrot.slane %v3631_v5, %v1911_v11 }
 0xabe   : > { %v2958_v43 = vpop.f32.mrf.mxu0 }
 0xabf   : > { %2962 = vmatmul.mubr.msk.bf16.vlgmr.msra.gmra.mxu1 %vm1163_vm2, %v1807_v38 }
 0xb7f   : > { %v1851_v39 = vpop.f32.mrf.mxu1 }
 0xb80   : > { %v1858_v41 = vadd.f32 %v1851_v39, %v1682_v21 }
 0xb81   : > { %v2963_v42 = vpop.f32.mrf.mxu1 }
 0xb82   : > { %v1867_v45 = vadd.f32 %v2726_v40, %v1858_v41  ;;  %v3139_v41 = vld [vmem:[%s3537_s21 + $0x38] sm:$0xff]   ;;  %v3141_v42 = vld [vmem:[%s3537_s21 + $0x30] sm:$0xff]  }
 0xb83   : > { %v1854_v48 = vpop.f32.mrf.mxu1  ;;  %2823 = vmatpush3.bf16.msra.mxu1 %v3139_v41 }
 0xb84   : > { %v1873_v49 = vmul.f32 %v1872_v46, %v1867_v45  ;;  %v1859_v50 = vadd.f32 %v1854_v48, %v1683_v28  ;;  %v3142_v45 = vld [vmem:[%s3537_s21 + $0x68] sm:$0xff]  }
 0xb85   : > { %v2964_v47 = vpop.f32.mrf.mxu1  ;;  %v3143_v48 = vld [vmem:[%s3537_s21 + $0x28] sm:$0xff]  }
 0xb86   : > { %v3773_v51 = vadd.f32 %v1873_v49, %v3581_v23  ;;  %v1868_v52 = vadd.f32 %v2726_v40, %v1859_v50  ;;  %v3144_v49 = vld [vmem:[%s3537_s21 + $0x60] sm:$0xff]   ;;  %v3146_v47 = vld [vmem:[%s3537_s21 + $0x58] sm:$0xff]  }
 0xb87   : > { %v3145_v50 = vld [vmem:[%s3537_s21 + $0x20] sm:$0xff]  }
 0xb88   : > { %1877 = vadd.xlane.f32.xlu1 %v3773_v51  ;;  %v1874_v53 = vmul.f32 %v1872_v46, %v1868_v52  ;;  %v1883_v22 = vmul.f32 %v3773_v51, %v3773_v51  ;;  %v3140_v46 = vld [vmem:[%s3537_s21 + $0x70] sm:$0xff]   ;;  %v3147_v52 = vld [vmem:[%s3537_s21 + $0x18] sm:$0xff]  }
 0xb89   : > { %2824 = vmatprep.subr.bf16.mxu1 %v3140_v46 }
 0xb8a   : > { %v3779_v54 = vadd.f32 %v1874_v53, %v3583_v24  ;;  %v3122_v24 = vld [vmem:[%s3527_s1 + $0x54] ss:$8 sps:$4 sm:$0xff]   ;;  %2825 = vmatpush3.bf16.msra.mxu1 %v3141_v42 }
 0xb8b   : > { %2028 = vmatprep.subr.bf16.mxu0 %v3122_v24  ;;  %2826 = vmatprep.subr.bf16.mxu1 %v3142_v45  ;;  %v3148_v53 = vld [vmem:[%s3537_s21 + $0x50] sm:$0xff]   ;;  %v1937_v24 = vrot.slane %v1932_v58, %v3643_v12 }
 0xb8c   : > { %1885 = vadd.xlane.f32.xlu1 %v1883_v22  ;;  %v1884_v23 = vmul.f32 %v3779_v54, %v3779_v54  ;;  %2029 = vmatpush1.bf16.msra.mxu0 %v3120_v59  ;;  %v3149_v22 = vld [vmem:[%s3537_s21 + $0x10] sm:$0xff]   ;;  %v1941_v59 = vrot.slane %v1932_v58, %v3637_v7 }
 0xb8d   : > { %2030 = vmatprep.subr.bf16.mxu0 %v3125_v61 }
 0xb8e   : > { %2827 = vmatpush3.bf16.msra.mxu1 %v3143_v48 }
 0xb8f   : > { %2828 = vmatprep.subr.bf16.mxu1 %v3144_v49 }
 0xb90   : > { %1879 = vadd.xlane.f32.xlu1 %v3779_v54  ;;  %2031 = vmatpush1.bf16.msra.mxu0 %v3123_v60 }
 0xb91   : > { %2032 = vmatprep.subr.bf16.mxu0 %v3128_v62 }
 0xb92   : > { %2829 = vmatpush3.bf16.msra.mxu1 %v3145_v50  ;;  %v2283_v50 = vsub.s32 5, %v3628_v4 }
 0xb93   : > { %2830 = vmatprep.subr.bf16.mxu1 %v3146_v47 }
 0xb94   : > { %1887 = vadd.xlane.f32.xlu1 %v1884_v23  ;;  %2033 = vmatpush1.bf16.msra.mxu0 %v3126_v63  ;;  %v3150_v23 = vld [vmem:[%s3537_s21 + $0x48] sm:$0xff]   ;;  %s3996_s21 = sld [smem:[#allocation26_spill]] (!%p2760_p1) }
 0xb95   : > { %2034 = vmatprep.subr.bf16.mxu0 %v3131_v0 }
 0xb96   : > { %2831 = vmatpush3.bf16.msra.mxu1 %v3147_v52  ;;  %v2743_v52 = vld [vmem:[%s721_s25] ss:$0 sm:$0xff] }
 0xb97   : > { %2832 = vmatprep.subr.bf16.mxu1 %v3148_v53 }
 0xb98   : > { %2035 = vmatpush1.bf16.msra.mxu0 %v3129_v1 }
 0xb99   : > { %2036 = vmatprep.subr.bf16.mxu0 %v3134_v2 }
 0xb9a   : > { %2833 = vmatpush3.bf16.msra.mxu1 %v3149_v22  ;;  %s3997_s2 = smov (!%p2760_p1), %s3996_s21 }
 0xb9b   : > { %2834 = vmatprep.subr.bf16.mxu1 %v3150_v23  ;;  %v2284_v23 = vrot.slane %v3631_v5, %v2283_v50 }
 0xb9c   : > { %2037 = vmatpush1.bf16.msra.mxu0 %v3132_v8 }
 0xb9d   : > { %2038 = vmatprep.subr.bf16.mxu0 %v3137_v10 }
 0xb9e   : > { %2835 = vmatpush3.bf16.msra.mxu1 %v3151_v55 }
 0xb9f   : > { %2836 = vmatprep.subr.bf16.mxu1 %v3152_v56 }
 0xba0   : > { %2039 = vmatpush1.bf16.msra.mxu0 %v3135_v13 }
 0xba2   : > { %2837 = vmatpush3.bf16.msra.mxu1 %v3153_v57 }
 0xc11   : > { %v1878_v15 = vpop.xlane.xlu1 %1877 }
 0xc12   : > { %v1881_v30 = vmul.f32 0.015625, %v1878_v15 }
 0xc14   : > { %v1891_v17 = vmul.f32 %v1881_v30, %v1881_v30  ;;  %v1895_v44 = vsub.f32 %v3773_v51, %v1881_v30 }
 0xc15   : > { %v1886_v16 = vpop.xlane.xlu1 %1885 }
 0xc16   : > { %v1889_v18 = vmul.f32 0.015625, %v1886_v16 }
 0xc18   : > { %v1893_v19 = vsub.f32 %v1889_v18, %v1891_v17 }
 0xc19   : > { %v1880_v20 = vpop.xlane.xlu1 %1879 }
 0xc1a   : > { %v1897_v21 = vadd.f32 1e-06, %v1893_v19  ;;  %v1882_v25 = vmul.f32 0.015625, %v1880_v20 }
 0xc1c   : > { %3190 = vrsqrt.f32 %v1897_v21  ;;  %v1892_v27 = vmul.f32 %v1882_v25, %v1882_v25  ;;  %v1896_v35 = vsub.f32 %v3779_v54, %v1882_v25 }
 0xc1d   : > { %v1888_v26 = vpop.xlane.xlu1 %1887 }
 0xc1e   : > { %v1890_v28 = vmul.f32 0.015625, %v1888_v26 }
 0xc20   : > { %v1894_v29 = vsub.f32 %v1890_v28, %v1892_v27 }
 0xc22   : > { %v1898_v31 = vadd.f32 1e-06, %v1894_v29 }
 0xc24   : > { %3192 = vrsqrt.f32 %v1898_v31 }
 0xc29   : > { %v3191_v33 = vpop.eup %3190 }
 0xc2a   : > { %v1901_v34 = vmul.f32 %v3191_v33, %v1895_v44 }
 0xc2c   : > { %v1907_v36 = vmul.f32 %v1906_v3, %v1901_v34 }
 0xc2e   : > { %v1913_v43 = vadd.f32 %v1912_v37, %v1907_v36 }
 0xc31   : > { %v3193_v9 = vpop.eup %3192 }
 0xc32   : > { %v1902_v14 = vmul.f32 %v3193_v9, %v1896_v35 }
 0xc34   : > { %v1908_v38 = vmul.f32 %v1906_v3, %v1902_v14 }
 0xc36   : > { %v1914_v39 = vadd.f32 %v1912_v37, %v1908_v38 }
 0xc38   : > { %v1915_v40 = vpack.c.bf16 %v1914_v39, %v1913_v43 }
 0xc3a   : > { %2057 = vmatmul.mubr.bf16.vlgmr.msra.gmra.mxu0 %v1915_v40 }
 0xcfa   : > { %v2058_v60 = vpop.f32.mrf.mxu0 }
 0xcfb   : > { %v2059_v61 = vadd.f32 %v2058_v60, %v1937_v24 }
 0xcfc   : > { %v2060_v62 = vpop.f32.mrf.mxu0 }
 0xcfd   : > { %v2071_v63 = vmul.f32 0.044715, %v2059_v61  ;;  %v2061_v0 = vadd.f32 %v2060_v62, %v1941_v59  ;;  %v2067_v6 = vmul.f32 0.5, %v2059_v61 }
 0xcfe   : > { %v2062_v1 = vpop.f32.mrf.mxu0 }
 0xcff   : > { %v2075_v2 = vmul.f32 %v2071_v63, %v2059_v61  ;;  %v2072_v8 = vmul.f32 0.044715, %v2061_v0  ;;  %v2063_v10 = vadd.f32 %v2062_v1, %v1937_v24  ;;  %v2068_v43 = vmul.f32 0.5, %v2061_v0 }
 0xd00   : > { %v2064_v13 = vpop.f32.mrf.mxu0 }
 0xd01   : > { %v2079_v15 = vmul.f32 %v2075_v2, %v2059_v61  ;;  %v2076_v30 = vmul.f32 %v2072_v8, %v2061_v0  ;;  %v2073_v16 = vmul.f32 0.044715, %v2063_v10  ;;  %v2065_v17 = vadd.f32 %v2064_v13, %v1941_v59 }
 0xd02   : > { %v2069_v37 = vmul.f32 0.5, %v2063_v10 }
 0xd03   : > { %v2083_v18 = vadd.f32 %v2079_v15, %v2059_v61  ;;  %v2080_v19 = vmul.f32 %v2076_v30, %v2061_v0  ;;  %v2077_v20 = vmul.f32 %v2073_v16, %v2063_v10  ;;  %v2074_v21 = vmul.f32 0.044715, %v2065_v17 }
 0xd04   : > { %v2070_v39 = vmul.f32 0.5, %v2065_v17 }
 0xd05   : > { %v2081_v25 = vmul.f32 %v2077_v20, %v2063_v10  ;;  %v2078_v26 = vmul.f32 %v2074_v21, %v2065_v17  ;;  %v2084_v27 = vadd.f32 %v2080_v19, %v2061_v0  ;;  %v2087_v28 = vmul.f32 0.7978846, %v2083_v18 }
 0xd07   : > { %v2085_v29 = vadd.f32 %v2081_v25, %v2063_v10  ;;  %v2082_v31 = vmul.f32 %v2078_v26, %v2065_v17  ;;  %v2088_v32 = vmul.f32 0.7978846, %v2084_v27 }
 0xd09   : > { %v2089_v33 = vmul.f32 0.7978846, %v2085_v29  ;;  %v2086_v44 = vadd.f32 %v2082_v31, %v2065_v17  ;;  %3194 = vtanh.f32 %v2088_v32 }
 0xd0a   : > { %3196 = vtanh.f32 %v2087_v28 }
 0xd0b   : > { %3198 = vtanh.f32 %v2089_v33  ;;  %v2090_v34 = vmul.f32 0.7978846, %v2086_v44 }
 0xd0d   : > { %3200 = vtanh.f32 %v2090_v34 }
 0xd16   : > { %v3195_v3 = vpop.eup %3194 }
 0xd17   : > { %v3197_v11 = vpop.eup %3196  ;;  %v2096_v9 = vadd.f32 1.0, %v3195_v3 }
 0xd18   : > { %v3199_v35 = vpop.eup %3198  ;;  %v2095_v38 = vadd.f32 1.0, %v3197_v11 }
 0xd19   : > { %v2097_v14 = vadd.f32 1.0, %v3199_v35  ;;  %v2100_v46 = vmul.f32 %v2096_v9, %v2068_v43 }
 0xd1a   : > { %v3201_v36 = vpop.eup %3200  ;;  %v2099_v45 = vmul.f32 %v2095_v38, %v2067_v6 }
 0xd1b   : > { %v2098_v40 = vadd.f32 1.0, %v3201_v36  ;;  %v2101_v41 = vmul.f32 %v2097_v14, %v2069_v37 }
 0xd1d   : > { %v2102_v42 = vmul.f32 %v2098_v40, %v2070_v39  ;;  %v2103_v49 = vpack.c.bf16 %v2101_v41, %v2099_v45 }
 0xd1f   : > { %v2104_v48 = vpack.c.bf16 %v2102_v42, %v2100_v46 }
 0xd21   : > { %2272 = vmatprep.mubr.bf16.mxu1 %v2104_v48 }
 0xd22   : > { %2273 = vmatmul.mubr.bf16.vlgmr.msra.gmra.mxu1 %v2103_v49 }
 0xde2   : > { %v2838_v47 = vpop.f32.mrf.mxu1 }
 0xde4   : > { %v2839_v53 = vpop.f32.mrf.mxu1 }
 0xde5   : > { %v2840_v22 = vadd.f32 %v2839_v53, %v2838_v47 }
 0xde6   : > { %v2841_v55 = vpop.f32.mrf.mxu1 }
 0xde7   : > { %v2275_v56 = vadd.f32 %v2840_v22, %v2743_v52 }
 0xde8   : > { %v2842_v57 = vpop.f32.mrf.mxu1 }
 0xde9   : > { %v2285_v58 = vmul.f32 %v2284_v23, %v2275_v56  ;;  %v2843_v24 = vadd.f32 %v2842_v57, %v2841_v55 }
 0xdeb   : > { %v2287_v59 = vadd.f32 %v2285_v58, %v3773_v51  ;;  %v2278_v60 = vadd.f32 %v2843_v24, %v2743_v52 }
 0xded   : > { %2289 = vst [vmem:[#allocation2] sm:$0xff] %v2287_v59  ;;  %v2286_v4 = vmul.f32 %v2284_v23, %v2278_v60  ;;  %2294 = sbr.rel (%p2760_p1) target bundleno = 3942 (0xf66), region = 92 }
 0xdef   : > { %v2288_v61 = vadd.f32 %v2286_v4, %v3779_v54 }
 0xdf1   : > { %2290 = vst [vmem:[#allocation2 + $0x8] sm:$0xff] %v2288_v61 }
 0xdf2   : > { %2296 = vadd.xlane.f32.xlu0 %v2287_v59  ;;  %v2302_v62 = vmul.f32 %v2287_v59, %v2287_v59  ;;  %v2303_v5 = vmul.f32 %v2288_v61, %v2288_v61  ;;  %v3202_v63 = vld [vmem:[%s3996_s21 + $0x38] sm:$0xff]   ;;  %v3316_v51 = vmov 0.0   ;;  %v3203_v54 = vld [vmem:[%s3997_s2 + $0x30] sm:$0xff]   ;;  %v3204_v0 = vld [vmem:[%s3997_s2 + $0x28] sm:$0xff]   ;;  %vm3317_vm3 = vmmov 0  }
 0xdf3   : > { %2965 = vmatprep.subr.bf16.mxu0 %v3316_v51  ;;  %v3205_v1 = vld [vmem:[%s3997_s2 + $0x20] sm:$0xff]   ;;  %2981 = vmatprep.mubr.msk.bf16.mxu0 %vm3317_vm3, %v3316_v51  ;;  %v3206_v2 = vld [vmem:[%s3997_s2 + $0x18] sm:$0xff]   ;;  %v3207_v8 = vld [vmem:[%s3997_s2 + $0x10] sm:$0xff]  }
 0xdf4   : > { %2304 = vadd.xlane.f32.xlu1 %v2302_v62  ;;  %2966 = vmatpush3.bf16.msra.mxu0 %v3202_v63  ;;  %v3208_v10 = vld [vmem:[%s3997_s2 + $0x8] sm:$0xff]   ;;  %v3209_v13 = vld [vmem:[%s3997_s2] sm:$0xff]  }
 0xdf5   : > { %2967 = vmatprep.subr.bf16.mxu0 %v3316_v51  ;;  %v2295_v32 = vld [vmem:[%s3998_s27] sm:$0x3] }
 0xdf6   : > { %2298 = vadd.xlane.f32.xlu0 %v2288_v61  ;;  %v2322_v33 = vadd.f32 1.0, %v2295_v32  ;;  %v2332_v37 = vrot.slane %v2295_v32, %v3637_v7  ;;  %v2761_v6 = vld [vmem:[%s3999_s19] ss:$0 sm:$0xff] }
 0xdf8   : > { %2306 = vadd.xlane.f32.xlu1 %v2303_v5  ;;  %2968 = vmatpush3.bf16.msra.mxu0 %v3203_v54  ;;  %v2326_v11 = vrot.slane %v2322_v33, %v3643_v12 }
 0xdf9   : > { %2969 = vmatprep.subr.bf16.mxu0 %v3316_v51 }
 0xdfc   : > { %2970 = vmatpush3.bf16.msra.mxu0 %v3204_v0 }
 0xdfd   : > { %2971 = vmatprep.subr.bf16.mxu0 %v3316_v51 }
 0xe00   : > { %2972 = vmatpush3.bf16.msra.mxu0 %v3205_v1 }
 0xe01   : > { %2973 = vmatprep.subr.bf16.mxu0 %v3316_v51 }
 0xe04   : > { %2974 = vmatpush3.bf16.msra.mxu0 %v3206_v2 }
 0xe05   : > { %2975 = vmatprep.subr.bf16.mxu0 %v3316_v51 }
 0xe08   : > { %2976 = vmatpush3.bf16.msra.mxu0 %v3207_v8 }
 0xe09   : > { %2977 = vmatprep.subr.bf16.mxu0 %v3316_v51 }
 0xe0c   : > { %2978 = vmatpush3.bf16.msra.mxu0 %v3208_v10 }
 0xe0d   : > { %2979 = vmatprep.subr.bf16.mxu0 %v3316_v51 }
 0xe10   : > { %2980 = vmatpush3.bf16.msra.mxu0 %v3209_v13 }
 0xe7b   : > { %v2297_v15 = vpop.xlane.xlu0 %2296 }
 0xe7c   : > { %v2300_v30 = vmul.f32 0.015625, %v2297_v15 }
 0xe7d   : > { %v2305_v16 = vpop.xlane.xlu1 %2304 }
 0xe7e   : > { %v2310_v17 = vmul.f32 %v2300_v30, %v2300_v30  ;;  %v2308_v18 = vmul.f32 0.015625, %v2305_v16  ;;  %v2314_v44 = vsub.f32 %v2287_v59, %v2300_v30 }
 0xe7f   : > { %v2299_v19 = vpop.xlane.xlu0 %2298 }
 0xe80   : > { %v2312_v20 = vsub.f32 %v2308_v18, %v2310_v17  ;;  %v2301_v21 = vmul.f32 0.015625, %v2299_v19 }
 0xe81   : > { %v2307_v25 = vpop.xlane.xlu1 %2306 }
 0xe82   : > { %v2316_v26 = vadd.f32 1e-06, %v2312_v20  ;;  %v2311_v27 = vmul.f32 %v2301_v21, %v2301_v21  ;;  %v2309_v28 = vmul.f32 0.015625, %v2307_v25  ;;  %v2315_v35 = vsub.f32 %v2288_v61, %v2301_v21 }
 0xe84   : > { %3210 = vrsqrt.f32 %v2316_v26  ;;  %v2313_v29 = vsub.f32 %v2309_v28, %v2311_v27 }
 0xe86   : > { %v2317_v31 = vadd.f32 1e-06, %v2313_v29 }
 0xe88   : > { %3212 = vrsqrt.f32 %v2317_v31 }
 0xe91   : > { %v3211_v34 = vpop.eup %3210 }
 0xe92   : > { %v2320_v3 = vmul.f32 %v3211_v34, %v2314_v44 }
 0xe94   : > { %v2327_v36 = vmul.f32 %v2326_v11, %v2320_v3 }
 0xe95   : > { %v3213_v9 = vpop.eup %3212 }
 0xe96   : > { %v2321_v14 = vmul.f32 %v3213_v9, %v2315_v35  ;;  %v2333_v43 = vadd.f32 %v2332_v37, %v2327_v36 }
 0xe98   : > { %v2328_v38 = vmul.f32 %v2326_v11, %v2321_v14 }
 0xe9a   : > { %v2334_v39 = vadd.f32 %v2332_v37, %v2328_v38 }
 0xe9c   : > { %v2335_v40 = vpack.c.bf16 %v2334_v39, %v2333_v43 }
 0xe9e   : > { %2982 = vmatmul.mubr.bf16.vlgmr.msra.gmra.mxu0 %v2335_v40 }
 0xf5e   : > { %v2441_v41 = vpop.f32.mrf.mxu0 }
 0xf5f   : > { %v2442_v46 = vadd.f32 %v2761_v6, %v2441_v41 }
 0xf60   : > { %v2983_v42 = vpop.f32.mrf.mxu0 }
 0xf61   : > { %2448 = vst [vmem:[%s3543_s30] sm:$0xff] %v2442_v46 }
 0xf62   : > { %v2444_v12 = vpop.f32.mrf.mxu0 }
 0xf63   : > { %v2445_v45 = vadd.f32 %v2761_v6, %v2444_v12 }
 0xf64   : > { %v2984_v48 = vpop.f32.mrf.mxu0 }
 0xf65   : > { %2449 = vst [vmem:[%s3543_s30 + $0x8] sm:$0xff] %v2445_v45 }
 0xf66 PF: > { %s4000_s5 = sld [smem:[#allocation9_spill]]  ;;  %s2464_s22 = sshll.u32 %s3543_s30, 4  ;;  %s3874_s22 = int_to_ptr.vmem [resolvable:$true] %s2464_s22 }
 0xf67   : > { %s4001_s21 = sld [smem:[#allocation7_spill]]  ;;  %s3214_s23 = scalar_lea.vmem %s3874_s22, 256 }
 0xf68   : > { %s4003_s28 = sld [smem:[#allocation28_spill]]  ;;  %p3215_p2 = scmp.ne.s32.totalorder %s3874_s22, %s3214_s23 }
 0xf69   : > { %s3318_s0 = smov [#allocation3]  }
 0xf6a   : > { %p3216_p4 = pnand %p3215_p2, %p3455_p3  ;;  %s3218_s29 = sshll.u32 %s3318_s0, 4  ;;  %s3219_s29 = int_to_ptr.vmem [resolvable:$false] %s3218_s29 }
 0xf6b   : > { %s3220_s3 = scalar_lea.vmem %s3219_s29, 512  ;;  %p3221_p6 = scmp.lt.s32.totalorder %s3874_s22, %s3219_s29 }
 0xf6c   : > { %s2779_s26 = sshll.u32 %s4000_s5, 8  ;;  %p3217_p5 = pneg %p3216_p4 }
 0xf6d   : > { %s4005_s4 = sand.u32 1, %s4001_s21   ;;  %p3222_p7 = scmp.lt.s32.totalorder %s3220_s3, %s3214_s23 }
 0xf6e   : > { %s4004_s16 = smov %s4003_s28  ;;  %s3871_s18 = scalar_lea.hbm %s4003_s28, %s2779_s26 }
 0xf6f   : > { %s3878_s14 = scalar_lea.sflag [#allocation4], %s4005_s4  ;;  %p3223_p8 = por %p3222_p7, %p3221_p6 }
 0xf71   : > { %p3224_p10 = pnand %p3223_p8, %p3217_p5 }
 0xf73   : > { %3227 = shalt.err (!%p3224_p10)
}
 0xf74   : > { %s3228_s30 = scalar_lea.hbm %s3871_s18, 256  ;;  %s3232_s1 = scalar_lea.hbm %s4004_s16, 512 }
 0xf75   : > { %p3229_p11 = scmp.ne.s32.totalorder %s3871_s18, %s3228_s30  ;;  %p3233_p0 = scmp.lt.s32.totalorder %s3871_s18, %s4004_s16 }
 0xf76   : > { %p3234_p1 = scmp.lt.s32.totalorder %s3232_s1, %s3228_s30 }
 0xf77   : > { %p3230_p12 = pnand %p3229_p11, %p3455_p3 }
 0xf78   : > { %p3235_p2 = por %p3234_p1, %p3233_p0 }
 0xf79   : > { %p3231_p13 = pneg %p3230_p12 }
 0xf7b   : > { %p3236_p4 = pnand %p3235_p2, %p3231_p13 }
 0xf7d   : > { %3239 = shalt.err (!%p3236_p4)
}
 0xf7e   : > { %s3319_s21 = smov 128   ;;  %s3320_s26 = smov 8  }
 0xf7f   : > { %2987 = dma.vmem_to_hbm [thread:$0]  (%p3455_p3), %s3874_s22, 256, %s3871_s18, %s3878_s14, %s3319_s21, %s3319_s21, %s3320_s26  }
 0xf80 PF: > { %s4006_s24 = sld [smem:[#allocation12_spill]] }
 0xf81   : > { %s4007_s17 = sld [smem:[#allocation6_spill]] }
 0xf86   : > { %p2993_p5 = scmp.ge.s32.totalorder %s4006_s24, 2 }
 0xf87   : > { %s2479_s4 = sand.u32 1, %s4007_s17  }
 0xf88   : > { %p2990_p6 = pnand %p2993_p5, %p3465_p9  ;;  %s2480_s23 = scalar_lea.sflag [#allocation4], %s2479_s4 }
 0xf8a   : > { %p2991_p7 = pneg %p2990_p6 }
 0xf8c   : > { %3273 = dma.done.wait (%p2991_p7), %s2480_s23, 256  }
 0xf8d   : > { %3275 = vsyncadd (%p2991_p7), %s2480_s23, 4294967040  ;;  %s29_s28 = sadd.s32 1, %s4006_s24   ;;  %s4009_s21 = sld [smem:[#allocation7_spill]] }
 0xf8e   : > { %p26_p8 = scmp.ge.s32.totalorder %s29_s28, 6   ;;  %s4010_s22 = sld [smem:[#allocation8_spill]] }
 0xf8f   : > { %s4011_s23 = sld [smem:[#allocation17_spill]] }
 0xf90   : > { %s4012_s24 = sld [smem:[#allocation10_spill]]  ;;  %28 = sbr.rel (!%p26_p8) target bundleno = 16 (0x10), region = 157 }
 0xf91   : > { %s4013_s25 = sld [smem:[#allocation11_spill]] }
 0xf92   : > { %s4014_s26 = sld [smem:[#allocation13_spill]] }
 0xf93   : > { %s4015_s27 = sld [smem:[#allocation15_spill]] }
 0xf95   :  { %2485 = vsyncpa [#allocation4], 1 }
 0xf96   :  { %2487 = vsyncpa [#allocation4 + $0x1], 1 }

</bundles_post_ra>
